<compile_context>
chip_gen: v7x
topology: tpu7x:2x2x1
jax: 0.10.0
libtpu: 0.0.40
codegen_flags: <defaults>
</compile_context>

<pallas_src>
import jax
import jax.numpy as jnp
from jax import lax
from jax.experimental import pallas as pl
from jax.experimental.pallas import tpu as pltpu

# ---------------- configuration (small, consistent with the module) ----------------
N_BLOCK = 4
HIDSIZE = 32
TIMESTEPS = 8
HEADS = 4
HEAD_DIM = HIDSIZE // HEADS
POINTWISE_RATIO = 4
MEMORY_SIZE = 16
MAXLEN = MEMORY_SIZE - TIMESTEPS        # KV cache length kept between chunks
LN_EPS = 1e-5
NEG_INF = -1e9


# ------------------------------- Pallas kernel -------------------------------------
def _fused_blocks_kernel(x_ref, sm_ref, first_ref, kc_ref, vc_ref,
                         ln1g_ref, ln1b_ref, wqkv_ref, bqkv_ref, wo_ref, bo_ref,
                         ln2g_ref, ln2b_ref, w0_ref, w1_ref, b1_ref,
                         y_ref, knew_ref, vnew_ref):
    n_block, B, M, H = kc_ref.shape
    BT = x_ref.shape[0]
    T = BT // B
    Tkv = M + T
    D = H // HEADS
    inv_d = 1.0 / float(D)              # muP attention factor (1/d, not 1/sqrt(d))
    bf16 = jnp.bfloat16

    x = x_ref[...]                                            # (B*T, H) f32

    # ---------------- attention bias: built ONCE, shared by all blocks -------------
    # TODO(synk): MaskedAttention source (xf.py) not provided; masking/residual
    # reproduce VPT-style clipped-causal semantics driven by first[:, 0] only.
    f0 = first_ref[...]                                       # (B, 1), 1.0 = reset
    valid = sm_ref[...] * (1.0 - f0)                          # (B, M), 1.0 = usable
    # pad with ones over the current-chunk columns (always "valid"; causality below)
    valid_pad = jnp.concatenate([valid, jnp.ones((B, T), jnp.float32)], axis=-1)

    colM = lax.broadcasted_iota(jnp.int32, (T, Tkv), 1)
    rowM = lax.broadcasted_iota(jnp.int32, (T, Tkv), 0)
    geom = ((colM < M) & (colM >= rowM)) | ((colM >= M) & ((colM - M) <= rowM))
    ok = geom[None] & (valid_pad[:, None, :] > 0.5)           # (B, T, Tkv)
    small_bias = jnp.where(ok, 0.0, NEG_INF)                  # per-head additive bias

    # expand to the head-block-diagonal bias used by the stacked-head matmuls
    neg_blk = jnp.full((B, T, Tkv), NEG_INF, jnp.float32)
    rows = []
    for h in range(HEADS):
        rows.append(jnp.concatenate(
            [small_bias if h2 == h else neg_blk for h2 in range(HEADS)], axis=-1))
    bias = jnp.concatenate(rows, axis=1)                      # (B, HEADS*T, HEADS*Tkv)

    for blk in range(n_block):          # static unroll; all weights already in VMEM
        # ---- pre_r_ln : nn.LayerNorm(hidsize) (f32) ----
        mu = jnp.mean(x, axis=-1, keepdims=True)
        var = jnp.mean((x - mu) ** 2, axis=-1, keepdims=True)
        xn = (x - mu) * lax.rsqrt(var + LN_EPS) * ln1g_ref[blk] + ln1b_ref[blk]

        # ---- MaskedAttention (norm='none', use_muP_factor=True, clipped_causal) ----
        qkv = jnp.dot(xn.astype(bf16), wqkv_ref[blk],
                      preferred_element_type=jnp.float32) + bqkv_ref[blk]   # (BT, 3H)
        q = qkv[:, :H].reshape(B, T, H) * inv_d              # fold muP scale into q
        k = qkv[:, H:2 * H].reshape(B, T, H)
        v = qkv[:, 2 * H:].reshape(B, T, H)

        # rolled KV cache for the next chunk; with T >= M this is just the new K/V
        if T >= M:
            knew_ref[blk] = k[:, T - M:, :]
            vnew_ref[blk] = v[:, T - M:, :]
        else:
            knew_ref[blk] = jnp.concatenate([kc_ref[blk][:, T:, :], k], axis=1)
            vnew_ref[blk] = jnp.concatenate([vc_ref[blk][:, T:, :], v], axis=1)

        k_full = jnp.concatenate([kc_ref[blk], k], axis=1)    # (B, Tkv, H) f32
        v_full = jnp.concatenate([vc_ref[blk], v], axis=1)

        # stack heads along the row axis -> two batched matmuls cover all heads;
        # the block-diagonal bias masks cross-head products exactly to -inf.
        qs = jnp.concatenate([q[:, :, h * D:(h + 1) * D] for h in range(HEADS)],
                             axis=1).astype(bf16)             # (B, HEADS*T, D)
        ks = jnp.concatenate([k_full[:, :, h * D:(h + 1) * D] for h in range(HEADS)],
                             axis=1).astype(bf16)             # (B, HEADS*Tkv, D)
        vs = jnp.concatenate([v_full[:, :, h * D:(h + 1) * D] for h in range(HEADS)],
                             axis=1).astype(bf16)             # (B, HEADS*Tkv, D)

        logits = jnp.einsum('bxd,byd->bxy', qs, ks,
                            preferred_element_type=jnp.float32) + bias
        m = jnp.max(logits, axis=-1, keepdims=True)
        p = jnp.exp(logits - m)
        p = p * pl.reciprocal(jnp.sum(p, axis=-1, keepdims=True), approx=True)
        av = jnp.einsum('bxy,byd->bxd', p.astype(bf16), vs,
                        preferred_element_type=jnp.float32)   # (B, HEADS*T, D)

        attn = jnp.concatenate([av[:, h * T:(h + 1) * T, :] for h in range(HEADS)],
                               axis=-1).reshape(BT, H)        # (BT, H) f32
        attn = jnp.dot(attn.astype(bf16), wo_ref[blk],
                       preferred_element_type=jnp.float32) + bo_ref[blk]

        # residual inside VPT's SelfAttentionLayer: X + R with X = pre_r_ln output
        x1 = xn + attn

        # ---- mlp0: LayerNorm -> Linear(H, 4H, bias=False) -> ReLU ----
        mu2 = jnp.mean(x1, axis=-1, keepdims=True)
        var2 = jnp.mean((x1 - mu2) ** 2, axis=-1, keepdims=True)
        x1n = (x1 - mu2) * lax.rsqrt(var2 + LN_EPS) * ln2g_ref[blk] + ln2b_ref[blk]
        h0 = jnp.maximum(
            jnp.dot(x1n.astype(bf16), w0_ref[blk],
                    preferred_element_type=jnp.float32), 0.0)
        # ---- mlp1: Linear(4H, H, bias), no activation; Dropout(p=0.2) == identity ----
        h1 = jnp.dot(h0.astype(bf16), w1_ref[blk],
                     preferred_element_type=jnp.float32) + b1_ref[blk]
        x = h1 + x1

    y_ref[...] = x.astype(y_ref.dtype)


# ------------------------------ forward wrapper -------------------------------------
def residual_recurrent_blocks_forward(params, x, first, state):
    """params: dict of per-block arrays stacked along a leading N_BLOCK axis
               (matmul weights stored bfloat16, everything else float32).
    state: pre-stacked tuple (mask (B, M) bool  -- shared by all blocks,
                              K (N_BLOCK, B, M, H) f32, V (N_BLOCK, B, M, H) f32)."""
    state_mask, k_cache, v_cache = state
    n_block = params["w_qkv"].shape[0]
    assert k_cache.shape[0] == n_block, (
        f"Length of state {k_cache.shape[0]} did not match length of blocks {n_block}")
    B, T, H = x.shape
    M = k_cache.shape[2]

    sm_f = state_mask.astype(jnp.float32)                     # (B, M)
    first_f = first[:, 0:1].astype(jnp.float32)               # (B, 1), reset at chunk start

    vmem = pl.BlockSpec(memory_space=pltpu.MemorySpace.VMEM)  # whole array resident in VMEM
    y_flat, k_new, v_new = pl.pallas_call(
        _fused_blocks_kernel,
        in_specs=[vmem] * 16,
        out_specs=[vmem] * 3,
        out_shape=[
            jax.ShapeDtypeStruct((B * T, H), jnp.float32),
            jax.ShapeDtypeStruct((n_block, B, M, H), jnp.float32),
            jax.ShapeDtypeStruct((n_block, B, M, H), jnp.float32),
        ],
        # update the KV caches in place (inputs 3/4 -> outputs 1/2)
        input_output_aliases={3: 1, 4: 2},
    )(x.reshape(B * T, H), sm_f, first_f, k_cache, v_cache,
      params["ln1_g"], params["ln1_b"], params["w_qkv"], params["b_qkv"],
      params["w_o"], params["b_o"], params["ln2_g"], params["ln2_b"],
      params["w0"], params["w1"], params["b1"])
    y = y_flat.reshape(B, T, H)

    # state-mask roll; with T >= M it is a compile-time constant of ones
    if T >= M:
        new_mask = jnp.ones((B, M), jnp.bool_)
    else:
        keep = state_mask & (~first[:, 0:1])
        new_mask = jnp.concatenate([keep, jnp.ones((B, T), jnp.bool_)], axis=-1)[:, -M:]
    return y, (new_mask, k_new, v_new)


# ------------------------------ parameter init --------------------------------------
def _fanin_linear(key, fan_in, fan_out, init_scale):
    """FanInInitReLULayer init: each output unit's fan-in vector has L2 norm init_scale."""
    w = jax.random.normal(key, (fan_in, fan_out), jnp.float32)
    return w * (init_scale / jnp.linalg.norm(w, axis=0, keepdims=True))


def init_params(key, n_block=N_BLOCK, hidsize=HIDSIZE):
    s = (n_block ** -0.5) * (2.0 ** -0.5)     # init_scale passed down to mlp1 / attn proj
    blocks = []
    for i in range(n_block):
        k = jax.random.fold_in(key, i)
        ks = jax.random.split(k, 4)
        H = hidsize
        blocks.append(dict(
            ln1_g=jnp.ones((1, H), jnp.float32),
            ln1_b=jnp.zeros((1, H), jnp.float32),
            w_qkv=_fanin_linear(ks[0], H, 3 * H, 1.0),
            b_qkv=jnp.zeros((1, 3 * H), jnp.float32),
            w_o=_fanin_linear(ks[1], H, H, s),
            b_o=jnp.zeros((1, H), jnp.float32),
            ln2_g=jnp.ones((1, H), jnp.float32),
            ln2_b=jnp.zeros((1, H), jnp.float32),
            w0=_fanin_linear(ks[2], H, H * POINTWISE_RATIO, 1.0),
            w1=_fanin_linear(ks[3], H * POINTWISE_RATIO, H, s),
            b1=jnp.zeros((1, H), jnp.float32),   # mlp1 bias zero-initialized
        ))
    # stack per-block params along a leading block axis for the fused kernel
    stacked = {name: jnp.stack([b[name] for b in blocks], axis=0) for name in blocks[0]}
    # matmul weights feed the MXU in bf16 (f32 accumulation inside the kernel)
    for name in ("w_qkv", "w_o", "w0", "w1"):
        stacked[name] = stacked[name].astype(jnp.bfloat16)
    return stacked


def initial_state(batchsize, n_block=N_BLOCK):
    # pre-stacked recurrent state: (shared mask, stacked K cache, stacked V cache)
    return (jnp.zeros((batchsize, MAXLEN), jnp.bool_),
            jnp.zeros((n_block, batchsize, MAXLEN, HIDSIZE), jnp.float32),
            jnp.zeros((n_block, batchsize, MAXLEN, HIDSIZE), jnp.float32))


# ---------------------------------- main ---------------------------------------------
if __name__ == "__main__":
    key = jax.random.PRNGKey(0)
    kx, kp = jax.random.split(key)

    B, T, H = 2, TIMESTEPS, HIDSIZE
    x = jax.random.normal(kx, (B, T, H), jnp.float32)
    first = jnp.zeros((B, T), jnp.bool_).at[:, 0].set(True)
    params = init_params(kp)
    state = initial_state(B)

    fwd = jax.jit(residual_recurrent_blocks_forward)
    y, state_out = fwd(params, x, first, state)
    jax.block_until_ready((y, state_out))

    # second recurrent step to exercise the cache/mask path and in-place aliasing
    y2, state_out2 = fwd(params, y, jnp.zeros((B, T), jnp.bool_), state_out)
    jax.block_until_ready((y2, state_out2))

    assert y.shape == (B, T, H) and y2.shape == (B, T, H)
    assert state_out[1].shape == (N_BLOCK, B, MAXLEN, H)
    assert bool(jnp.isfinite(y).all()) and bool(jnp.isfinite(y2).all())
    print("KERNEL_OK")
</pallas_src>

<mosaic_0001>
module attributes {stable_mosaic.version = 11 : i64} {
  func.func @_fused_blocks_kernel(%arg0: memref<16x32xf32, #tpu.memory_space<vmem>>, %arg1: memref<2x8xf32, #tpu.memory_space<vmem>>, %arg2: memref<2x1xf32, #tpu.memory_space<vmem>>, %arg3: memref<4x2x8x32xf32, #tpu.memory_space<vmem>>, %arg4: memref<4x2x8x32xf32, #tpu.memory_space<vmem>>, %arg5: memref<4x1x32xf32, #tpu.memory_space<vmem>>, %arg6: memref<4x1x32xf32, #tpu.memory_space<vmem>>, %arg7: memref<4x32x96xbf16, #tpu.memory_space<vmem>>, %arg8: memref<4x1x96xf32, #tpu.memory_space<vmem>>, %arg9: memref<4x32x32xbf16, #tpu.memory_space<vmem>>, %arg10: memref<4x1x32xf32, #tpu.memory_space<vmem>>, %arg11: memref<4x1x32xf32, #tpu.memory_space<vmem>>, %arg12: memref<4x1x32xf32, #tpu.memory_space<vmem>>, %arg13: memref<4x32x128xbf16, #tpu.memory_space<vmem>>, %arg14: memref<4x128x32xbf16, #tpu.memory_space<vmem>>, %arg15: memref<4x1x32xf32, #tpu.memory_space<vmem>>, %arg16: memref<16x32xf32, #tpu.memory_space<vmem>>, %arg17: memref<4x2x8x32xf32, #tpu.memory_space<vmem>>, %arg18: memref<4x2x8x32xf32, #tpu.memory_space<vmem>>) attributes {dimension_semantics = [], scalar_prefetch = 0 : i64, scratch_operands = 0 : i64, tpu.core_type = #tpu.core_type<tc>} {
    %c0 = arith.constant 0 : index
    %c0_0 = arith.constant 0 : index
    %0 = vector.load %arg0[%c0, %c0_0] : memref<16x32xf32, #tpu.memory_space<vmem>>, vector<16x32xf32>
    %c0_1 = arith.constant 0 : index
    %c0_2 = arith.constant 0 : index
    %1 = vector.load %arg2[%c0_1, %c0_2] : memref<2x1xf32, #tpu.memory_space<vmem>>, vector<2x1xf32>
    %c0_3 = arith.constant 0 : index
    %c0_4 = arith.constant 0 : index
    %2 = vector.load %arg1[%c0_3, %c0_4] : memref<2x8xf32, #tpu.memory_space<vmem>>, vector<2x8xf32>
    %cst = arith.constant 1.000000e+00 : f32
    %3 = vector.broadcast %cst : f32 to vector<2x1xf32>
    %4 = arith.subf %3, %1 : vector<2x1xf32>
    %5 = vector.broadcast %4 : vector<2x1xf32> to vector<2x8xf32>
    %6 = arith.mulf %2, %5 : vector<2x8xf32>
    %cst_5 = arith.constant 1.000000e+00 : f32
    %7 = vector.broadcast %cst_5 : f32 to vector<2x8xf32>
    %8 = tpu.concatenate %6, %7 in 1 : vector<2x8xf32>, vector<2x8xf32> -> vector<2x16xf32>
    %9 = tpu.iota {dimensions = array<i32: 1>} : vector<8x16xi32>
    %10 = tpu.iota {dimensions = array<i32: 0>} : vector<8x16xi32>
    %c8_i32 = arith.constant 8 : i32
    %11 = vector.broadcast %c8_i32 : i32 to vector<8x16xi32>
    %12 = arith.cmpi slt, %9, %11 : vector<8x16xi32>
    %13 = arith.cmpi sge, %9, %10 : vector<8x16xi32>
    %14 = arith.andi %12, %13 : vector<8x16xi1>
    %c8_i32_6 = arith.constant 8 : i32
    %15 = vector.broadcast %c8_i32_6 : i32 to vector<8x16xi32>
    %16 = arith.cmpi sge, %9, %15 : vector<8x16xi32>
    %c8_i32_7 = arith.constant 8 : i32
    %17 = vector.broadcast %c8_i32_7 : i32 to vector<8x16xi32>
    %18 = arith.subi %9, %17 : vector<8x16xi32>
    %19 = arith.cmpi sle, %18, %10 : vector<8x16xi32>
    %20 = arith.andi %16, %19 : vector<8x16xi1>
    %21 = arith.ori %14, %20 : vector<8x16xi1>
    %22 = vector.shape_cast %21 : vector<8x16xi1> to vector<1x8x16xi1>
    %23 = vector.shape_cast %8 : vector<2x16xf32> to vector<2x1x16xf32>
    %cst_8 = arith.constant 5.000000e-01 : f32
    %24 = vector.broadcast %cst_8 : f32 to vector<2x1x16xf32>
    %25 = arith.cmpf ogt, %23, %24 : vector<2x1x16xf32>
    %26 = vector.broadcast %22 : vector<1x8x16xi1> to vector<2x8x16xi1>
    %27 = vector.broadcast %25 : vector<2x1x16xi1> to vector<2x8x16xi1>
    %28 = arith.andi %26, %27 : vector<2x8x16xi1>
    %cst_9 = arith.constant 0.000000e+00 : f32
    %cst_10 = arith.constant -1.000000e+09 : f32
    %29 = vector.broadcast %cst_9 : f32 to vector<2x8x16xf32>
    %30 = vector.broadcast %cst_10 : f32 to vector<2x8x16xf32>
    %31 = arith.select %28, %29, %30 : vector<2x8x16xi1>, vector<2x8x16xf32>
    %cst_11 = arith.constant -1.000000e+09 : f32
    %32 = vector.broadcast %cst_11 : f32 to vector<2x8x16xf32>
    %33 = tpu.concatenate %31, %32, %32, %32 in 2 : vector<2x8x16xf32>, vector<2x8x16xf32>, vector<2x8x16xf32>, vector<2x8x16xf32> -> vector<2x8x64xf32>
    %34 = tpu.concatenate %32, %31, %32, %32 in 2 : vector<2x8x16xf32>, vector<2x8x16xf32>, vector<2x8x16xf32>, vector<2x8x16xf32> -> vector<2x8x64xf32>
    %35 = tpu.concatenate %32, %32, %31, %32 in 2 : vector<2x8x16xf32>, vector<2x8x16xf32>, vector<2x8x16xf32>, vector<2x8x16xf32> -> vector<2x8x64xf32>
    %36 = tpu.concatenate %32, %32, %32, %31 in 2 : vector<2x8x16xf32>, vector<2x8x16xf32>, vector<2x8x16xf32>, vector<2x8x16xf32> -> vector<2x8x64xf32>
    %37 = tpu.concatenate %33, %34, %35, %36 in 1 : vector<2x8x64xf32>, vector<2x8x64xf32>, vector<2x8x64xf32>, vector<2x8x64xf32> -> vector<2x32x64xf32>
    %cst_12 = arith.constant dense<0.000000e+00> : vector<16xf32>
    %38 = vector.multi_reduction <add>, %0, %cst_12 [1] : vector<16x32xf32> to vector<16xf32>
    %39 = vector.shape_cast %38 : vector<16xf32> to vector<16x1xf32>
    %cst_13 = arith.constant 3.200000e+01 : f32
    %40 = vector.broadcast %cst_13 : f32 to vector<16x1xf32>
    %41 = arith.divf %39, %40 : vector<16x1xf32>
    %42 = vector.broadcast %41 : vector<16x1xf32> to vector<16x32xf32>
    %43 = arith.subf %0, %42 : vector<16x32xf32>
    %44 = arith.mulf %43, %43 : vector<16x32xf32>
    %cst_14 = arith.constant dense<0.000000e+00> : vector<16xf32>
    %45 = vector.multi_reduction <add>, %44, %cst_14 [1] : vector<16x32xf32> to vector<16xf32>
    %46 = vector.shape_cast %45 : vector<16xf32> to vector<16x1xf32>
    %cst_15 = arith.constant 3.200000e+01 : f32
    %47 = vector.broadcast %cst_15 : f32 to vector<16x1xf32>
    %48 = arith.divf %46, %47 : vector<16x1xf32>
    %49 = vector.broadcast %41 : vector<16x1xf32> to vector<16x32xf32>
    %50 = arith.subf %0, %49 : vector<16x32xf32>
    %cst_16 = arith.constant 9.99999974E-6 : f32
    %51 = vector.broadcast %cst_16 : f32 to vector<16x1xf32>
    %52 = arith.addf %48, %51 : vector<16x1xf32>
    %53 = math.rsqrt %52 : vector<16x1xf32>
    %54 = vector.broadcast %53 : vector<16x1xf32> to vector<16x32xf32>
    %55 = arith.mulf %50, %54 : vector<16x32xf32>
    %c0_17 = arith.constant 0 : index
    %c0_18 = arith.constant 0 : index
    %c0_19 = arith.constant 0 : index
    %56 = vector.load %arg5[%c0_17, %c0_18, %c0_19] : memref<4x1x32xf32, #tpu.memory_space<vmem>>, vector<1x1x32xf32>
    %57 = vector.shape_cast %56 : vector<1x1x32xf32> to vector<1x32xf32>
    %58 = vector.broadcast %57 : vector<1x32xf32> to vector<16x32xf32>
    %59 = arith.mulf %55, %58 : vector<16x32xf32>
    %c0_20 = arith.constant 0 : index
    %c0_21 = arith.constant 0 : index
    %c0_22 = arith.constant 0 : index
    %60 = vector.load %arg6[%c0_20, %c0_21, %c0_22] : memref<4x1x32xf32, #tpu.memory_space<vmem>>, vector<1x1x32xf32>
    %61 = vector.shape_cast %60 : vector<1x1x32xf32> to vector<1x32xf32>
    %62 = vector.broadcast %61 : vector<1x32xf32> to vector<16x32xf32>
    %63 = arith.addf %59, %62 : vector<16x32xf32>
    %64 = arith.truncf %63 : vector<16x32xf32> to vector<16x32xbf16>
    %c0_23 = arith.constant 0 : index
    %c0_24 = arith.constant 0 : index
    %c0_25 = arith.constant 0 : index
    %65 = vector.load %arg7[%c0_23, %c0_24, %c0_25] : memref<4x32x96xbf16, #tpu.memory_space<vmem>>, vector<1x32x96xbf16>
    %66 = vector.shape_cast %65 : vector<1x32x96xbf16> to vector<32x96xbf16>
    %cst_26 = arith.constant dense<0.000000e+00> : vector<16x96xf32>
    %67 = tpu.matmul %64, %66, %cst_26 {dimension_numbers = #tpu.dot_dimension_numbers<[1], [0], [0], [1], [0, 0, 1, 1], [], []>} : vector<16x32xbf16>, vector<32x96xbf16>, vector<16x96xf32> -> vector<16x96xf32>
    %c0_27 = arith.constant 0 : index
    %c0_28 = arith.constant 0 : index
    %c0_29 = arith.constant 0 : index
    %68 = vector.load %arg8[%c0_27, %c0_28, %c0_29] : memref<4x1x96xf32, #tpu.memory_space<vmem>>, vector<1x1x96xf32>
    %69 = vector.shape_cast %68 : vector<1x1x96xf32> to vector<1x96xf32>
    %70 = vector.broadcast %69 : vector<1x96xf32> to vector<16x96xf32>
    %71 = arith.addf %67, %70 : vector<16x96xf32>
    %72 = vector.extract_strided_slice %71 {offsets = [0, 0], sizes = [16, 32], strides = [1, 1]} : vector<16x96xf32> to vector<16x32xf32>
    %73 = vector.shape_cast %72 : vector<16x32xf32> to vector<2x8x32xf32>
    %cst_30 = arith.constant 1.250000e-01 : f32
    %74 = vector.broadcast %cst_30 : f32 to vector<2x8x32xf32>
    %75 = arith.mulf %73, %74 : vector<2x8x32xf32>
    %76 = vector.extract_strided_slice %71 {offsets = [0, 32], sizes = [16, 32], strides = [1, 1]} : vector<16x96xf32> to vector<16x32xf32>
    %77 = vector.shape_cast %76 : vector<16x32xf32> to vector<2x8x32xf32>
    %78 = vector.extract_strided_slice %71 {offsets = [0, 64], sizes = [16, 32], strides = [1, 1]} : vector<16x96xf32> to vector<16x32xf32>
    %79 = vector.shape_cast %78 : vector<16x32xf32> to vector<2x8x32xf32>
    %c0_31 = arith.constant 0 : index
    %c0_32 = arith.constant 0 : index
    %c0_33 = arith.constant 0 : index
    %c0_34 = arith.constant 0 : index
    %80 = vector.load %arg17[%c0_31, %c0_32, %c0_33, %c0_34] : memref<4x2x8x32xf32, #tpu.memory_space<vmem>>, vector<1x2x8x32xf32>
    %81 = vector.shape_cast %80 : vector<1x2x8x32xf32> to vector<2x8x32xf32>
    %82 = vector.shape_cast %77 : vector<2x8x32xf32> to vector<1x2x8x32xf32>
    tpu.vector_store %arg17[%c0_31, %c0_32, %c0_33, %c0_34], %82 {strides = array<i32>} : memref<4x2x8x32xf32, #tpu.memory_space<vmem>>, vector<1x2x8x32xf32>,
    %c0_35 = arith.constant 0 : index
    %c0_36 = arith.constant 0 : index
    %c0_37 = arith.constant 0 : index
    %c0_38 = arith.constant 0 : index
    %83 = vector.load %arg18[%c0_35, %c0_36, %c0_37, %c0_38] : memref<4x2x8x32xf32, #tpu.memory_space<vmem>>, vector<1x2x8x32xf32>
    %84 = vector.shape_cast %83 : vector<1x2x8x32xf32> to vector<2x8x32xf32>
    %85 = vector.shape_cast %79 : vector<2x8x32xf32> to vector<1x2x8x32xf32>
    tpu.vector_store %arg18[%c0_35, %c0_36, %c0_37, %c0_38], %85 {strides = array<i32>} : memref<4x2x8x32xf32, #tpu.memory_space<vmem>>, vector<1x2x8x32xf32>,
    %c0_39 = arith.constant 0 : index
    %c0_40 = arith.constant 0 : index
    %c0_41 = arith.constant 0 : index
    %c0_42 = arith.constant 0 : index
    %86 = vector.load %arg3[%c0_39, %c0_40, %c0_41, %c0_42] : memref<4x2x8x32xf32, #tpu.memory_space<vmem>>, vector<1x2x8x32xf32>
    %87 = vector.shape_cast %86 : vector<1x2x8x32xf32> to vector<2x8x32xf32>
    %88 = tpu.concatenate %87, %77 in 1 : vector<2x8x32xf32>, vector<2x8x32xf32> -> vector<2x16x32xf32>
    %c0_43 = arith.constant 0 : index
    %c0_44 = arith.constant 0 : index
    %c0_45 = arith.constant 0 : index
    %c0_46 = arith.constant 0 : index
    %89 = vector.load %arg4[%c0_43, %c0_44, %c0_45, %c0_46] : memref<4x2x8x32xf32, #tpu.memory_space<vmem>>, vector<1x2x8x32xf32>
    %90 = vector.shape_cast %89 : vector<1x2x8x32xf32> to vector<2x8x32xf32>
    %91 = tpu.concatenate %90, %79 in 1 : vector<2x8x32xf32>, vector<2x8x32xf32> -> vector<2x16x32xf32>
    %92 = vector.extract_strided_slice %75 {offsets = [0, 0, 0], sizes = [2, 8, 8], strides = [1, 1, 1]} : vector<2x8x32xf32> to vector<2x8x8xf32>
    %93 = vector.extract_strided_slice %75 {offsets = [0, 0, 8], sizes = [2, 8, 8], strides = [1, 1, 1]} : vector<2x8x32xf32> to vector<2x8x8xf32>
    %94 = vector.extract_strided_slice %75 {offsets = [0, 0, 16], sizes = [2, 8, 8], strides = [1, 1, 1]} : vector<2x8x32xf32> to vector<2x8x8xf32>
    %95 = vector.extract_strided_slice %75 {offsets = [0, 0, 24], sizes = [2, 8, 8], strides = [1, 1, 1]} : vector<2x8x32xf32> to vector<2x8x8xf32>
    %96 = tpu.concatenate %92, %93, %94, %95 in 1 : vector<2x8x8xf32>, vector<2x8x8xf32>, vector<2x8x8xf32>, vector<2x8x8xf32> -> vector<2x32x8xf32>
    %97 = arith.truncf %96 : vector<2x32x8xf32> to vector<2x32x8xbf16>
    %98 = vector.extract_strided_slice %88 {offsets = [0, 0, 0], sizes = [2, 16, 8], strides = [1, 1, 1]} : vector<2x16x32xf32> to vector<2x16x8xf32>
    %99 = vector.extract_strided_slice %88 {offsets = [0, 0, 8], sizes = [2, 16, 8], strides = [1, 1, 1]} : vector<2x16x32xf32> to vector<2x16x8xf32>
    %100 = vector.extract_strided_slice %88 {offsets = [0, 0, 16], sizes = [2, 16, 8], strides = [1, 1, 1]} : vector<2x16x32xf32> to vector<2x16x8xf32>
    %101 = vector.extract_strided_slice %88 {offsets = [0, 0, 24], sizes = [2, 16, 8], strides = [1, 1, 1]} : vector<2x16x32xf32> to vector<2x16x8xf32>
    %102 = tpu.concatenate %98, %99, %100, %101 in 1 : vector<2x16x8xf32>, vector<2x16x8xf32>, vector<2x16x8xf32>, vector<2x16x8xf32> -> vector<2x64x8xf32>
    %103 = arith.truncf %102 : vector<2x64x8xf32> to vector<2x64x8xbf16>
    %104 = vector.extract_strided_slice %91 {offsets = [0, 0, 0], sizes = [2, 16, 8], strides = [1, 1, 1]} : vector<2x16x32xf32> to vector<2x16x8xf32>
    %105 = vector.extract_strided_slice %91 {offsets = [0, 0, 8], sizes = [2, 16, 8], strides = [1, 1, 1]} : vector<2x16x32xf32> to vector<2x16x8xf32>
    %106 = vector.extract_strided_slice %91 {offsets = [0, 0, 16], sizes = [2, 16, 8], strides = [1, 1, 1]} : vector<2x16x32xf32> to vector<2x16x8xf32>
    %107 = vector.extract_strided_slice %91 {offsets = [0, 0, 24], sizes = [2, 16, 8], strides = [1, 1, 1]} : vector<2x16x32xf32> to vector<2x16x8xf32>
    %108 = tpu.concatenate %104, %105, %106, %107 in 1 : vector<2x16x8xf32>, vector<2x16x8xf32>, vector<2x16x8xf32>, vector<2x16x8xf32> -> vector<2x64x8xf32>
    %109 = arith.truncf %108 : vector<2x64x8xf32> to vector<2x64x8xbf16>
    "tpu.trace_start"() <{level = 10 : i32, message = "bxd,byd->bxy"}> : () -> ()
    %cst_47 = arith.constant dense<0.000000e+00> : vector<2x32x64xf32>
    %110 = tpu.matmul %97, %103, %cst_47 {dimension_numbers = #tpu.dot_dimension_numbers<[2], [2], [1], [1], [0, 0, 0, 1, 1, 1], [0], [0]>} : vector<2x32x8xbf16>, vector<2x64x8xbf16>, vector<2x32x64xf32> -> vector<2x32x64xf32>
    "tpu.trace_stop"() : () -> ()
    %111 = arith.addf %110, %37 : vector<2x32x64xf32>
    %cst_48 = arith.constant dense<0xFF800000> : vector<2x32xf32>
    %112 = vector.multi_reduction <maximumf>, %111, %cst_48 [2] : vector<2x32x64xf32> to vector<2x32xf32>
    %113 = vector.shape_cast %112 : vector<2x32xf32> to vector<2x32x1xf32>
    %114 = vector.broadcast %113 : vector<2x32x1xf32> to vector<2x32x64xf32>
    %115 = arith.subf %111, %114 : vector<2x32x64xf32>
    %116 = math.exp %115 : vector<2x32x64xf32>
    %cst_49 = arith.constant dense<0.000000e+00> : vector<2x32xf32>
    %117 = vector.multi_reduction <add>, %116, %cst_49 [2] : vector<2x32x64xf32> to vector<2x32xf32>
    %118 = vector.shape_cast %117 : vector<2x32xf32> to vector<2x32x1xf32>
    %119 = tpu.reciprocal %118 {approx = true} : vector<2x32x1xf32> -> vector<2x32x1xf32>
    %120 = vector.broadcast %119 : vector<2x32x1xf32> to vector<2x32x64xf32>
    %121 = arith.mulf %116, %120 : vector<2x32x64xf32>
    %122 = arith.truncf %121 : vector<2x32x64xf32> to vector<2x32x64xbf16>
    "tpu.trace_start"() <{level = 10 : i32, message = "bxy,byd->bxd"}> : () -> ()
    %cst_50 = arith.constant dense<0.000000e+00> : vector<2x32x8xf32>
    %123 = tpu.matmul %122, %109, %cst_50 {dimension_numbers = #tpu.dot_dimension_numbers<[2], [1], [1], [2], [0, 0, 0, 1, 1, 2], [0], [0]>} : vector<2x32x64xbf16>, vector<2x64x8xbf16>, vector<2x32x8xf32> -> vector<2x32x8xf32>
    "tpu.trace_stop"() : () -> ()
    %124 = vector.extract_strided_slice %123 {offsets = [0, 0, 0], sizes = [2, 8, 8], strides = [1, 1, 1]} : vector<2x32x8xf32> to vector<2x8x8xf32>
    %125 = vector.extract_strided_slice %123 {offsets = [0, 8, 0], sizes = [2, 8, 8], strides = [1, 1, 1]} : vector<2x32x8xf32> to vector<2x8x8xf32>
    %126 = vector.extract_strided_slice %123 {offsets = [0, 16, 0], sizes = [2, 8, 8], strides = [1, 1, 1]} : vector<2x32x8xf32> to vector<2x8x8xf32>
    %127 = vector.extract_strided_slice %123 {offsets = [0, 24, 0], sizes = [2, 8, 8], strides = [1, 1, 1]} : vector<2x32x8xf32> to vector<2x8x8xf32>
    %128 = tpu.concatenate %124, %125, %126, %127 in 2 : vector<2x8x8xf32>, vector<2x8x8xf32>, vector<2x8x8xf32>, vector<2x8x8xf32> -> vector<2x8x32xf32>
    %129 = vector.shape_cast %128 : vector<2x8x32xf32> to vector<16x32xf32>
    %130 = arith.truncf %129 : vector<16x32xf32> to vector<16x32xbf16>
    %c0_51 = arith.constant 0 : index
    %c0_52 = arith.constant 0 : index
    %c0_53 = arith.constant 0 : index
    %131 = vector.load %arg9[%c0_51, %c0_52, %c0_53] : memref<4x32x32xbf16, #tpu.memory_space<vmem>>, vector<1x32x32xbf16>
    %132 = vector.shape_cast %131 : vector<1x32x32xbf16> to vector<32x32xbf16>
    %cst_54 = arith.constant dense<0.000000e+00> : vector<16x32xf32>
    %133 = tpu.matmul %130, %132, %cst_54 {dimension_numbers = #tpu.dot_dimension_numbers<[1], [0], [0], [1], [0, 0, 1, 1], [], []>} : vector<16x32xbf16>, vector<32x32xbf16>, vector<16x32xf32> -> vector<16x32xf32>
    %c0_55 = arith.constant 0 : index
    %c0_56 = arith.constant 0 : index
    %c0_57 = arith.constant 0 : index
    %134 = vector.load %arg10[%c0_55, %c0_56, %c0_57] : memref<4x1x32xf32, #tpu.memory_space<vmem>>, vector<1x1x32xf32>
    %135 = vector.shape_cast %134 : vector<1x1x32xf32> to vector<1x32xf32>
    %136 = vector.broadcast %135 : vector<1x32xf32> to vector<16x32xf32>
    %137 = arith.addf %133, %136 : vector<16x32xf32>
    %138 = arith.addf %63, %137 : vector<16x32xf32>
    %cst_58 = arith.constant dense<0.000000e+00> : vector<16xf32>
    %139 = vector.multi_reduction <add>, %138, %cst_58 [1] : vector<16x32xf32> to vector<16xf32>
    %140 = vector.shape_cast %139 : vector<16xf32> to vector<16x1xf32>
    %cst_59 = arith.constant 3.200000e+01 : f32
    %141 = vector.broadcast %cst_59 : f32 to vector<16x1xf32>
    %142 = arith.divf %140, %141 : vector<16x1xf32>
    %143 = vector.broadcast %142 : vector<16x1xf32> to vector<16x32xf32>
    %144 = arith.subf %138, %143 : vector<16x32xf32>
    %145 = arith.mulf %144, %144 : vector<16x32xf32>
    %cst_60 = arith.constant dense<0.000000e+00> : vector<16xf32>
    %146 = vector.multi_reduction <add>, %145, %cst_60 [1] : vector<16x32xf32> to vector<16xf32>
    %147 = vector.shape_cast %146 : vector<16xf32> to vector<16x1xf32>
    %cst_61 = arith.constant 3.200000e+01 : f32
    %148 = vector.broadcast %cst_61 : f32 to vector<16x1xf32>
    %149 = arith.divf %147, %148 : vector<16x1xf32>
    %150 = vector.broadcast %142 : vector<16x1xf32> to vector<16x32xf32>
    %151 = arith.subf %138, %150 : vector<16x32xf32>
    %cst_62 = arith.constant 9.99999974E-6 : f32
    %152 = vector.broadcast %cst_62 : f32 to vector<16x1xf32>
    %153 = arith.addf %149, %152 : vector<16x1xf32>
    %154 = math.rsqrt %153 : vector<16x1xf32>
    %155 = vector.broadcast %154 : vector<16x1xf32> to vector<16x32xf32>
    %156 = arith.mulf %151, %155 : vector<16x32xf32>
    %c0_63 = arith.constant 0 : index
    %c0_64 = arith.constant 0 : index
    %c0_65 = arith.constant 0 : index
    %157 = vector.load %arg11[%c0_63, %c0_64, %c0_65] : memref<4x1x32xf32, #tpu.memory_space<vmem>>, vector<1x1x32xf32>
    %158 = vector.shape_cast %157 : vector<1x1x32xf32> to vector<1x32xf32>
    %159 = vector.broadcast %158 : vector<1x32xf32> to vector<16x32xf32>
    %160 = arith.mulf %156, %159 : vector<16x32xf32>
    %c0_66 = arith.constant 0 : index
    %c0_67 = arith.constant 0 : index
    %c0_68 = arith.constant 0 : index
    %161 = vector.load %arg12[%c0_66, %c0_67, %c0_68] : memref<4x1x32xf32, #tpu.memory_space<vmem>>, vector<1x1x32xf32>
    %162 = vector.shape_cast %161 : vector<1x1x32xf32> to vector<1x32xf32>
    %163 = vector.broadcast %162 : vector<1x32xf32> to vector<16x32xf32>
    %164 = arith.addf %160, %163 : vector<16x32xf32>
    %165 = arith.truncf %164 : vector<16x32xf32> to vector<16x32xbf16>
    %c0_69 = arith.constant 0 : index
    %c0_70 = arith.constant 0 : index
    %c0_71 = arith.constant 0 : index
    %166 = vector.load %arg13[%c0_69, %c0_70, %c0_71] : memref<4x32x128xbf16, #tpu.memory_space<vmem>>, vector<1x32x128xbf16>
    %167 = vector.shape_cast %166 : vector<1x32x128xbf16> to vector<32x128xbf16>
    %cst_72 = arith.constant dense<0.000000e+00> : vector<16x128xf32>
    %168 = tpu.matmul %165, %167, %cst_72 {dimension_numbers = #tpu.dot_dimension_numbers<[1], [0], [0], [1], [0, 0, 1, 1], [], []>} : vector<16x32xbf16>, vector<32x128xbf16>, vector<16x128xf32> -> vector<16x128xf32>
    %cst_73 = arith.constant 0.000000e+00 : f32
    %169 = vector.broadcast %cst_73 : f32 to vector<16x128xf32>
    %170 = arith.maximumf %168, %169 : vector<16x128xf32>
    %171 = arith.truncf %170 : vector<16x128xf32> to vector<16x128xbf16>
    %c0_74 = arith.constant 0 : index
    %c0_75 = arith.constant 0 : index
    %c0_76 = arith.constant 0 : index
    %172 = vector.load %arg14[%c0_74, %c0_75, %c0_76] : memref<4x128x32xbf16, #tpu.memory_space<vmem>>, vector<1x128x32xbf16>
    %173 = vector.shape_cast %172 : vector<1x128x32xbf16> to vector<128x32xbf16>
    %cst_77 = arith.constant dense<0.000000e+00> : vector<16x32xf32>
    %174 = tpu.matmul %171, %173, %cst_77 {dimension_numbers = #tpu.dot_dimension_numbers<[1], [0], [0], [1], [0, 0, 1, 1], [], []>} : vector<16x128xbf16>, vector<128x32xbf16>, vector<16x32xf32> -> vector<16x32xf32>
    %c0_78 = arith.constant 0 : index
    %c0_79 = arith.constant 0 : index
    %c0_80 = arith.constant 0 : index
    %175 = vector.load %arg15[%c0_78, %c0_79, %c0_80] : memref<4x1x32xf32, #tpu.memory_space<vmem>>, vector<1x1x32xf32>
    %176 = vector.shape_cast %175 : vector<1x1x32xf32> to vector<1x32xf32>
    %177 = vector.broadcast %176 : vector<1x32xf32> to vector<16x32xf32>
    %178 = arith.addf %174, %177 : vector<16x32xf32>
    %179 = arith.addf %178, %138 : vector<16x32xf32>
    %cst_81 = arith.constant dense<0.000000e+00> : vector<16xf32>
    %180 = vector.multi_reduction <add>, %179, %cst_81 [1] : vector<16x32xf32> to vector<16xf32>
    %181 = vector.shape_cast %180 : vector<16xf32> to vector<16x1xf32>
    %cst_82 = arith.constant 3.200000e+01 : f32
    %182 = vector.broadcast %cst_82 : f32 to vector<16x1xf32>
    %183 = arith.divf %181, %182 : vector<16x1xf32>
    %184 = vector.broadcast %183 : vector<16x1xf32> to vector<16x32xf32>
    %185 = arith.subf %179, %184 : vector<16x32xf32>
    %186 = arith.mulf %185, %185 : vector<16x32xf32>
    %cst_83 = arith.constant dense<0.000000e+00> : vector<16xf32>
    %187 = vector.multi_reduction <add>, %186, %cst_83 [1] : vector<16x32xf32> to vector<16xf32>
    %188 = vector.shape_cast %187 : vector<16xf32> to vector<16x1xf32>
    %cst_84 = arith.constant 3.200000e+01 : f32
    %189 = vector.broadcast %cst_84 : f32 to vector<16x1xf32>
    %190 = arith.divf %188, %189 : vector<16x1xf32>
    %191 = vector.broadcast %183 : vector<16x1xf32> to vector<16x32xf32>
    %192 = arith.subf %179, %191 : vector<16x32xf32>
    %cst_85 = arith.constant 9.99999974E-6 : f32
    %193 = vector.broadcast %cst_85 : f32 to vector<16x1xf32>
    %194 = arith.addf %190, %193 : vector<16x1xf32>
    %195 = math.rsqrt %194 : vector<16x1xf32>
    %196 = vector.broadcast %195 : vector<16x1xf32> to vector<16x32xf32>
    %197 = arith.mulf %192, %196 : vector<16x32xf32>
    %c1 = arith.constant 1 : index
    %c0_86 = arith.constant 0 : index
    %c0_87 = arith.constant 0 : index
    %198 = vector.load %arg5[%c1, %c0_86, %c0_87] : memref<4x1x32xf32, #tpu.memory_space<vmem>>, vector<1x1x32xf32>
    %199 = vector.shape_cast %198 : vector<1x1x32xf32> to vector<1x32xf32>
    %200 = vector.broadcast %199 : vector<1x32xf32> to vector<16x32xf32>
    %201 = arith.mulf %197, %200 : vector<16x32xf32>
    %c1_88 = arith.constant 1 : index
    %c0_89 = arith.constant 0 : index
    %c0_90 = arith.constant 0 : index
    %202 = vector.load %arg6[%c1_88, %c0_89, %c0_90] : memref<4x1x32xf32, #tpu.memory_space<vmem>>, vector<1x1x32xf32>
    %203 = vector.shape_cast %202 : vector<1x1x32xf32> to vector<1x32xf32>
    %204 = vector.broadcast %203 : vector<1x32xf32> to vector<16x32xf32>
    %205 = arith.addf %201, %204 : vector<16x32xf32>
    %206 = arith.truncf %205 : vector<16x32xf32> to vector<16x32xbf16>
    %c1_91 = arith.constant 1 : index
    %c0_92 = arith.constant 0 : index
    %c0_93 = arith.constant 0 : index
    %207 = vector.load %arg7[%c1_91, %c0_92, %c0_93] : memref<4x32x96xbf16, #tpu.memory_space<vmem>>, vector<1x32x96xbf16>
    %208 = vector.shape_cast %207 : vector<1x32x96xbf16> to vector<32x96xbf16>
    %cst_94 = arith.constant dense<0.000000e+00> : vector<16x96xf32>
    %209 = tpu.matmul %206, %208, %cst_94 {dimension_numbers = #tpu.dot_dimension_numbers<[1], [0], [0], [1], [0, 0, 1, 1], [], []>} : vector<16x32xbf16>, vector<32x96xbf16>, vector<16x96xf32> -> vector<16x96xf32>
    %c1_95 = arith.constant 1 : index
    %c0_96 = arith.constant 0 : index
    %c0_97 = arith.constant 0 : index
    %210 = vector.load %arg8[%c1_95, %c0_96, %c0_97] : memref<4x1x96xf32, #tpu.memory_space<vmem>>, vector<1x1x96xf32>
    %211 = vector.shape_cast %210 : vector<1x1x96xf32> to vector<1x96xf32>
    %212 = vector.broadcast %211 : vector<1x96xf32> to vector<16x96xf32>
    %213 = arith.addf %209, %212 : vector<16x96xf32>
    %214 = vector.extract_strided_slice %213 {offsets = [0, 0], sizes = [16, 32], strides = [1, 1]} : vector<16x96xf32> to vector<16x32xf32>
    %215 = vector.shape_cast %214 : vector<16x32xf32> to vector<2x8x32xf32>
    %cst_98 = arith.constant 1.250000e-01 : f32
    %216 = vector.broadcast %cst_98 : f32 to vector<2x8x32xf32>
    %217 = arith.mulf %215, %216 : vector<2x8x32xf32>
    %218 = vector.extract_strided_slice %213 {offsets = [0, 32], sizes = [16, 32], strides = [1, 1]} : vector<16x96xf32> to vector<16x32xf32>
    %219 = vector.shape_cast %218 : vector<16x32xf32> to vector<2x8x32xf32>
    %220 = vector.extract_strided_slice %213 {offsets = [0, 64], sizes = [16, 32], strides = [1, 1]} : vector<16x96xf32> to vector<16x32xf32>
    %221 = vector.shape_cast %220 : vector<16x32xf32> to vector<2x8x32xf32>
    %c1_99 = arith.constant 1 : index
    %c0_100 = arith.constant 0 : index
    %c0_101 = arith.constant 0 : index
    %c0_102 = arith.constant 0 : index
    %222 = vector.load %arg17[%c1_99, %c0_100, %c0_101, %c0_102] : memref<4x2x8x32xf32, #tpu.memory_space<vmem>>, vector<1x2x8x32xf32>
    %223 = vector.shape_cast %222 : vector<1x2x8x32xf32> to vector<2x8x32xf32>
    %224 = vector.shape_cast %219 : vector<2x8x32xf32> to vector<1x2x8x32xf32>
    tpu.vector_store %arg17[%c1_99, %c0_100, %c0_101, %c0_102], %224 {strides = array<i32>} : memref<4x2x8x32xf32, #tpu.memory_space<vmem>>, vector<1x2x8x32xf32>,
    %c1_103 = arith.constant 1 : index
    %c0_104 = arith.constant 0 : index
    %c0_105 = arith.constant 0 : index
    %c0_106 = arith.constant 0 : index
    %225 = vector.load %arg18[%c1_103, %c0_104, %c0_105, %c0_106] : memref<4x2x8x32xf32, #tpu.memory_space<vmem>>, vector<1x2x8x32xf32>
    %226 = vector.shape_cast %225 : vector<1x2x8x32xf32> to vector<2x8x32xf32>
    %227 = vector.shape_cast %221 : vector<2x8x32xf32> to vector<1x2x8x32xf32>
    tpu.vector_store %arg18[%c1_103, %c0_104, %c0_105, %c0_106], %227 {strides = array<i32>} : memref<4x2x8x32xf32, #tpu.memory_space<vmem>>, vector<1x2x8x32xf32>,
    %c1_107 = arith.constant 1 : index
    %c0_108 = arith.constant 0 : index
    %c0_109 = arith.constant 0 : index
    %c0_110 = arith.constant 0 : index
    %228 = vector.load %arg3[%c1_107, %c0_108, %c0_109, %c0_110] : memref<4x2x8x32xf32, #tpu.memory_space<vmem>>, vector<1x2x8x32xf32>
    %229 = vector.shape_cast %228 : vector<1x2x8x32xf32> to vector<2x8x32xf32>
    %230 = tpu.concatenate %229, %219 in 1 : vector<2x8x32xf32>, vector<2x8x32xf32> -> vector<2x16x32xf32>
    %c1_111 = arith.constant 1 : index
    %c0_112 = arith.constant 0 : index
    %c0_113 = arith.constant 0 : index
    %c0_114 = arith.constant 0 : index
    %231 = vector.load %arg4[%c1_111, %c0_112, %c0_113, %c0_114] : memref<4x2x8x32xf32, #tpu.memory_space<vmem>>, vector<1x2x8x32xf32>
    %232 = vector.shape_cast %231 : vector<1x2x8x32xf32> to vector<2x8x32xf32>
    %233 = tpu.concatenate %232, %221 in 1 : vector<2x8x32xf32>, vector<2x8x32xf32> -> vector<2x16x32xf32>
    %234 = vector.extract_strided_slice %217 {offsets = [0, 0, 0], sizes = [2, 8, 8], strides = [1, 1, 1]} : vector<2x8x32xf32> to vector<2x8x8xf32>
    %235 = vector.extract_strided_slice %217 {offsets = [0, 0, 8], sizes = [2, 8, 8], strides = [1, 1, 1]} : vector<2x8x32xf32> to vector<2x8x8xf32>
    %236 = vector.extract_strided_slice %217 {offsets = [0, 0, 16], sizes = [2, 8, 8], strides = [1, 1, 1]} : vector<2x8x32xf32> to vector<2x8x8xf32>
    %237 = vector.extract_strided_slice %217 {offsets = [0, 0, 24], sizes = [2, 8, 8], strides = [1, 1, 1]} : vector<2x8x32xf32> to vector<2x8x8xf32>
    %238 = tpu.concatenate %234, %235, %236, %237 in 1 : vector<2x8x8xf32>, vector<2x8x8xf32>, vector<2x8x8xf32>, vector<2x8x8xf32> -> vector<2x32x8xf32>
    %239 = arith.truncf %238 : vector<2x32x8xf32> to vector<2x32x8xbf16>
    %240 = vector.extract_strided_slice %230 {offsets = [0, 0, 0], sizes = [2, 16, 8], strides = [1, 1, 1]} : vector<2x16x32xf32> to vector<2x16x8xf32>
    %241 = vector.extract_strided_slice %230 {offsets = [0, 0, 8], sizes = [2, 16, 8], strides = [1, 1, 1]} : vector<2x16x32xf32> to vector<2x16x8xf32>
    %242 = vector.extract_strided_slice %230 {offsets = [0, 0, 16], sizes = [2, 16, 8], strides = [1, 1, 1]} : vector<2x16x32xf32> to vector<2x16x8xf32>
    %243 = vector.extract_strided_slice %230 {offsets = [0, 0, 24], sizes = [2, 16, 8], strides = [1, 1, 1]} : vector<2x16x32xf32> to vector<2x16x8xf32>
    %244 = tpu.concatenate %240, %241, %242, %243 in 1 : vector<2x16x8xf32>, vector<2x16x8xf32>, vector<2x16x8xf32>, vector<2x16x8xf32> -> vector<2x64x8xf32>
    %245 = arith.truncf %244 : vector<2x64x8xf32> to vector<2x64x8xbf16>
    %246 = vector.extract_strided_slice %233 {offsets = [0, 0, 0], sizes = [2, 16, 8], strides = [1, 1, 1]} : vector<2x16x32xf32> to vector<2x16x8xf32>
    %247 = vector.extract_strided_slice %233 {offsets = [0, 0, 8], sizes = [2, 16, 8], strides = [1, 1, 1]} : vector<2x16x32xf32> to vector<2x16x8xf32>
    %248 = vector.extract_strided_slice %233 {offsets = [0, 0, 16], sizes = [2, 16, 8], strides = [1, 1, 1]} : vector<2x16x32xf32> to vector<2x16x8xf32>
    %249 = vector.extract_strided_slice %233 {offsets = [0, 0, 24], sizes = [2, 16, 8], strides = [1, 1, 1]} : vector<2x16x32xf32> to vector<2x16x8xf32>
    %250 = tpu.concatenate %246, %247, %248, %249 in 1 : vector<2x16x8xf32>, vector<2x16x8xf32>, vector<2x16x8xf32>, vector<2x16x8xf32> -> vector<2x64x8xf32>
    %251 = arith.truncf %250 : vector<2x64x8xf32> to vector<2x64x8xbf16>
    "tpu.trace_start"() <{level = 10 : i32, message = "bxd,byd->bxy"}> : () -> ()
    %cst_115 = arith.constant dense<0.000000e+00> : vector<2x32x64xf32>
    %252 = tpu.matmul %239, %245, %cst_115 {dimension_numbers = #tpu.dot_dimension_numbers<[2], [2], [1], [1], [0, 0, 0, 1, 1, 1], [0], [0]>} : vector<2x32x8xbf16>, vector<2x64x8xbf16>, vector<2x32x64xf32> -> vector<2x32x64xf32>
    "tpu.trace_stop"() : () -> ()
    %253 = arith.addf %252, %37 : vector<2x32x64xf32>
    %cst_116 = arith.constant dense<0xFF800000> : vector<2x32xf32>
    %254 = vector.multi_reduction <maximumf>, %253, %cst_116 [2] : vector<2x32x64xf32> to vector<2x32xf32>
    %255 = vector.shape_cast %254 : vector<2x32xf32> to vector<2x32x1xf32>
    %256 = vector.broadcast %255 : vector<2x32x1xf32> to vector<2x32x64xf32>
    %257 = arith.subf %253, %256 : vector<2x32x64xf32>
    %258 = math.exp %257 : vector<2x32x64xf32>
    %cst_117 = arith.constant dense<0.000000e+00> : vector<2x32xf32>
    %259 = vector.multi_reduction <add>, %258, %cst_117 [2] : vector<2x32x64xf32> to vector<2x32xf32>
    %260 = vector.shape_cast %259 : vector<2x32xf32> to vector<2x32x1xf32>
    %261 = tpu.reciprocal %260 {approx = true} : vector<2x32x1xf32> -> vector<2x32x1xf32>
    %262 = vector.broadcast %261 : vector<2x32x1xf32> to vector<2x32x64xf32>
    %263 = arith.mulf %258, %262 : vector<2x32x64xf32>
    %264 = arith.truncf %263 : vector<2x32x64xf32> to vector<2x32x64xbf16>
    "tpu.trace_start"() <{level = 10 : i32, message = "bxy,byd->bxd"}> : () -> ()
    %cst_118 = arith.constant dense<0.000000e+00> : vector<2x32x8xf32>
    %265 = tpu.matmul %264, %251, %cst_118 {dimension_numbers = #tpu.dot_dimension_numbers<[2], [1], [1], [2], [0, 0, 0, 1, 1, 2], [0], [0]>} : vector<2x32x64xbf16>, vector<2x64x8xbf16>, vector<2x32x8xf32> -> vector<2x32x8xf32>
    "tpu.trace_stop"() : () -> ()
    %266 = vector.extract_strided_slice %265 {offsets = [0, 0, 0], sizes = [2, 8, 8], strides = [1, 1, 1]} : vector<2x32x8xf32> to vector<2x8x8xf32>
    %267 = vector.extract_strided_slice %265 {offsets = [0, 8, 0], sizes = [2, 8, 8], strides = [1, 1, 1]} : vector<2x32x8xf32> to vector<2x8x8xf32>
    %268 = vector.extract_strided_slice %265 {offsets = [0, 16, 0], sizes = [2, 8, 8], strides = [1, 1, 1]} : vector<2x32x8xf32> to vector<2x8x8xf32>
    %269 = vector.extract_strided_slice %265 {offsets = [0, 24, 0], sizes = [2, 8, 8], strides = [1, 1, 1]} : vector<2x32x8xf32> to vector<2x8x8xf32>
    %270 = tpu.concatenate %266, %267, %268, %269 in 2 : vector<2x8x8xf32>, vector<2x8x8xf32>, vector<2x8x8xf32>, vector<2x8x8xf32> -> vector<2x8x32xf32>
    %271 = vector.shape_cast %270 : vector<2x8x32xf32> to vector<16x32xf32>
    %272 = arith.truncf %271 : vector<16x32xf32> to vector<16x32xbf16>
    %c1_119 = arith.constant 1 : index
    %c0_120 = arith.constant 0 : index
    %c0_121 = arith.constant 0 : index
    %273 = vector.load %arg9[%c1_119, %c0_120, %c0_121] : memref<4x32x32xbf16, #tpu.memory_space<vmem>>, vector<1x32x32xbf16>
    %274 = vector.shape_cast %273 : vector<1x32x32xbf16> to vector<32x32xbf16>
    %cst_122 = arith.constant dense<0.000000e+00> : vector<16x32xf32>
    %275 = tpu.matmul %272, %274, %cst_122 {dimension_numbers = #tpu.dot_dimension_numbers<[1], [0], [0], [1], [0, 0, 1, 1], [], []>} : vector<16x32xbf16>, vector<32x32xbf16>, vector<16x32xf32> -> vector<16x32xf32>
    %c1_123 = arith.constant 1 : index
    %c0_124 = arith.constant 0 : index
    %c0_125 = arith.constant 0 : index
    %276 = vector.load %arg10[%c1_123, %c0_124, %c0_125] : memref<4x1x32xf32, #tpu.memory_space<vmem>>, vector<1x1x32xf32>
    %277 = vector.shape_cast %276 : vector<1x1x32xf32> to vector<1x32xf32>
    %278 = vector.broadcast %277 : vector<1x32xf32> to vector<16x32xf32>
    %279 = arith.addf %275, %278 : vector<16x32xf32>
    %280 = arith.addf %205, %279 : vector<16x32xf32>
    %cst_126 = arith.constant dense<0.000000e+00> : vector<16xf32>
    %281 = vector.multi_reduction <add>, %280, %cst_126 [1] : vector<16x32xf32> to vector<16xf32>
    %282 = vector.shape_cast %281 : vector<16xf32> to vector<16x1xf32>
    %cst_127 = arith.constant 3.200000e+01 : f32
    %283 = vector.broadcast %cst_127 : f32 to vector<16x1xf32>
    %284 = arith.divf %282, %283 : vector<16x1xf32>
    %285 = vector.broadcast %284 : vector<16x1xf32> to vector<16x32xf32>
    %286 = arith.subf %280, %285 : vector<16x32xf32>
    %287 = arith.mulf %286, %286 : vector<16x32xf32>
    %cst_128 = arith.constant dense<0.000000e+00> : vector<16xf32>
    %288 = vector.multi_reduction <add>, %287, %cst_128 [1] : vector<16x32xf32> to vector<16xf32>
    %289 = vector.shape_cast %288 : vector<16xf32> to vector<16x1xf32>
    %cst_129 = arith.constant 3.200000e+01 : f32
    %290 = vector.broadcast %cst_129 : f32 to vector<16x1xf32>
    %291 = arith.divf %289, %290 : vector<16x1xf32>
    %292 = vector.broadcast %284 : vector<16x1xf32> to vector<16x32xf32>
    %293 = arith.subf %280, %292 : vector<16x32xf32>
    %cst_130 = arith.constant 9.99999974E-6 : f32
    %294 = vector.broadcast %cst_130 : f32 to vector<16x1xf32>
    %295 = arith.addf %291, %294 : vector<16x1xf32>
    %296 = math.rsqrt %295 : vector<16x1xf32>
    %297 = vector.broadcast %296 : vector<16x1xf32> to vector<16x32xf32>
    %298 = arith.mulf %293, %297 : vector<16x32xf32>
    %c1_131 = arith.constant 1 : index
    %c0_132 = arith.constant 0 : index
    %c0_133 = arith.constant 0 : index
    %299 = vector.load %arg11[%c1_131, %c0_132, %c0_133] : memref<4x1x32xf32, #tpu.memory_space<vmem>>, vector<1x1x32xf32>
    %300 = vector.shape_cast %299 : vector<1x1x32xf32> to vector<1x32xf32>
    %301 = vector.broadcast %300 : vector<1x32xf32> to vector<16x32xf32>
    %302 = arith.mulf %298, %301 : vector<16x32xf32>
    %c1_134 = arith.constant 1 : index
    %c0_135 = arith.constant 0 : index
    %c0_136 = arith.constant 0 : index
    %303 = vector.load %arg12[%c1_134, %c0_135, %c0_136] : memref<4x1x32xf32, #tpu.memory_space<vmem>>, vector<1x1x32xf32>
    %304 = vector.shape_cast %303 : vector<1x1x32xf32> to vector<1x32xf32>
    %305 = vector.broadcast %304 : vector<1x32xf32> to vector<16x32xf32>
    %306 = arith.addf %302, %305 : vector<16x32xf32>
    %307 = arith.truncf %306 : vector<16x32xf32> to vector<16x32xbf16>
    %c1_137 = arith.constant 1 : index
    %c0_138 = arith.constant 0 : index
    %c0_139 = arith.constant 0 : index
    %308 = vector.load %arg13[%c1_137, %c0_138, %c0_139] : memref<4x32x128xbf16, #tpu.memory_space<vmem>>, vector<1x32x128xbf16>
    %309 = vector.shape_cast %308 : vector<1x32x128xbf16> to vector<32x128xbf16>
    %cst_140 = arith.constant dense<0.000000e+00> : vector<16x128xf32>
    %310 = tpu.matmul %307, %309, %cst_140 {dimension_numbers = #tpu.dot_dimension_numbers<[1], [0], [0], [1], [0, 0, 1, 1], [], []>} : vector<16x32xbf16>, vector<32x128xbf16>, vector<16x128xf32> -> vector<16x128xf32>
    %cst_141 = arith.constant 0.000000e+00 : f32
    %311 = vector.broadcast %cst_141 : f32 to vector<16x128xf32>
    %312 = arith.maximumf %310, %311 : vector<16x128xf32>
    %313 = arith.truncf %312 : vector<16x128xf32> to vector<16x128xbf16>
    %c1_142 = arith.constant 1 : index
    %c0_143 = arith.constant 0 : index
    %c0_144 = arith.constant 0 : index
    %314 = vector.load %arg14[%c1_142, %c0_143, %c0_144] : memref<4x128x32xbf16, #tpu.memory_space<vmem>>, vector<1x128x32xbf16>
    %315 = vector.shape_cast %314 : vector<1x128x32xbf16> to vector<128x32xbf16>
    %cst_145 = arith.constant dense<0.000000e+00> : vector<16x32xf32>
    %316 = tpu.matmul %313, %315, %cst_145 {dimension_numbers = #tpu.dot_dimension_numbers<[1], [0], [0], [1], [0, 0, 1, 1], [], []>} : vector<16x128xbf16>, vector<128x32xbf16>, vector<16x32xf32> -> vector<16x32xf32>
    %c1_146 = arith.constant 1 : index
    %c0_147 = arith.constant 0 : index
    %c0_148 = arith.constant 0 : index
    %317 = vector.load %arg15[%c1_146, %c0_147, %c0_148] : memref<4x1x32xf32, #tpu.memory_space<vmem>>, vector<1x1x32xf32>
    %318 = vector.shape_cast %317 : vector<1x1x32xf32> to vector<1x32xf32>
    %319 = vector.broadcast %318 : vector<1x32xf32> to vector<16x32xf32>
    %320 = arith.addf %316, %319 : vector<16x32xf32>
    %321 = arith.addf %320, %280 : vector<16x32xf32>
    %cst_149 = arith.constant dense<0.000000e+00> : vector<16xf32>
    %322 = vector.multi_reduction <add>, %321, %cst_149 [1] : vector<16x32xf32> to vector<16xf32>
    %323 = vector.shape_cast %322 : vector<16xf32> to vector<16x1xf32>
    %cst_150 = arith.constant 3.200000e+01 : f32
    %324 = vector.broadcast %cst_150 : f32 to vector<16x1xf32>
    %325 = arith.divf %323, %324 : vector<16x1xf32>
    %326 = vector.broadcast %325 : vector<16x1xf32> to vector<16x32xf32>
    %327 = arith.subf %321, %326 : vector<16x32xf32>
    %328 = arith.mulf %327, %327 : vector<16x32xf32>
    %cst_151 = arith.constant dense<0.000000e+00> : vector<16xf32>
    %329 = vector.multi_reduction <add>, %328, %cst_151 [1] : vector<16x32xf32> to vector<16xf32>
    %330 = vector.shape_cast %329 : vector<16xf32> to vector<16x1xf32>
    %cst_152 = arith.constant 3.200000e+01 : f32
    %331 = vector.broadcast %cst_152 : f32 to vector<16x1xf32>
    %332 = arith.divf %330, %331 : vector<16x1xf32>
    %333 = vector.broadcast %325 : vector<16x1xf32> to vector<16x32xf32>
    %334 = arith.subf %321, %333 : vector<16x32xf32>
    %cst_153 = arith.constant 9.99999974E-6 : f32
    %335 = vector.broadcast %cst_153 : f32 to vector<16x1xf32>
    %336 = arith.addf %332, %335 : vector<16x1xf32>
    %337 = math.rsqrt %336 : vector<16x1xf32>
    %338 = vector.broadcast %337 : vector<16x1xf32> to vector<16x32xf32>
    %339 = arith.mulf %334, %338 : vector<16x32xf32>
    %c2 = arith.constant 2 : index
    %c0_154 = arith.constant 0 : index
    %c0_155 = arith.constant 0 : index
    %340 = vector.load %arg5[%c2, %c0_154, %c0_155] : memref<4x1x32xf32, #tpu.memory_space<vmem>>, vector<1x1x32xf32>
    %341 = vector.shape_cast %340 : vector<1x1x32xf32> to vector<1x32xf32>
    %342 = vector.broadcast %341 : vector<1x32xf32> to vector<16x32xf32>
    %343 = arith.mulf %339, %342 : vector<16x32xf32>
    %c2_156 = arith.constant 2 : index
    %c0_157 = arith.constant 0 : index
    %c0_158 = arith.constant 0 : index
    %344 = vector.load %arg6[%c2_156, %c0_157, %c0_158] : memref<4x1x32xf32, #tpu.memory_space<vmem>>, vector<1x1x32xf32>
    %345 = vector.shape_cast %344 : vector<1x1x32xf32> to vector<1x32xf32>
    %346 = vector.broadcast %345 : vector<1x32xf32> to vector<16x32xf32>
    %347 = arith.addf %343, %346 : vector<16x32xf32>
    %348 = arith.truncf %347 : vector<16x32xf32> to vector<16x32xbf16>
    %c2_159 = arith.constant 2 : index
    %c0_160 = arith.constant 0 : index
    %c0_161 = arith.constant 0 : index
    %349 = vector.load %arg7[%c2_159, %c0_160, %c0_161] : memref<4x32x96xbf16, #tpu.memory_space<vmem>>, vector<1x32x96xbf16>
    %350 = vector.shape_cast %349 : vector<1x32x96xbf16> to vector<32x96xbf16>
    %cst_162 = arith.constant dense<0.000000e+00> : vector<16x96xf32>
    %351 = tpu.matmul %348, %350, %cst_162 {dimension_numbers = #tpu.dot_dimension_numbers<[1], [0], [0], [1], [0, 0, 1, 1], [], []>} : vector<16x32xbf16>, vector<32x96xbf16>, vector<16x96xf32> -> vector<16x96xf32>
    %c2_163 = arith.constant 2 : index
    %c0_164 = arith.constant 0 : index
    %c0_165 = arith.constant 0 : index
    %352 = vector.load %arg8[%c2_163, %c0_164, %c0_165] : memref<4x1x96xf32, #tpu.memory_space<vmem>>, vector<1x1x96xf32>
    %353 = vector.shape_cast %352 : vector<1x1x96xf32> to vector<1x96xf32>
    %354 = vector.broadcast %353 : vector<1x96xf32> to vector<16x96xf32>
    %355 = arith.addf %351, %354 : vector<16x96xf32>
    %356 = vector.extract_strided_slice %355 {offsets = [0, 0], sizes = [16, 32], strides = [1, 1]} : vector<16x96xf32> to vector<16x32xf32>
    %357 = vector.shape_cast %356 : vector<16x32xf32> to vector<2x8x32xf32>
    %cst_166 = arith.constant 1.250000e-01 : f32
    %358 = vector.broadcast %cst_166 : f32 to vector<2x8x32xf32>
    %359 = arith.mulf %357, %358 : vector<2x8x32xf32>
    %360 = vector.extract_strided_slice %355 {offsets = [0, 32], sizes = [16, 32], strides = [1, 1]} : vector<16x96xf32> to vector<16x32xf32>
    %361 = vector.shape_cast %360 : vector<16x32xf32> to vector<2x8x32xf32>
    %362 = vector.extract_strided_slice %355 {offsets = [0, 64], sizes = [16, 32], strides = [1, 1]} : vector<16x96xf32> to vector<16x32xf32>
    %363 = vector.shape_cast %362 : vector<16x32xf32> to vector<2x8x32xf32>
    %c2_167 = arith.constant 2 : index
    %c0_168 = arith.constant 0 : index
    %c0_169 = arith.constant 0 : index
    %c0_170 = arith.constant 0 : index
    %364 = vector.load %arg17[%c2_167, %c0_168, %c0_169, %c0_170] : memref<4x2x8x32xf32, #tpu.memory_space<vmem>>, vector<1x2x8x32xf32>
    %365 = vector.shape_cast %364 : vector<1x2x8x32xf32> to vector<2x8x32xf32>
    %366 = vector.shape_cast %361 : vector<2x8x32xf32> to vector<1x2x8x32xf32>
    tpu.vector_store %arg17[%c2_167, %c0_168, %c0_169, %c0_170], %366 {strides = array<i32>} : memref<4x2x8x32xf32, #tpu.memory_space<vmem>>, vector<1x2x8x32xf32>,
    %c2_171 = arith.constant 2 : index
    %c0_172 = arith.constant 0 : index
    %c0_173 = arith.constant 0 : index
    %c0_174 = arith.constant 0 : index
    %367 = vector.load %arg18[%c2_171, %c0_172, %c0_173, %c0_174] : memref<4x2x8x32xf32, #tpu.memory_space<vmem>>, vector<1x2x8x32xf32>
    %368 = vector.shape_cast %367 : vector<1x2x8x32xf32> to vector<2x8x32xf32>
    %369 = vector.shape_cast %363 : vector<2x8x32xf32> to vector<1x2x8x32xf32>
    tpu.vector_store %arg18[%c2_171, %c0_172, %c0_173, %c0_174], %369 {strides = array<i32>} : memref<4x2x8x32xf32, #tpu.memory_space<vmem>>, vector<1x2x8x32xf32>,
    %c2_175 = arith.constant 2 : index
    %c0_176 = arith.constant 0 : index
    %c0_177 = arith.constant 0 : index
    %c0_178 = arith.constant 0 : index
    %370 = vector.load %arg3[%c2_175, %c0_176, %c0_177, %c0_178] : memref<4x2x8x32xf32, #tpu.memory_space<vmem>>, vector<1x2x8x32xf32>
    %371 = vector.shape_cast %370 : vector<1x2x8x32xf32> to vector<2x8x32xf32>
    %372 = tpu.concatenate %371, %361 in 1 : vector<2x8x32xf32>, vector<2x8x32xf32> -> vector<2x16x32xf32>
    %c2_179 = arith.constant 2 : index
    %c0_180 = arith.constant 0 : index
    %c0_181 = arith.constant 0 : index
    %c0_182 = arith.constant 0 : index
    %373 = vector.load %arg4[%c2_179, %c0_180, %c0_181, %c0_182] : memref<4x2x8x32xf32, #tpu.memory_space<vmem>>, vector<1x2x8x32xf32>
    %374 = vector.shape_cast %373 : vector<1x2x8x32xf32> to vector<2x8x32xf32>
    %375 = tpu.concatenate %374, %363 in 1 : vector<2x8x32xf32>, vector<2x8x32xf32> -> vector<2x16x32xf32>
    %376 = vector.extract_strided_slice %359 {offsets = [0, 0, 0], sizes = [2, 8, 8], strides = [1, 1, 1]} : vector<2x8x32xf32> to vector<2x8x8xf32>
    %377 = vector.extract_strided_slice %359 {offsets = [0, 0, 8], sizes = [2, 8, 8], strides = [1, 1, 1]} : vector<2x8x32xf32> to vector<2x8x8xf32>
    %378 = vector.extract_strided_slice %359 {offsets = [0, 0, 16], sizes = [2, 8, 8], strides = [1, 1, 1]} : vector<2x8x32xf32> to vector<2x8x8xf32>
    %379 = vector.extract_strided_slice %359 {offsets = [0, 0, 24], sizes = [2, 8, 8], strides = [1, 1, 1]} : vector<2x8x32xf32> to vector<2x8x8xf32>
    %380 = tpu.concatenate %376, %377, %378, %379 in 1 : vector<2x8x8xf32>, vector<2x8x8xf32>, vector<2x8x8xf32>, vector<2x8x8xf32> -> vector<2x32x8xf32>
    %381 = arith.truncf %380 : vector<2x32x8xf32> to vector<2x32x8xbf16>
    %382 = vector.extract_strided_slice %372 {offsets = [0, 0, 0], sizes = [2, 16, 8], strides = [1, 1, 1]} : vector<2x16x32xf32> to vector<2x16x8xf32>
    %383 = vector.extract_strided_slice %372 {offsets = [0, 0, 8], sizes = [2, 16, 8], strides = [1, 1, 1]} : vector<2x16x32xf32> to vector<2x16x8xf32>
    %384 = vector.extract_strided_slice %372 {offsets = [0, 0, 16], sizes = [2, 16, 8], strides = [1, 1, 1]} : vector<2x16x32xf32> to vector<2x16x8xf32>
    %385 = vector.extract_strided_slice %372 {offsets = [0, 0, 24], sizes = [2, 16, 8], strides = [1, 1, 1]} : vector<2x16x32xf32> to vector<2x16x8xf32>
    %386 = tpu.concatenate %382, %383, %384, %385 in 1 : vector<2x16x8xf32>, vector<2x16x8xf32>, vector<2x16x8xf32>, vector<2x16x8xf32> -> vector<2x64x8xf32>
    %387 = arith.truncf %386 : vector<2x64x8xf32> to vector<2x64x8xbf16>
    %388 = vector.extract_strided_slice %375 {offsets = [0, 0, 0], sizes = [2, 16, 8], strides = [1, 1, 1]} : vector<2x16x32xf32> to vector<2x16x8xf32>
    %389 = vector.extract_strided_slice %375 {offsets = [0, 0, 8], sizes = [2, 16, 8], strides = [1, 1, 1]} : vector<2x16x32xf32> to vector<2x16x8xf32>
    %390 = vector.extract_strided_slice %375 {offsets = [0, 0, 16], sizes = [2, 16, 8], strides = [1, 1, 1]} : vector<2x16x32xf32> to vector<2x16x8xf32>
    %391 = vector.extract_strided_slice %375 {offsets = [0, 0, 24], sizes = [2, 16, 8], strides = [1, 1, 1]} : vector<2x16x32xf32> to vector<2x16x8xf32>
    %392 = tpu.concatenate %388, %389, %390, %391 in 1 : vector<2x16x8xf32>, vector<2x16x8xf32>, vector<2x16x8xf32>, vector<2x16x8xf32> -> vector<2x64x8xf32>
    %393 = arith.truncf %392 : vector<2x64x8xf32> to vector<2x64x8xbf16>
    "tpu.trace_start"() <{level = 10 : i32, message = "bxd,byd->bxy"}> : () -> ()
    %cst_183 = arith.constant dense<0.000000e+00> : vector<2x32x64xf32>
    %394 = tpu.matmul %381, %387, %cst_183 {dimension_numbers = #tpu.dot_dimension_numbers<[2], [2], [1], [1], [0, 0, 0, 1, 1, 1], [0], [0]>} : vector<2x32x8xbf16>, vector<2x64x8xbf16>, vector<2x32x64xf32> -> vector<2x32x64xf32>
    "tpu.trace_stop"() : () -> ()
    %395 = arith.addf %394, %37 : vector<2x32x64xf32>
    %cst_184 = arith.constant dense<0xFF800000> : vector<2x32xf32>
    %396 = vector.multi_reduction <maximumf>, %395, %cst_184 [2] : vector<2x32x64xf32> to vector<2x32xf32>
    %397 = vector.shape_cast %396 : vector<2x32xf32> to vector<2x32x1xf32>
    %398 = vector.broadcast %397 : vector<2x32x1xf32> to vector<2x32x64xf32>
    %399 = arith.subf %395, %398 : vector<2x32x64xf32>
    %400 = math.exp %399 : vector<2x32x64xf32>
    %cst_185 = arith.constant dense<0.000000e+00> : vector<2x32xf32>
    %401 = vector.multi_reduction <add>, %400, %cst_185 [2] : vector<2x32x64xf32> to vector<2x32xf32>
    %402 = vector.shape_cast %401 : vector<2x32xf32> to vector<2x32x1xf32>
    %403 = tpu.reciprocal %402 {approx = true} : vector<2x32x1xf32> -> vector<2x32x1xf32>
    %404 = vector.broadcast %403 : vector<2x32x1xf32> to vector<2x32x64xf32>
    %405 = arith.mulf %400, %404 : vector<2x32x64xf32>
    %406 = arith.truncf %405 : vector<2x32x64xf32> to vector<2x32x64xbf16>
    "tpu.trace_start"() <{level = 10 : i32, message = "bxy,byd->bxd"}> : () -> ()
    %cst_186 = arith.constant dense<0.000000e+00> : vector<2x32x8xf32>
    %407 = tpu.matmul %406, %393, %cst_186 {dimension_numbers = #tpu.dot_dimension_numbers<[2], [1], [1], [2], [0, 0, 0, 1, 1, 2], [0], [0]>} : vector<2x32x64xbf16>, vector<2x64x8xbf16>, vector<2x32x8xf32> -> vector<2x32x8xf32>
    "tpu.trace_stop"() : () -> ()
    %408 = vector.extract_strided_slice %407 {offsets = [0, 0, 0], sizes = [2, 8, 8], strides = [1, 1, 1]} : vector<2x32x8xf32> to vector<2x8x8xf32>
    %409 = vector.extract_strided_slice %407 {offsets = [0, 8, 0], sizes = [2, 8, 8], strides = [1, 1, 1]} : vector<2x32x8xf32> to vector<2x8x8xf32>
    %410 = vector.extract_strided_slice %407 {offsets = [0, 16, 0], sizes = [2, 8, 8], strides = [1, 1, 1]} : vector<2x32x8xf32> to vector<2x8x8xf32>
    %411 = vector.extract_strided_slice %407 {offsets = [0, 24, 0], sizes = [2, 8, 8], strides = [1, 1, 1]} : vector<2x32x8xf32> to vector<2x8x8xf32>
    %412 = tpu.concatenate %408, %409, %410, %411 in 2 : vector<2x8x8xf32>, vector<2x8x8xf32>, vector<2x8x8xf32>, vector<2x8x8xf32> -> vector<2x8x32xf32>
    %413 = vector.shape_cast %412 : vector<2x8x32xf32> to vector<16x32xf32>
    %414 = arith.truncf %413 : vector<16x32xf32> to vector<16x32xbf16>
    %c2_187 = arith.constant 2 : index
    %c0_188 = arith.constant 0 : index
    %c0_189 = arith.constant 0 : index
    %415 = vector.load %arg9[%c2_187, %c0_188, %c0_189] : memref<4x32x32xbf16, #tpu.memory_space<vmem>>, vector<1x32x32xbf16>
    %416 = vector.shape_cast %415 : vector<1x32x32xbf16> to vector<32x32xbf16>
    %cst_190 = arith.constant dense<0.000000e+00> : vector<16x32xf32>
    %417 = tpu.matmul %414, %416, %cst_190 {dimension_numbers = #tpu.dot_dimension_numbers<[1], [0], [0], [1], [0, 0, 1, 1], [], []>} : vector<16x32xbf16>, vector<32x32xbf16>, vector<16x32xf32> -> vector<16x32xf32>
    %c2_191 = arith.constant 2 : index
    %c0_192 = arith.constant 0 : index
    %c0_193 = arith.constant 0 : index
    %418 = vector.load %arg10[%c2_191, %c0_192, %c0_193] : memref<4x1x32xf32, #tpu.memory_space<vmem>>, vector<1x1x32xf32>
    %419 = vector.shape_cast %418 : vector<1x1x32xf32> to vector<1x32xf32>
    %420 = vector.broadcast %419 : vector<1x32xf32> to vector<16x32xf32>
    %421 = arith.addf %417, %420 : vector<16x32xf32>
    %422 = arith.addf %347, %421 : vector<16x32xf32>
    %cst_194 = arith.constant dense<0.000000e+00> : vector<16xf32>
    %423 = vector.multi_reduction <add>, %422, %cst_194 [1] : vector<16x32xf32> to vector<16xf32>
    %424 = vector.shape_cast %423 : vector<16xf32> to vector<16x1xf32>
    %cst_195 = arith.constant 3.200000e+01 : f32
    %425 = vector.broadcast %cst_195 : f32 to vector<16x1xf32>
    %426 = arith.divf %424, %425 : vector<16x1xf32>
    %427 = vector.broadcast %426 : vector<16x1xf32> to vector<16x32xf32>
    %428 = arith.subf %422, %427 : vector<16x32xf32>
    %429 = arith.mulf %428, %428 : vector<16x32xf32>
    %cst_196 = arith.constant dense<0.000000e+00> : vector<16xf32>
    %430 = vector.multi_reduction <add>, %429, %cst_196 [1] : vector<16x32xf32> to vector<16xf32>
    %431 = vector.shape_cast %430 : vector<16xf32> to vector<16x1xf32>
    %cst_197 = arith.constant 3.200000e+01 : f32
    %432 = vector.broadcast %cst_197 : f32 to vector<16x1xf32>
    %433 = arith.divf %431, %432 : vector<16x1xf32>
    %434 = vector.broadcast %426 : vector<16x1xf32> to vector<16x32xf32>
    %435 = arith.subf %422, %434 : vector<16x32xf32>
    %cst_198 = arith.constant 9.99999974E-6 : f32
    %436 = vector.broadcast %cst_198 : f32 to vector<16x1xf32>
    %437 = arith.addf %433, %436 : vector<16x1xf32>
    %438 = math.rsqrt %437 : vector<16x1xf32>
    %439 = vector.broadcast %438 : vector<16x1xf32> to vector<16x32xf32>
    %440 = arith.mulf %435, %439 : vector<16x32xf32>
    %c2_199 = arith.constant 2 : index
    %c0_200 = arith.constant 0 : index
    %c0_201 = arith.constant 0 : index
    %441 = vector.load %arg11[%c2_199, %c0_200, %c0_201] : memref<4x1x32xf32, #tpu.memory_space<vmem>>, vector<1x1x32xf32>
    %442 = vector.shape_cast %441 : vector<1x1x32xf32> to vector<1x32xf32>
    %443 = vector.broadcast %442 : vector<1x32xf32> to vector<16x32xf32>
    %444 = arith.mulf %440, %443 : vector<16x32xf32>
    %c2_202 = arith.constant 2 : index
    %c0_203 = arith.constant 0 : index
    %c0_204 = arith.constant 0 : index
    %445 = vector.load %arg12[%c2_202, %c0_203, %c0_204] : memref<4x1x32xf32, #tpu.memory_space<vmem>>, vector<1x1x32xf32>
    %446 = vector.shape_cast %445 : vector<1x1x32xf32> to vector<1x32xf32>
    %447 = vector.broadcast %446 : vector<1x32xf32> to vector<16x32xf32>
    %448 = arith.addf %444, %447 : vector<16x32xf32>
    %449 = arith.truncf %448 : vector<16x32xf32> to vector<16x32xbf16>
    %c2_205 = arith.constant 2 : index
    %c0_206 = arith.constant 0 : index
    %c0_207 = arith.constant 0 : index
    %450 = vector.load %arg13[%c2_205, %c0_206, %c0_207] : memref<4x32x128xbf16, #tpu.memory_space<vmem>>, vector<1x32x128xbf16>
    %451 = vector.shape_cast %450 : vector<1x32x128xbf16> to vector<32x128xbf16>
    %cst_208 = arith.constant dense<0.000000e+00> : vector<16x128xf32>
    %452 = tpu.matmul %449, %451, %cst_208 {dimension_numbers = #tpu.dot_dimension_numbers<[1], [0], [0], [1], [0, 0, 1, 1], [], []>} : vector<16x32xbf16>, vector<32x128xbf16>, vector<16x128xf32> -> vector<16x128xf32>
    %cst_209 = arith.constant 0.000000e+00 : f32
    %453 = vector.broadcast %cst_209 : f32 to vector<16x128xf32>
    %454 = arith.maximumf %452, %453 : vector<16x128xf32>
    %455 = arith.truncf %454 : vector<16x128xf32> to vector<16x128xbf16>
    %c2_210 = arith.constant 2 : index
    %c0_211 = arith.constant 0 : index
    %c0_212 = arith.constant 0 : index
    %456 = vector.load %arg14[%c2_210, %c0_211, %c0_212] : memref<4x128x32xbf16, #tpu.memory_space<vmem>>, vector<1x128x32xbf16>
    %457 = vector.shape_cast %456 : vector<1x128x32xbf16> to vector<128x32xbf16>
    %cst_213 = arith.constant dense<0.000000e+00> : vector<16x32xf32>
    %458 = tpu.matmul %455, %457, %cst_213 {dimension_numbers = #tpu.dot_dimension_numbers<[1], [0], [0], [1], [0, 0, 1, 1], [], []>} : vector<16x128xbf16>, vector<128x32xbf16>, vector<16x32xf32> -> vector<16x32xf32>
    %c2_214 = arith.constant 2 : index
    %c0_215 = arith.constant 0 : index
    %c0_216 = arith.constant 0 : index
    %459 = vector.load %arg15[%c2_214, %c0_215, %c0_216] : memref<4x1x32xf32, #tpu.memory_space<vmem>>, vector<1x1x32xf32>
    %460 = vector.shape_cast %459 : vector<1x1x32xf32> to vector<1x32xf32>
    %461 = vector.broadcast %460 : vector<1x32xf32> to vector<16x32xf32>
    %462 = arith.addf %458, %461 : vector<16x32xf32>
    %463 = arith.addf %462, %422 : vector<16x32xf32>
    %cst_217 = arith.constant dense<0.000000e+00> : vector<16xf32>
    %464 = vector.multi_reduction <add>, %463, %cst_217 [1] : vector<16x32xf32> to vector<16xf32>
    %465 = vector.shape_cast %464 : vector<16xf32> to vector<16x1xf32>
    %cst_218 = arith.constant 3.200000e+01 : f32
    %466 = vector.broadcast %cst_218 : f32 to vector<16x1xf32>
    %467 = arith.divf %465, %466 : vector<16x1xf32>
    %468 = vector.broadcast %467 : vector<16x1xf32> to vector<16x32xf32>
    %469 = arith.subf %463, %468 : vector<16x32xf32>
    %470 = arith.mulf %469, %469 : vector<16x32xf32>
    %cst_219 = arith.constant dense<0.000000e+00> : vector<16xf32>
    %471 = vector.multi_reduction <add>, %470, %cst_219 [1] : vector<16x32xf32> to vector<16xf32>
    %472 = vector.shape_cast %471 : vector<16xf32> to vector<16x1xf32>
    %cst_220 = arith.constant 3.200000e+01 : f32
    %473 = vector.broadcast %cst_220 : f32 to vector<16x1xf32>
    %474 = arith.divf %472, %473 : vector<16x1xf32>
    %475 = vector.broadcast %467 : vector<16x1xf32> to vector<16x32xf32>
    %476 = arith.subf %463, %475 : vector<16x32xf32>
    %cst_221 = arith.constant 9.99999974E-6 : f32
    %477 = vector.broadcast %cst_221 : f32 to vector<16x1xf32>
    %478 = arith.addf %474, %477 : vector<16x1xf32>
    %479 = math.rsqrt %478 : vector<16x1xf32>
    %480 = vector.broadcast %479 : vector<16x1xf32> to vector<16x32xf32>
    %481 = arith.mulf %476, %480 : vector<16x32xf32>
    %c3 = arith.constant 3 : index
    %c0_222 = arith.constant 0 : index
    %c0_223 = arith.constant 0 : index
    %482 = vector.load %arg5[%c3, %c0_222, %c0_223] : memref<4x1x32xf32, #tpu.memory_space<vmem>>, vector<1x1x32xf32>
    %483 = vector.shape_cast %482 : vector<1x1x32xf32> to vector<1x32xf32>
    %484 = vector.broadcast %483 : vector<1x32xf32> to vector<16x32xf32>
    %485 = arith.mulf %481, %484 : vector<16x32xf32>
    %c3_224 = arith.constant 3 : index
    %c0_225 = arith.constant 0 : index
    %c0_226 = arith.constant 0 : index
    %486 = vector.load %arg6[%c3_224, %c0_225, %c0_226] : memref<4x1x32xf32, #tpu.memory_space<vmem>>, vector<1x1x32xf32>
    %487 = vector.shape_cast %486 : vector<1x1x32xf32> to vector<1x32xf32>
    %488 = vector.broadcast %487 : vector<1x32xf32> to vector<16x32xf32>
    %489 = arith.addf %485, %488 : vector<16x32xf32>
    %490 = arith.truncf %489 : vector<16x32xf32> to vector<16x32xbf16>
    %c3_227 = arith.constant 3 : index
    %c0_228 = arith.constant 0 : index
    %c0_229 = arith.constant 0 : index
    %491 = vector.load %arg7[%c3_227, %c0_228, %c0_229] : memref<4x32x96xbf16, #tpu.memory_space<vmem>>, vector<1x32x96xbf16>
    %492 = vector.shape_cast %491 : vector<1x32x96xbf16> to vector<32x96xbf16>
    %cst_230 = arith.constant dense<0.000000e+00> : vector<16x96xf32>
    %493 = tpu.matmul %490, %492, %cst_230 {dimension_numbers = #tpu.dot_dimension_numbers<[1], [0], [0], [1], [0, 0, 1, 1], [], []>} : vector<16x32xbf16>, vector<32x96xbf16>, vector<16x96xf32> -> vector<16x96xf32>
    %c3_231 = arith.constant 3 : index
    %c0_232 = arith.constant 0 : index
    %c0_233 = arith.constant 0 : index
    %494 = vector.load %arg8[%c3_231, %c0_232, %c0_233] : memref<4x1x96xf32, #tpu.memory_space<vmem>>, vector<1x1x96xf32>
    %495 = vector.shape_cast %494 : vector<1x1x96xf32> to vector<1x96xf32>
    %496 = vector.broadcast %495 : vector<1x96xf32> to vector<16x96xf32>
    %497 = arith.addf %493, %496 : vector<16x96xf32>
    %498 = vector.extract_strided_slice %497 {offsets = [0, 0], sizes = [16, 32], strides = [1, 1]} : vector<16x96xf32> to vector<16x32xf32>
    %499 = vector.shape_cast %498 : vector<16x32xf32> to vector<2x8x32xf32>
    %cst_234 = arith.constant 1.250000e-01 : f32
    %500 = vector.broadcast %cst_234 : f32 to vector<2x8x32xf32>
    %501 = arith.mulf %499, %500 : vector<2x8x32xf32>
    %502 = vector.extract_strided_slice %497 {offsets = [0, 32], sizes = [16, 32], strides = [1, 1]} : vector<16x96xf32> to vector<16x32xf32>
    %503 = vector.shape_cast %502 : vector<16x32xf32> to vector<2x8x32xf32>
    %504 = vector.extract_strided_slice %497 {offsets = [0, 64], sizes = [16, 32], strides = [1, 1]} : vector<16x96xf32> to vector<16x32xf32>
    %505 = vector.shape_cast %504 : vector<16x32xf32> to vector<2x8x32xf32>
    %c3_235 = arith.constant 3 : index
    %c0_236 = arith.constant 0 : index
    %c0_237 = arith.constant 0 : index
    %c0_238 = arith.constant 0 : index
    %506 = vector.load %arg17[%c3_235, %c0_236, %c0_237, %c0_238] : memref<4x2x8x32xf32, #tpu.memory_space<vmem>>, vector<1x2x8x32xf32>
    %507 = vector.shape_cast %506 : vector<1x2x8x32xf32> to vector<2x8x32xf32>
    %508 = vector.shape_cast %503 : vector<2x8x32xf32> to vector<1x2x8x32xf32>
    tpu.vector_store %arg17[%c3_235, %c0_236, %c0_237, %c0_238], %508 {strides = array<i32>} : memref<4x2x8x32xf32, #tpu.memory_space<vmem>>, vector<1x2x8x32xf32>,
    %c3_239 = arith.constant 3 : index
    %c0_240 = arith.constant 0 : index
    %c0_241 = arith.constant 0 : index
    %c0_242 = arith.constant 0 : index
    %509 = vector.load %arg18[%c3_239, %c0_240, %c0_241, %c0_242] : memref<4x2x8x32xf32, #tpu.memory_space<vmem>>, vector<1x2x8x32xf32>
    %510 = vector.shape_cast %509 : vector<1x2x8x32xf32> to vector<2x8x32xf32>
    %511 = vector.shape_cast %505 : vector<2x8x32xf32> to vector<1x2x8x32xf32>
    tpu.vector_store %arg18[%c3_239, %c0_240, %c0_241, %c0_242], %511 {strides = array<i32>} : memref<4x2x8x32xf32, #tpu.memory_space<vmem>>, vector<1x2x8x32xf32>,
    %c3_243 = arith.constant 3 : index
    %c0_244 = arith.constant 0 : index
    %c0_245 = arith.constant 0 : index
    %c0_246 = arith.constant 0 : index
    %512 = vector.load %arg3[%c3_243, %c0_244, %c0_245, %c0_246] : memref<4x2x8x32xf32, #tpu.memory_space<vmem>>, vector<1x2x8x32xf32>
    %513 = vector.shape_cast %512 : vector<1x2x8x32xf32> to vector<2x8x32xf32>
    %514 = tpu.concatenate %513, %503 in 1 : vector<2x8x32xf32>, vector<2x8x32xf32> -> vector<2x16x32xf32>
    %c3_247 = arith.constant 3 : index
    %c0_248 = arith.constant 0 : index
    %c0_249 = arith.constant 0 : index
    %c0_250 = arith.constant 0 : index
    %515 = vector.load %arg4[%c3_247, %c0_248, %c0_249, %c0_250] : memref<4x2x8x32xf32, #tpu.memory_space<vmem>>, vector<1x2x8x32xf32>
    %516 = vector.shape_cast %515 : vector<1x2x8x32xf32> to vector<2x8x32xf32>
    %517 = tpu.concatenate %516, %505 in 1 : vector<2x8x32xf32>, vector<2x8x32xf32> -> vector<2x16x32xf32>
    %518 = vector.extract_strided_slice %501 {offsets = [0, 0, 0], sizes = [2, 8, 8], strides = [1, 1, 1]} : vector<2x8x32xf32> to vector<2x8x8xf32>
    %519 = vector.extract_strided_slice %501 {offsets = [0, 0, 8], sizes = [2, 8, 8], strides = [1, 1, 1]} : vector<2x8x32xf32> to vector<2x8x8xf32>
    %520 = vector.extract_strided_slice %501 {offsets = [0, 0, 16], sizes = [2, 8, 8], strides = [1, 1, 1]} : vector<2x8x32xf32> to vector<2x8x8xf32>
    %521 = vector.extract_strided_slice %501 {offsets = [0, 0, 24], sizes = [2, 8, 8], strides = [1, 1, 1]} : vector<2x8x32xf32> to vector<2x8x8xf32>
    %522 = tpu.concatenate %518, %519, %520, %521 in 1 : vector<2x8x8xf32>, vector<2x8x8xf32>, vector<2x8x8xf32>, vector<2x8x8xf32> -> vector<2x32x8xf32>
    %523 = arith.truncf %522 : vector<2x32x8xf32> to vector<2x32x8xbf16>
    %524 = vector.extract_strided_slice %514 {offsets = [0, 0, 0], sizes = [2, 16, 8], strides = [1, 1, 1]} : vector<2x16x32xf32> to vector<2x16x8xf32>
    %525 = vector.extract_strided_slice %514 {offsets = [0, 0, 8], sizes = [2, 16, 8], strides = [1, 1, 1]} : vector<2x16x32xf32> to vector<2x16x8xf32>
    %526 = vector.extract_strided_slice %514 {offsets = [0, 0, 16], sizes = [2, 16, 8], strides = [1, 1, 1]} : vector<2x16x32xf32> to vector<2x16x8xf32>
    %527 = vector.extract_strided_slice %514 {offsets = [0, 0, 24], sizes = [2, 16, 8], strides = [1, 1, 1]} : vector<2x16x32xf32> to vector<2x16x8xf32>
    %528 = tpu.concatenate %524, %525, %526, %527 in 1 : vector<2x16x8xf32>, vector<2x16x8xf32>, vector<2x16x8xf32>, vector<2x16x8xf32> -> vector<2x64x8xf32>
    %529 = arith.truncf %528 : vector<2x64x8xf32> to vector<2x64x8xbf16>
    %530 = vector.extract_strided_slice %517 {offsets = [0, 0, 0], sizes = [2, 16, 8], strides = [1, 1, 1]} : vector<2x16x32xf32> to vector<2x16x8xf32>
    %531 = vector.extract_strided_slice %517 {offsets = [0, 0, 8], sizes = [2, 16, 8], strides = [1, 1, 1]} : vector<2x16x32xf32> to vector<2x16x8xf32>
    %532 = vector.extract_strided_slice %517 {offsets = [0, 0, 16], sizes = [2, 16, 8], strides = [1, 1, 1]} : vector<2x16x32xf32> to vector<2x16x8xf32>
    %533 = vector.extract_strided_slice %517 {offsets = [0, 0, 24], sizes = [2, 16, 8], strides = [1, 1, 1]} : vector<2x16x32xf32> to vector<2x16x8xf32>
    %534 = tpu.concatenate %530, %531, %532, %533 in 1 : vector<2x16x8xf32>, vector<2x16x8xf32>, vector<2x16x8xf32>, vector<2x16x8xf32> -> vector<2x64x8xf32>
    %535 = arith.truncf %534 : vector<2x64x8xf32> to vector<2x64x8xbf16>
    "tpu.trace_start"() <{level = 10 : i32, message = "bxd,byd->bxy"}> : () -> ()
    %cst_251 = arith.constant dense<0.000000e+00> : vector<2x32x64xf32>
    %536 = tpu.matmul %523, %529, %cst_251 {dimension_numbers = #tpu.dot_dimension_numbers<[2], [2], [1], [1], [0, 0, 0, 1, 1, 1], [0], [0]>} : vector<2x32x8xbf16>, vector<2x64x8xbf16>, vector<2x32x64xf32> -> vector<2x32x64xf32>
    "tpu.trace_stop"() : () -> ()
    %537 = arith.addf %536, %37 : vector<2x32x64xf32>
    %cst_252 = arith.constant dense<0xFF800000> : vector<2x32xf32>
    %538 = vector.multi_reduction <maximumf>, %537, %cst_252 [2] : vector<2x32x64xf32> to vector<2x32xf32>
    %539 = vector.shape_cast %538 : vector<2x32xf32> to vector<2x32x1xf32>
    %540 = vector.broadcast %539 : vector<2x32x1xf32> to vector<2x32x64xf32>
    %541 = arith.subf %537, %540 : vector<2x32x64xf32>
    %542 = math.exp %541 : vector<2x32x64xf32>
    %cst_253 = arith.constant dense<0.000000e+00> : vector<2x32xf32>
    %543 = vector.multi_reduction <add>, %542, %cst_253 [2] : vector<2x32x64xf32> to vector<2x32xf32>
    %544 = vector.shape_cast %543 : vector<2x32xf32> to vector<2x32x1xf32>
    %545 = tpu.reciprocal %544 {approx = true} : vector<2x32x1xf32> -> vector<2x32x1xf32>
    %546 = vector.broadcast %545 : vector<2x32x1xf32> to vector<2x32x64xf32>
    %547 = arith.mulf %542, %546 : vector<2x32x64xf32>
    %548 = arith.truncf %547 : vector<2x32x64xf32> to vector<2x32x64xbf16>
    "tpu.trace_start"() <{level = 10 : i32, message = "bxy,byd->bxd"}> : () -> ()
    %cst_254 = arith.constant dense<0.000000e+00> : vector<2x32x8xf32>
    %549 = tpu.matmul %548, %535, %cst_254 {dimension_numbers = #tpu.dot_dimension_numbers<[2], [1], [1], [2], [0, 0, 0, 1, 1, 2], [0], [0]>} : vector<2x32x64xbf16>, vector<2x64x8xbf16>, vector<2x32x8xf32> -> vector<2x32x8xf32>
    "tpu.trace_stop"() : () -> ()
    %550 = vector.extract_strided_slice %549 {offsets = [0, 0, 0], sizes = [2, 8, 8], strides = [1, 1, 1]} : vector<2x32x8xf32> to vector<2x8x8xf32>
    %551 = vector.extract_strided_slice %549 {offsets = [0, 8, 0], sizes = [2, 8, 8], strides = [1, 1, 1]} : vector<2x32x8xf32> to vector<2x8x8xf32>
    %552 = vector.extract_strided_slice %549 {offsets = [0, 16, 0], sizes = [2, 8, 8], strides = [1, 1, 1]} : vector<2x32x8xf32> to vector<2x8x8xf32>
    %553 = vector.extract_strided_slice %549 {offsets = [0, 24, 0], sizes = [2, 8, 8], strides = [1, 1, 1]} : vector<2x32x8xf32> to vector<2x8x8xf32>
    %554 = tpu.concatenate %550, %551, %552, %553 in 2 : vector<2x8x8xf32>, vector<2x8x8xf32>, vector<2x8x8xf32>, vector<2x8x8xf32> -> vector<2x8x32xf32>
    %555 = vector.shape_cast %554 : vector<2x8x32xf32> to vector<16x32xf32>
    %556 = arith.truncf %555 : vector<16x32xf32> to vector<16x32xbf16>
    %c3_255 = arith.constant 3 : index
    %c0_256 = arith.constant 0 : index
    %c0_257 = arith.constant 0 : index
    %557 = vector.load %arg9[%c3_255, %c0_256, %c0_257] : memref<4x32x32xbf16, #tpu.memory_space<vmem>>, vector<1x32x32xbf16>
    %558 = vector.shape_cast %557 : vector<1x32x32xbf16> to vector<32x32xbf16>
    %cst_258 = arith.constant dense<0.000000e+00> : vector<16x32xf32>
    %559 = tpu.matmul %556, %558, %cst_258 {dimension_numbers = #tpu.dot_dimension_numbers<[1], [0], [0], [1], [0, 0, 1, 1], [], []>} : vector<16x32xbf16>, vector<32x32xbf16>, vector<16x32xf32> -> vector<16x32xf32>
    %c3_259 = arith.constant 3 : index
    %c0_260 = arith.constant 0 : index
    %c0_261 = arith.constant 0 : index
    %560 = vector.load %arg10[%c3_259, %c0_260, %c0_261] : memref<4x1x32xf32, #tpu.memory_space<vmem>>, vector<1x1x32xf32>
    %561 = vector.shape_cast %560 : vector<1x1x32xf32> to vector<1x32xf32>
    %562 = vector.broadcast %561 : vector<1x32xf32> to vector<16x32xf32>
    %563 = arith.addf %559, %562 : vector<16x32xf32>
    %564 = arith.addf %489, %563 : vector<16x32xf32>
    %cst_262 = arith.constant dense<0.000000e+00> : vector<16xf32>
    %565 = vector.multi_reduction <add>, %564, %cst_262 [1] : vector<16x32xf32> to vector<16xf32>
    %566 = vector.shape_cast %565 : vector<16xf32> to vector<16x1xf32>
    %cst_263 = arith.constant 3.200000e+01 : f32
    %567 = vector.broadcast %cst_263 : f32 to vector<16x1xf32>
    %568 = arith.divf %566, %567 : vector<16x1xf32>
    %569 = vector.broadcast %568 : vector<16x1xf32> to vector<16x32xf32>
    %570 = arith.subf %564, %569 : vector<16x32xf32>
    %571 = arith.mulf %570, %570 : vector<16x32xf32>
    %cst_264 = arith.constant dense<0.000000e+00> : vector<16xf32>
    %572 = vector.multi_reduction <add>, %571, %cst_264 [1] : vector<16x32xf32> to vector<16xf32>
    %573 = vector.shape_cast %572 : vector<16xf32> to vector<16x1xf32>
    %cst_265 = arith.constant 3.200000e+01 : f32
    %574 = vector.broadcast %cst_265 : f32 to vector<16x1xf32>
    %575 = arith.divf %573, %574 : vector<16x1xf32>
    %576 = vector.broadcast %568 : vector<16x1xf32> to vector<16x32xf32>
    %577 = arith.subf %564, %576 : vector<16x32xf32>
    %cst_266 = arith.constant 9.99999974E-6 : f32
    %578 = vector.broadcast %cst_266 : f32 to vector<16x1xf32>
    %579 = arith.addf %575, %578 : vector<16x1xf32>
    %580 = math.rsqrt %579 : vector<16x1xf32>
    %581 = vector.broadcast %580 : vector<16x1xf32> to vector<16x32xf32>
    %582 = arith.mulf %577, %581 : vector<16x32xf32>
    %c3_267 = arith.constant 3 : index
    %c0_268 = arith.constant 0 : index
    %c0_269 = arith.constant 0 : index
    %583 = vector.load %arg11[%c3_267, %c0_268, %c0_269] : memref<4x1x32xf32, #tpu.memory_space<vmem>>, vector<1x1x32xf32>
    %584 = vector.shape_cast %583 : vector<1x1x32xf32> to vector<1x32xf32>
    %585 = vector.broadcast %584 : vector<1x32xf32> to vector<16x32xf32>
    %586 = arith.mulf %582, %585 : vector<16x32xf32>
    %c3_270 = arith.constant 3 : index
    %c0_271 = arith.constant 0 : index
    %c0_272 = arith.constant 0 : index
    %587 = vector.load %arg12[%c3_270, %c0_271, %c0_272] : memref<4x1x32xf32, #tpu.memory_space<vmem>>, vector<1x1x32xf32>
    %588 = vector.shape_cast %587 : vector<1x1x32xf32> to vector<1x32xf32>
    %589 = vector.broadcast %588 : vector<1x32xf32> to vector<16x32xf32>
    %590 = arith.addf %586, %589 : vector<16x32xf32>
    %591 = arith.truncf %590 : vector<16x32xf32> to vector<16x32xbf16>
    %c3_273 = arith.constant 3 : index
    %c0_274 = arith.constant 0 : index
    %c0_275 = arith.constant 0 : index
    %592 = vector.load %arg13[%c3_273, %c0_274, %c0_275] : memref<4x32x128xbf16, #tpu.memory_space<vmem>>, vector<1x32x128xbf16>
    %593 = vector.shape_cast %592 : vector<1x32x128xbf16> to vector<32x128xbf16>
    %cst_276 = arith.constant dense<0.000000e+00> : vector<16x128xf32>
    %594 = tpu.matmul %591, %593, %cst_276 {dimension_numbers = #tpu.dot_dimension_numbers<[1], [0], [0], [1], [0, 0, 1, 1], [], []>} : vector<16x32xbf16>, vector<32x128xbf16>, vector<16x128xf32> -> vector<16x128xf32>
    %cst_277 = arith.constant 0.000000e+00 : f32
    %595 = vector.broadcast %cst_277 : f32 to vector<16x128xf32>
    %596 = arith.maximumf %594, %595 : vector<16x128xf32>
    %597 = arith.truncf %596 : vector<16x128xf32> to vector<16x128xbf16>
    %c3_278 = arith.constant 3 : index
    %c0_279 = arith.constant 0 : index
    %c0_280 = arith.constant 0 : index
    %598 = vector.load %arg14[%c3_278, %c0_279, %c0_280] : memref<4x128x32xbf16, #tpu.memory_space<vmem>>, vector<1x128x32xbf16>
    %599 = vector.shape_cast %598 : vector<1x128x32xbf16> to vector<128x32xbf16>
    %cst_281 = arith.constant dense<0.000000e+00> : vector<16x32xf32>
    %600 = tpu.matmul %597, %599, %cst_281 {dimension_numbers = #tpu.dot_dimension_numbers<[1], [0], [0], [1], [0, 0, 1, 1], [], []>} : vector<16x128xbf16>, vector<128x32xbf16>, vector<16x32xf32> -> vector<16x32xf32>
    %c3_282 = arith.constant 3 : index
    %c0_283 = arith.constant 0 : index
    %c0_284 = arith.constant 0 : index
    %601 = vector.load %arg15[%c3_282, %c0_283, %c0_284] : memref<4x1x32xf32, #tpu.memory_space<vmem>>, vector<1x1x32xf32>
    %602 = vector.shape_cast %601 : vector<1x1x32xf32> to vector<1x32xf32>
    %603 = vector.broadcast %602 : vector<1x32xf32> to vector<16x32xf32>
    %604 = arith.addf %600, %603 : vector<16x32xf32>
    %605 = arith.addf %604, %564 : vector<16x32xf32>
    %c0_285 = arith.constant 0 : index
    %c0_286 = arith.constant 0 : index
    %606 = vector.load %arg16[%c0_285, %c0_286] : memref<16x32xf32, #tpu.memory_space<vmem>>, vector<16x32xf32>
    tpu.vector_store %arg16[%c0_285, %c0_286], %605 {strides = array<i32>} : memref<16x32xf32, #tpu.memory_space<vmem>>, vector<16x32xf32>,
    return
  }
}

</mosaic_0001>

<bundles_post_ra>
// kernel: residual_recurrent_blocks_forward.1
= control target key start
LH: loop header
LB: loop body
LE: loop exit
PB: predicated region body
PF: predicated region fallthrough
CT: control target
= control target key end

     0   :  { %s6550_s0 = inlined_call_operand.vmem [shape: f32[16,32], index: 0, kind: input, shape index: {}]   ;;  %s6551_s1 = inlined_call_operand.vmem [shape: f32[2,8], index: 1, kind: input, shape index: {}]   ;;  %s6552_s2 = inlined_call_operand.vmem [shape: f32[2,1], index: 2, kind: input, shape index: {}]   ;;  %s6553_s3 = inlined_call_operand.vmem [shape: f32[4,2,8,32], index: 3, kind: input, shape index: {}, may-alias: {3,17}]   ;;  %s6554_s4 = inlined_call_operand.vmem [shape: f32[4,2,8,32], index: 4, kind: input, shape index: {}, may-alias: {4,18}]   ;;  %s6555_s5 = inlined_call_operand.vmem [shape: f32[4,1,32], index: 5, kind: input, shape index: {}]   ;;  %s6556_s6 = inlined_call_operand.vmem [shape: f32[4,1,32], index: 6, kind: input, shape index: {}]   ;;  %s6557_s7 = inlined_call_operand.vmem [shape: bf16[4,32,96], index: 7, kind: input, shape index: {}]   ;;  %s6558_s8 = inlined_call_operand.vmem [shape: f32[4,1,96], index: 8, kind: input, shape index: {}]   ;;  %s6559_s9 = inlined_call_operand.vmem [shape: bf16[4,32,32], index: 9, kind: input, shape index: {}]   ;;  %s6560_s10 = inlined_call_operand.vmem [shape: f32[4,1,32], index: 10, kind: input, shape index: {}]   ;;  %s6561_s11 = inlined_call_operand.vmem [shape: f32[4,1,32], index: 11, kind: input, shape index: {}]   ;;  %s6562_s12 = inlined_call_operand.vmem [shape: f32[4,1,32], index: 12, kind: input, shape index: {}]   ;;  %s6563_s13 = inlined_call_operand.vmem [shape: bf16[4,32,128], index: 13, kind: input, shape index: {}]   ;;  %s6564_s14 = inlined_call_operand.vmem [shape: bf16[4,128,32], index: 14, kind: input, shape index: {}]   ;;  %s6565_s15 = inlined_call_operand.vmem [shape: f32[4,1,32], index: 15, kind: input, shape index: {}]   ;;  %s6566_s16 = inlined_call_operand.hbm [shape: f32[16,32], index: 16, kind: output, shape index: {0}]   ;;  %s6567_s17 = inlined_call_operand.vmem [shape: f32[4,2,8,32], index: 17, kind: output, shape index: {1}, may-alias: {3,17}]   ;;  %s6568_s18 = inlined_call_operand.vmem [shape: f32[4,2,8,32], index: 18, kind: output, shape index: {2}, may-alias: {4,18}]  }
   0x1   :  { %6575 = sst [smem:[#allocation5_spill]] %s6550_s0 }
   0x2   :  { %6576 = sst [smem:[#allocation6_spill]] %s6551_s1 }
   0x3   :  { %6577 = sst [smem:[#allocation7_spill]] %s6552_s2 }
   0x4   :  { %s6578_s29 = sld [smem:[#allocation5_spill]]  ;;  %vm131_vm0 = vcmask 261120  }
   0xa   :  { %v58_v0 = vld [vmem:[%s6578_s29] sm:$0xff]  ;;  %v59_v1 = vld [vmem:[%s6578_s29 + $0x8] sm:$0xff] }
   0xb   :  { %v169_v2 = vsel %vm131_vm0, %v58_v0, 0.0  ;;  %v172_v3 = vsel %vm131_vm0, %v59_v1, 0.0 }
   0xc   :  { %170 = vadd.xlane.f32.xlu0 %v169_v2 }
  0x10   :  { %173 = vadd.xlane.f32.xlu0 %v172_v3 }
  0x11   :  { %24 = vsyncpa [#allocation3], 0  ;;  %v5027_v14 = vld [vmem:[%s6557_s7] sm:$0xff]   ;;  %v5267_v15 = vmov 0.0   ;;  %vm5268_vm1 = vmmov 0   ;;  %v5028_v16 = vld [vmem:[%s6557_s7 + $0x8] sm:$0xff]  }
  0x12   :  { %4309 = vmatprep.subr.bf16.mxu0 %v5267_v15  ;;  %4313 = vmatprep.mubr.msk.bf16.mxu0 %vm5268_vm1, %v5267_v15  ;;  %v3884_v25 = vld [vmem:[%s6555_s5] ss:$0 sm:$0xff]  ;;  %s5269_s27 = smov 96   ;;  %v5270_v41 = vmov 0   ;;  %vm69_vm2 = vcmask 64512   ;;  %s5271_s22 = smov 120  }
  0x13   :  { %4310 = vmatpush3.bf16.msra.mxu0 %v5027_v14  ;;  %v3885_v29 = vld [vmem:[%s6556_s6] ss:$0 sm:$0xff]  ;;  %4756 = vset.pattern.permute.xlu0 %v5270_v41  ;;  %s5272_s2 = smov 112   ;;  %s5273_s23 = smov 104  }
  0x14   :  { %4311 = vmatprep.subr.bf16.mxu0 %v5267_v15  ;;  %v3886_v34 = vld [vmem:[%s6558_s8] ss:$0 sm:$0xff]  ;;  %s6579_s26 = sld [smem:[#allocation7_spill]]  ;;  %s6580_s30 = sld [smem:[#allocation6_spill]] }
  0x15   :  { %s6574_s0 = smov 16   ;;  %s5277_s19 = smov 48  }
  0x16   :  { %s5278_s1 = smov 32   ;;  %s5279_s20 = smov 64  }
  0x17   :  { %4312 = vmatpush3.bf16.msra.mxu0 %v5028_v16  ;;  %s6570_s28 = smov 24   ;;  %s6586_s24 = smov 8  }
  0x1a   :  { %v60_v53 = vld [vmem:[%s6579_s26] sm:$0x3]  ;;  %s6572_s26 = smov 8  }
  0x1b   :  { %v62_v55 = vsub.f32 1.0, %v60_v53 }
  0x99   :  { %v171_v4 = vpop.xlane.xlu0 %170 }
  0x9a   :  { %v176_v5 = vmul.f32 0.03125, %v171_v4 }
  0x9c   :  { %v178_v6 = vsub.f32 %v58_v0, %v176_v5 }
  0x9d   :  { %v174_v7 = vpop.xlane.xlu0 %173 }
  0x9e   :  { %v177_v8 = vmul.f32 0.03125, %v174_v7  ;;  %v180_v9 = vmul.f32 %v178_v6, %v178_v6 }
  0xa0   :  { %v179_v10 = vsub.f32 %v59_v1, %v177_v8  ;;  %v182_v11 = vsel %vm131_vm0, %v180_v9, 0.0 }
  0xa1   :  { %183 = vadd.xlane.f32.xlu1 %v182_v11 }
  0xa2   :  { %v181_v12 = vmul.f32 %v179_v10, %v179_v10 }
  0xa4   :  { %v185_v13 = vsel %vm131_vm0, %v181_v12, 0.0 }
  0xa5   :  { %186 = vadd.xlane.f32.xlu1 %v185_v13 }
 0x12e   :  { %v184_v17 = vpop.xlane.xlu1 %183 }
 0x12f   :  { %v188_v18 = vmul.f32 0.03125, %v184_v17 }
 0x131   :  { %v190_v19 = vadd.f32 1e-05, %v188_v18 }
 0x132   :  { %v187_v20 = vpop.xlane.xlu1 %186 }
 0x133   :  { %5083 = vrsqrt.f32 %v190_v19  ;;  %v189_v21 = vmul.f32 0.03125, %v187_v20 }
 0x135   :  { %v191_v22 = vadd.f32 1e-05, %v189_v21 }
 0x137   :  { %5085 = vrsqrt.f32 %v191_v22 }
 0x13d   :  { %v5084_v23 = vpop.eup %5083 }
 0x13e   :  { %v194_v24 = vmul.f32 %v5084_v23, %v178_v6 }
 0x140   :  { %v203_v28 = vmul.f32 %v3884_v25, %v194_v24 }
 0x141   :  { %v5086_v26 = vpop.eup %5085 }
 0x142   :  { %v195_v27 = vmul.f32 %v5086_v26, %v179_v10  ;;  %v5405_v31 = vadd.f32 %v3885_v29, %v203_v28 }
 0x144   :  { %v204_v30 = vmul.f32 %v3884_v25, %v195_v27 }
 0x146   :  { %v5407_v32 = vadd.f32 %v3885_v29, %v204_v30  ;;  %v71_v30 = vlaneseq }
 0x148   :  { %v214_v33 = vpack.c.bf16 %v5407_v32, %v5405_v31 }
 0x14a   :  { %4314 = vmatmul.mubr.msk.bf16.vlgmr.msra.gmra.mrb[0].mxu0 %vm131_vm0, %v214_v33  ;;  %v5274_v33 = vmov 1966171168  }
 0x21d   :  { %v275_v35 = vpop.f32.mrb[0].mxu0 }
 0x21e   :  { %v5415_v36 = vadd.f32 %v3886_v34, %v275_v35  ;;  %v4315_v37 = vpop.f32.mrb[1].mxu0 }
 0x21f   :  { %v278_v38 = vpop.f32.mrb[2].mxu0 }
 0x220   :  { %v5417_v39 = vadd.f32 %v3886_v34, %v278_v38  ;;  %286 = vrot.lane.b32.xlu0 %v5415_v36, %s5269_s27  ;;  %v4316_v40 = vpop.f32.mrb[3].mxu0  ;;  %v282_v52 = vmul.f32 0.125, %v5415_v36  ;;  %v85_v34 = vunpack.c.l.s4 %v5274_v33 }
 0x221   :  { %v74_v40 = vshrl.u32 %v71_v30, 7 }
 0x222   :  { %288 = vrot.lane.b32.xlu1 %v5417_v39, %s5269_s27  ;;  %v283_v54 = vmul.f32 0.125, %v5417_v39 }
 0x292   :  { %v287_v42 = vpop.permute.xlu0 %286 }
 0x293   :  { %292 = vst.msk [vmem:[%s6567_s17] sm:$0xff] %vm131_vm0, %v287_v42 }
 0x294   :  { %v289_v43 = vpop.permute.xlu1 %288 }
 0x295   :  { %293 = vst.msk [vmem:[%s6567_s17 + $0x8] sm:$0xff] %vm131_vm0, %v289_v43 }
 0x29c   :  { %v302_v44 = vld [vmem:[%s6553_s3] sm:$0xff]  ;;  %v303_v47 = vld [vmem:[%s6553_s3 + $0x8] sm:$0xff] }
 0x29d   :  { %v368_v45 = vpack.c.bf16 %v287_v42, %v302_v44  ;;  %v4726_v46 = vpack.i.bf16 %v287_v42, %v302_v44  ;;  %v4736_v49 = vpack.i.bf16 %v289_v43, %v303_v47  ;;  %v372_v50 = vpack.c.bf16 %v289_v43, %v303_v47  ;;  %v61_v44 = vld [vmem:[%s6580_s30] sm:$0x3] }
 0x29e   :  { %v86_v42 = vunpack.c.0.s8 %v85_v34  ;;  %v72_v43 = vand.u32 127, %v71_v30 }
 0x29f   :  { %4677 = vmatprep.subr.msk.bf16.mxu1 %vm69_vm2, %v368_v45  ;;  %4727 = vrot.lane.b32.xlu1 %v4726_v46, %s5271_s22  ;;  %v429_v48 = vsel %vm69_vm2, %v368_v45, 0  ;;  %v496_v51 = vsel %vm69_vm2, %v372_v50, 0 }
 0x2a0   :  { %4318 = vmatpush3.bf16.xpose.msra.mxu1 %v429_v48  ;;  %4737 = vrot.lane.b32.xlu0 %v4736_v49, %s5271_s22  ;;  %v89_v45 = vsub.s32 %v86_v42, %v74_v40  ;;  %v3883_v47 = vadd.s32 4294967288, %v72_v43  ;;  %vm75_vm3 = vcmp.lt.s32.totalorder %v72_v43, 8  ;;  %vm76_vm4 = vcmp.ge.s32.totalorder %v72_v43, %v74_v40 }
 0x2a1   :  { %4681 = vmatprep.subr.msk.bf16.mxu0 %vm69_vm2, %v372_v50  ;;  %vm78_vm5 = vcmp.ge.s32.totalorder %v72_v43, 8  ;;  %vm5482_vm7 = vmand %vm75_vm3, %vm76_vm4  ;;  %vm128_vm3 = vcmask 130048   ;;  %vm134_vm4 = vcmask 392192  }
 0x2a2   :  { %4330 = vmatpush3.bf16.xpose.msra.mxu0 %v496_v51  ;;  %vm80_vm6 = vcmp.le.s32.totalorder %v3883_v47, %v74_v40 }
 0x2a3   :  { %4732 = vrot.lane.b32.xlu1 %v4726_v46, %s5272_s2  ;;  %vm5486_vm8 = vmand %vm78_vm5, %vm80_vm6  ;;  %vm556_vm5 = vcmask 523264   ;;  %vm787_vm6 = vcmask 195584  }
 0x2a4   :  { %308 = vrot.lane.b32.xlu0 %v282_v52, %s5271_s22  ;;  %vm82_vm10 = vmor %vm5482_vm7, %vm5486_vm8 }
 0x2a7   :  { %4742 = vrot.lane.b32.xlu1 %v4726_v46, %s5273_s23 }
 0x2a8   :  { %314 = vrot.lane.b32.xlu0 %v282_v52, %s5272_s2 }
 0x2ab   :  { %4747 = vrot.lane.b32.xlu1 %v4736_v49, %s5272_s2 }
 0x2ac   :  { %4752 = vrot.lane.b32.xlu0 %v4736_v49, %s5273_s23 }
 0x2af   :  { %320 = vrot.lane.b32.xlu1 %v282_v52, %s5273_s23 }
 0x2b0   :  { %316 = vrot.lane.b32.xlu0 %v283_v54, %s5272_s2 }
 0x2b3   :  { %310 = vrot.lane.b32.xlu1 %v283_v54, %s5271_s22 }
 0x2b4   :  { %65 = vperm.xlu0 %4756, %v62_v55  }
 0x2b7   :  { %322 = vrot.lane.b32.xlu1 %v283_v54, %s5273_s23 }
 0x311   :  { %v4728_v56 = vpop.permute.xlu1 %4727 }
 0x312   :  { %v4730_v57 = vunpack.i.h.bf16 %v4728_v56  ;;  %v4729_v58 = vunpack.i.l.bf16 %v4728_v56  ;;  %v4738_v59 = vpop.permute.xlu0 %4737 }
 0x313   :  { %v4740_v61 = vunpack.i.h.bf16 %v4738_v59  ;;  %v4739_v62 = vunpack.i.l.bf16 %v4738_v59 }
 0x314   :  { %v369_v60 = vpack.c.bf16 %v4730_v57, %v4729_v58 }
 0x315   :  { %v4733_v63 = vpop.permute.xlu1 %4732  ;;  %v373_v0 = vpack.c.bf16 %v4740_v61, %v4739_v62  ;;  %v5275_v61 = vmov -1e+09  }
 0x316   :  { %v4735_v1 = vunpack.i.h.bf16 %v4733_v63  ;;  %v4734_v2 = vunpack.i.l.bf16 %v4733_v63  ;;  %4678 = vmatprep.subr.msk.bf16.mxu1 %vm69_vm2, %v369_v60  ;;  %v432_v3 = vsel %vm69_vm2, %v369_v60, 0  ;;  %v309_v4 = vpop.permute.xlu0 %308 }
 0x317   :  { %4320 = vmatpush3.bf16.xpose.msra.mxu1 %v432_v3  ;;  %4682 = vmatprep.subr.msk.bf16.mxu0 %vm69_vm2, %v373_v0  ;;  %v499_v6 = vsel %vm69_vm2, %v373_v0, 0  ;;  %v326_v7 = vpack.c.bf16 %v309_v4, %v282_v52 }
 0x318   :  { %v370_v5 = vpack.c.bf16 %v4735_v1, %v4734_v2  ;;  %4332 = vmatpush3.bf16.xpose.msra.mxu0 %v499_v6 }
 0x319   :  { %v4743_v8 = vpop.permute.xlu1 %4742  ;;  %4325 = vmatprep.mubr.msk.bf16.mxu1 %vm69_vm2, %v326_v7 }
 0x31a   :  { %v4745_v9 = vunpack.i.h.bf16 %v4743_v8  ;;  %v4744_v10 = vunpack.i.l.bf16 %v4743_v8  ;;  %4679 = vmatprep.subr.msk.bf16.mxu1 %vm69_vm2, %v370_v5  ;;  %v315_v11 = vpop.permute.xlu0 %314  ;;  %v435_v17 = vsel %vm69_vm2, %v370_v5, 0 }
 0x31c   :  { %v371_v13 = vpack.c.bf16 %v4745_v9, %v4744_v10 }
 0x31d   :  { %v4748_v12 = vpop.permute.xlu1 %4747 }
 0x31e   :  { %v4750_v14 = vunpack.i.h.bf16 %v4748_v12  ;;  %v4749_v16 = vunpack.i.l.bf16 %v4748_v12  ;;  %v4753_v18 = vpop.permute.xlu0 %4752  ;;  %v438_v27 = vsel %vm69_vm2, %v371_v13, 0 }
 0x31f   :  { %4322 = vmatpush3.bf16.xpose.msra.mxu1 %v435_v17  ;;  %v4755_v20 = vunpack.i.h.bf16 %v4753_v18  ;;  %v4754_v21 = vunpack.i.l.bf16 %v4753_v18 }
 0x320   :  { %v374_v19 = vpack.c.bf16 %v4750_v14, %v4749_v16  ;;  %4680 = vmatprep.subr.msk.bf16.mxu1 %vm69_vm2, %v371_v13 }
 0x321   :  { %v321_v22 = vpop.permute.xlu1 %320  ;;  %v375_v23 = vpack.c.bf16 %v4755_v20, %v4754_v21 }
 0x322   :  { %4683 = vmatprep.subr.msk.bf16.mxu0 %vm69_vm2, %v374_v19  ;;  %v502_v24 = vsel %vm69_vm2, %v374_v19, 0  ;;  %v327_v29 = vpack.c.bf16 %v321_v22, %v315_v11  ;;  %v317_v37 = vpop.permute.xlu0 %316 }
 0x323   :  { %4334 = vmatpush3.bf16.xpose.msra.mxu0 %v502_v24  ;;  %v505_v28 = vsel %vm69_vm2, %v375_v23, 0 }
 0x324   :  { %4684 = vmatprep.subr.msk.bf16.mxu0 %vm69_vm2, %v375_v23 }
 0x325   :  { %v311_v25 = vpop.permute.xlu1 %310 }
 0x326   :  { %v328_v26 = vpack.c.bf16 %v311_v25, %v283_v54  ;;  %v116_v54 = vsub.s32 0, %v74_v40 }
 0x327   :  { %4324 = vmatpush3.bf16.xpose.msra.mxu1 %v438_v27 }
 0x328   :  { %4337 = vmatprep.mubr.msk.bf16.mxu0 %vm69_vm2, %v328_v26 }
 0x329   :  { %v323_v35 = vpop.permute.xlu1 %322 }
 0x32a   :  { %v329_v38 = vpack.c.bf16 %v323_v35, %v317_v37 }
 0x32b   :  { %4336 = vmatpush3.bf16.xpose.msra.mxu0 %v505_v28 }
 0x32c   :  { %4373 = vmatprep.subr.bf16.mxu0 %v5267_v15 }
 0x32e   :  { %4326 = vmatmul.mubr.msk.bf16.vlgmr.msra.gmra.mrb[0].mxu1 %vm69_vm2, %v327_v29 }
 0x332   :  { %4338 = vmatmul.mubr.msk.bf16.vlgmr.msra.gmra.mrb[4].mxu0 %vm69_vm2, %v329_v38 }
 0x333   :  { %4377 = vmatprep.mubr.msk.bf16.mxu0 %vm5268_vm1, %v5267_v15  ;;  %v66_v46 = vpop.permute.xlu0 %65 }
 0x334   :  { %v68_v48 = vmul.f32 %v66_v46, %v61_v44 }
 0x336   :  { %v70_v49 = vsel %vm69_vm2, %v68_v48, 1.0 }
 0x337   :  { %v90_v50 = vrot.slane %v70_v49, %v89_v45 }
 0x339   :  { %v91_v51 = vcombine.high %v90_v50, %v90_v50  ;;  %v98_v52 = vrot.slane %v90_v50, %v89_v45 }
 0x33b   :  { %vm108_vm9 = vcmp.gt.f32.partialorder %v98_v52, 0.5  ;;  %v105_v56 = vrot.slane %v91_v51, %v89_v45 }
 0x33c   :  { %v112_v57 = vsel %vm108_vm9, 1, %v5270_v41 }
 0x33d   :  { %v117_v58 = vrot.slane %v112_v57, %v116_v54  ;;  %vm109_vm11 = vcmp.gt.f32.partialorder %v105_v56, 0.5 }
 0x33e   :  { %v113_v59 = vsel %vm109_vm11, 1, %v5270_v41 }
 0x33f   :  { %vm122_vm12 = vcmp.eq.s32.totalorder %v117_v58, 1  ;;  %v121_v60 = vrot.slane %v113_v59, %v116_v54 }
 0x340   :  { %vm124_vm13 = vmand %vm82_vm10, %vm122_vm12 }
 0x341   :  { %v126_v62 = vsel %vm124_vm13, 0.0, %v5275_v61  ;;  %vm123_vm14 = vcmp.eq.s32.totalorder %v121_v60, 1 }
 0x342   :  { %139 = vrot.lane.b32.xlu1 %v126_v62, %s6574_s0  ;;  %161 = vrot.lane.b32.xlu0 %v126_v62, %s5277_s19  ;;  %vm125_vm15 = vmand %vm82_vm10, %vm123_vm14  ;;  %v129_v1 = vsel %vm128_vm3, %v126_v62, -1e+09 }
 0x343   :  { %v127_v63 = vsel %vm125_vm15, 0.0, %v5275_v61  ;;  %v132_v5 = vsel %vm131_vm0, %v129_v1, -1e+09 }
 0x344   :  { %v5504_v9 = vsel %vm134_vm4, %v132_v5, -1e+09  ;;  %v130_v37 = vsel %vm128_vm3, %v127_v63, -1e+09 }
 0x345   :  { %v133_v46 = vsel %vm131_vm0, %v130_v37, -1e+09 }
 0x346   :  { %151 = vrot.lane.b32.xlu1 %v126_v62, %s5278_s1  ;;  %153 = vrot.lane.b32.xlu0 %v127_v63, %s5278_s1  ;;  %v5555_v49 = vsel %vm134_vm4, %v133_v46, -1e+09 }
 0x34a   :  { %141 = vrot.lane.b32.xlu1 %v127_v63, %s6574_s0 }
 0x34e   :  { %163 = vrot.lane.b32.xlu1 %v127_v63, %s5277_s19  ;;  %s6585_s19 = smov 24  }
 0x3b4   :  { %v140_v41 = vpop.permute.xlu1 %139  ;;  %v162_v3 = vpop.permute.xlu0 %161 }
 0x3b5   :  { %v145_v2 = vsel %vm128_vm3, -1e+09, %v140_v41  ;;  %v5530_v30 = vsel %vm134_vm4, -1e+09, %v162_v3 }
 0x3b6   :  { %v147_v6 = vsel %vm131_vm0, %v145_v2, -1e+09 }
 0x3b7   :  { %v5507_v10 = vsel %vm134_vm4, %v147_v6, -1e+09 }
 0x3b8   :  { %v152_v0 = vpop.permute.xlu1 %151  ;;  %v154_v14 = vpop.permute.xlu0 %153 }
 0x3b9   :  { %v157_v7 = vsel %vm131_vm0, -1e+09, %v152_v0  ;;  %v158_v24 = vsel %vm131_vm0, -1e+09, %v154_v14 }
 0x3ba   :  { %v5510_v11 = vsel %vm134_vm4, %v157_v7, -1e+09  ;;  %v5542_v42 = vsel %vm134_vm4, %v158_v24, -1e+09 }
 0x3bc   :  { %v142_v4 = vpop.permute.xlu1 %141 }
 0x3bd   :  { %v146_v17 = vsel %vm128_vm3, -1e+09, %v142_v4 }
 0x3be   :  { %v148_v26 = vsel %vm131_vm0, %v146_v17, -1e+09 }
 0x3bf   :  { %v5539_v40 = vsel %vm134_vm4, %v148_v26, -1e+09 }
 0x3c0   :  { %v164_v18 = vpop.permute.xlu1 %163 }
 0x3c1   :  { %v5525_v27 = vsel %vm134_vm4, -1e+09, %v164_v18 }
 0x401   :  { %v4327_v8 = vpop.f32.mrb[0].mxu1 }
 0x402   :  { %v474_v12 = vpop.f32.mrb[1].mxu1  ;;  %v483_v20 = vadd.f32 %v4327_v8, %v5510_v11 }
 0x403   :  { %v5513_v13 = vadd.f32 %v474_v12, %v5504_v9  ;;  %v4328_v16 = vpop.f32.mrb[2].mxu1 }
 0x404   :  { %v477_v19 = vpop.f32.mrb[3].mxu1  ;;  %v486_v35 = vadd.f32 %v4328_v16, %v5530_v30  ;;  %v563_v38 = vsel %vm556_vm5, %v483_v20, -inf }
 0x405   :  { %v5518_v21 = vadd.f32 %v477_v19, %v5507_v10  ;;  %v4339_v22 = vpop.f32.mrb[4].mxu0  ;;  %v557_v23 = vsel %vm556_vm5, %v5513_v13, -inf }
 0x406   :  { %558 = vmax.xlane.f32.xlu0 %v557_v23  ;;  %v541_v25 = vpop.f32.mrb[5].mxu0  ;;  %v550_v45 = vadd.f32 %v4339_v22, %v5542_v42  ;;  %v566_v47 = vsel %vm556_vm5, %v486_v35, -inf }
 0x407   :  { %v4340_v28 = vpop.f32.mrb[6].mxu0  ;;  %v560_v29 = vsel %vm556_vm5, %v5518_v21, -inf  ;;  %v542_v50 = vadd.f32 %v541_v25, %v5555_v49 }
 0x408   :  { %v5533_v33 = vadd.f32 %v4340_v28, %v5525_v27  ;;  %561 = vmax.xlane.f32.xlu1 %v560_v29  ;;  %v544_v34 = vpop.f32.mrb[7].mxu0  ;;  %v575_v51 = vsel %vm556_vm5, %v550_v45, -inf }
 0x409   :  { %v5547_v44 = vadd.f32 %v544_v34, %v5539_v40  ;;  %v569_v52 = vsel %vm556_vm5, %v542_v50, -inf }
 0x40a   :  { %564 = vmax.xlane.f32.xlu0 %v563_v38  ;;  %v578_v43 = vsel %vm556_vm5, %v5533_v33, -inf }
 0x40b   :  { %v572_v48 = vsel %vm556_vm5, %v5547_v44, -inf }
 0x40c   :  { %579 = vmax.xlane.f32.xlu1 %v578_v43 }
 0x40e   :  { %567 = vmax.xlane.f32.xlu0 %v566_v47 }
 0x410   :  { %573 = vmax.xlane.f32.xlu1 %v572_v48 }
 0x412   :  { %576 = vmax.xlane.f32.xlu0 %v575_v51 }
 0x416   :  { %570 = vmax.xlane.f32.xlu0 %v569_v52 }
 0x421   :  { %296 = vrot.lane.b32.xlu1 %v5417_v39, %s5279_s20 }
 0x42c   :  { %294 = vrot.lane.b32.xlu0 %v5415_v36, %s5279_s20 }
 0x493   :  { %v559_v53 = vpop.xlane.xlu0 %558 }
 0x494   :  { %v581_v0 = vsub.f32 %v5513_v13, %v559_v53 }
 0x495   :  { %v562_v54 = vpop.xlane.xlu1 %561 }
 0x496   :  { %v582_v1 = vsub.f32 %v5518_v21, %v562_v54  ;;  %v589_v3 = vmul.f32 1.442695, %v581_v0 }
 0x497   :  { %v565_v55 = vpop.xlane.xlu0 %564 }
 0x498   :  { %v583_v41 = vsub.f32 %v483_v20, %v565_v55  ;;  %v591_v5 = vmul.f32 1.442695, %v582_v1 }
 0x499   :  { %v580_v56 = vpop.xlane.xlu1 %579 }
 0x49a   :  { %v593_v2 = vmul.f32 1.442695, %v583_v41  ;;  %v588_v14 = vsub.f32 %v5533_v33, %v580_v56 }
 0x49b   :  { %v568_v57 = vpop.xlane.xlu0 %567 }
 0x49c   :  { %v584_v4 = vsub.f32 %v486_v35, %v568_v57  ;;  %5087 = vpow2.f32 %v593_v2  ;;  %v603_v18 = vmul.f32 1.442695, %v588_v14 }
 0x49d   :  { %v574_v58 = vpop.xlane.xlu1 %573  ;;  %5089 = vpow2.f32 %v589_v3 }
 0x49e   :  { %v595_v6 = vmul.f32 1.442695, %v584_v4  ;;  %5091 = vpow2.f32 %v591_v5  ;;  %v586_v19 = vsub.f32 %v5547_v44, %v574_v58 }
 0x49f   :  { %v577_v59 = vpop.xlane.xlu0 %576 }
 0x4a0   :  { %v587_v7 = vsub.f32 %v550_v45, %v577_v59  ;;  %5093 = vpow2.f32 %v595_v6  ;;  %v599_v24 = vmul.f32 1.442695, %v586_v19 }
 0x4a1   :  { %v5564_v60 = vpop.permute.xlu1 %296 }
 0x4a2   :  { %301 = vst.msk [vmem:[%s6568_s18 + $0x8] sm:$0xff] %vm131_vm0, %v5564_v60  ;;  %v601_v8 = vmul.f32 1.442695, %v587_v7 }
 0x4a3   :  { %v571_v61 = vpop.xlane.xlu0 %570 }
 0x4a4   :  { %v585_v12 = vsub.f32 %v542_v50, %v571_v61  ;;  %5095 = vpow2.f32 %v601_v8 }
 0x4a6   :  { %v597_v16 = vmul.f32 1.442695, %v585_v12  ;;  %v5584_v17 = vpop.eup %5087 }
 0x4a7   :  { %v295_v39 = vpop.permute.xlu0 %294  ;;  %v5586_v13 = vpop.eup %5089  ;;  %v611_v20 = vsel %vm556_vm5, %v5584_v17, 0.0 }
 0x4a8   :  { %300 = vst.msk [vmem:[%s6568_s18] sm:$0xff] %vm131_vm0, %v295_v39  ;;  %5097 = vpow2.f32 %v597_v16  ;;  %v5591_v21 = vpop.eup %5091  ;;  %v605_v22 = vsel %vm556_vm5, %v5586_v13, 0.0 }
 0x4a9   :  { %5099 = vpow2.f32 %v603_v18  ;;  %v608_v25 = vsel %vm556_vm5, %v5591_v21, 0.0 }
 0x4aa   :  { %v5595_v23 = vpop.eup %5093  ;;  %5101 = vpow2.f32 %v599_v24 }
 0x4ab   :  { %v614_v26 = vsel %vm556_vm5, %v5595_v23, 0.0 }
 0x4ae   :  { %v5601_v28 = vpop.eup %5095 }
 0x4af   :  { %v304_v36 = vld [vmem:[%s6554_s4] sm:$0xff]  ;;  %v623_v29 = vsel %vm556_vm5, %v5601_v28, 0.0  ;;  %v305_v44 = vld [vmem:[%s6554_s4 + $0x8] sm:$0xff] }
 0x4b0   :  { %v4762_v62 = vpack.i.bf16 %v295_v39, %v304_v36  ;;  %v414_v63 = vpack.c.bf16 %v295_v39, %v304_v36  ;;  %v4772_v45 = vpack.i.bf16 %v5564_v60, %v305_v44  ;;  %v418_v59 = vpack.c.bf16 %v5564_v60, %v305_v44 }
 0x4b2   :  { %4763 = vrot.lane.b32.xlu1 %v4762_v62, %s5272_s2  ;;  %4758 = vrot.lane.b32.xlu0 %v4762_v62, %s5271_s22  ;;  %v5605_v33 = vpop.eup %5097 }
 0x4b3   :  { %4341 = vmatprep.subr.bf16.mxu1 %v414_v63  ;;  %v617_v34 = vsel %vm556_vm5, %v5605_v33, 0.0  ;;  %v5609_v35 = vpop.eup %5099 }
 0x4b4   :  { %4342 = vmatpush3.bf16.msra.mxu1 %v414_v63  ;;  %v626_v37 = vsel %vm556_vm5, %v5609_v35, 0.0  ;;  %v5613_v38 = vpop.eup %5101 }
 0x4b5   :  { %v620_v43 = vsel %vm556_vm5, %v5613_v38, 0.0 }
 0x4b6   :  { %4768 = vrot.lane.b32.xlu0 %v4762_v62, %s5273_s23 }
 0x4d5   :  { %612 = vadd.xlane.f32.xlu0 %v611_v20 }
 0x4d6   :  { %606 = vadd.xlane.f32.xlu1 %v605_v22 }
 0x4d9   :  { %609 = vadd.xlane.f32.xlu0 %v608_v25 }
 0x4da   :  { %615 = vadd.xlane.f32.xlu1 %v614_v26 }
 0x4de   :  { %624 = vadd.xlane.f32.xlu1 %v623_v29 }
 0x4e2   :  { %618 = vadd.xlane.f32.xlu1 %v617_v34 }
 0x4e6   :  { %627 = vadd.xlane.f32.xlu1 %v626_v37 }
 0x4ea   :  { %621 = vadd.xlane.f32.xlu1 %v620_v43 }
 0x4ef   :  { %4773 = vrot.lane.b32.xlu0 %v4772_v45, %s5271_s22 }
 0x4f3   :  { %4778 = vrot.lane.b32.xlu0 %v4772_v45, %s5272_s2 }
 0x4fb   :  { %4783 = vrot.lane.b32.xlu1 %v4772_v45, %s5273_s23 }
 0x524   :  { %v4764_v46 = vpop.permute.xlu1 %4763  ;;  %v4759_v47 = vpop.permute.xlu0 %4758 }
 0x525   :  { %v4766_v48 = vunpack.i.h.bf16 %v4764_v46  ;;  %v4765_v50 = vunpack.i.l.bf16 %v4764_v46  ;;  %v4761_v51 = vunpack.i.h.bf16 %v4759_v47  ;;  %v4760_v52 = vunpack.i.l.bf16 %v4759_v47 }
 0x527   :  { %v415_v53 = vpack.c.bf16 %v4761_v51, %v4760_v52  ;;  %v416_v57 = vpack.c.bf16 %v4766_v48, %v4765_v50 }
 0x528   :  { %v4769_v54 = vpop.permute.xlu0 %4768 }
 0x529   :  { %v4771_v55 = vunpack.i.h.bf16 %v4769_v54  ;;  %v4770_v56 = vunpack.i.l.bf16 %v4769_v54  ;;  %4343 = vmatprep.subr.bf16.mxu1 %v415_v53 }
 0x52a   :  { %4344 = vmatpush3.bf16.msra.mxu1 %v415_v53 }
 0x52b   :  { %4345 = vmatprep.subr.bf16.mxu1 %v416_v57  ;;  %v417_v58 = vpack.c.bf16 %v4771_v55, %v4770_v56 }
 0x52e   :  { %4346 = vmatpush3.bf16.msra.mxu1 %v416_v57 }
 0x52f   :  { %4347 = vmatprep.subr.bf16.mxu1 %v417_v58 }
 0x532   :  { %4348 = vmatpush3.bf16.msra.mxu1 %v417_v58 }
 0x533   :  { %4353 = vmatprep.subr.bf16.mxu1 %v418_v59 }
 0x562   :  { %v613_v61 = vpop.xlane.xlu0 %612 }
 0x563   :  { %v607_v39 = vpop.xlane.xlu1 %606 }
 0x564   :  { %5103 = vrcp.f32 %v607_v39 }
 0x565   :  { %5105 = vrcp.f32 %v613_v61 }
 0x566   :  { %v610_v36 = vpop.xlane.xlu0 %609 }
 0x567   :  { %5107 = vrcp.f32 %v610_v36  ;;  %v616_v62 = vpop.xlane.xlu1 %615 }
 0x568   :  { %5109 = vrcp.f32 %v616_v62 }
 0x56a   :  { %v4774_v41 = vpop.permute.xlu0 %4773 }
 0x56b   :  { %v625_v63 = vpop.xlane.xlu1 %624  ;;  %v4776_v8 = vunpack.i.h.bf16 %v4774_v41  ;;  %v4775_v12 = vunpack.i.l.bf16 %v4774_v41 }
 0x56e   :  { %v5104_v0 = vpop.eup %5103  ;;  %v4779_v16 = vpop.permute.xlu0 %4778 }
 0x56f   :  { %v619_v1 = vpop.xlane.xlu1 %618  ;;  %v5106_v2 = vpop.eup %5105  ;;  %v637_v5 = vmul.f32 %v5104_v0, %v5586_v13  ;;  %v4781_v20 = vunpack.i.h.bf16 %v4779_v16  ;;  %v4780_v22 = vunpack.i.l.bf16 %v4779_v16 }
 0x570   :  { %v639_v6 = vmul.f32 %v5106_v2, %v5584_v17 }
 0x571   :  { %v5108_v3 = vpop.eup %5107 }
 0x572   :  { %v5110_v4 = vpop.eup %5109  ;;  %v638_v60 = vmul.f32 %v5108_v3, %v5591_v21  ;;  %v419_v21 = vpack.c.bf16 %v4776_v8, %v4775_v12  ;;  %v3898_v12 = vld [vmem:[%s6560_s10] ss:$0 sm:$0xff] }
 0x573   :  { %v640_v7 = vmul.f32 %v5110_v4, %v5595_v23  ;;  %v628_v14 = vpop.xlane.xlu1 %627  ;;  %v420_v23 = vpack.c.bf16 %v4781_v20, %v4780_v22 }
 0x574   :  { %v645_v18 = vpack.c.bf16 %v638_v60, %v637_v5  ;;  %5111 = vrcp.f32 %v628_v14 }
 0x575   :  { %v646_v19 = vpack.c.bf16 %v640_v7, %v639_v6  ;;  %5113 = vrcp.f32 %v619_v1 }
 0x576   :  { %4349 = vmatprep.mubr.msk.bf16.mxu1 %vm556_vm5, %v645_v18  ;;  %5115 = vrcp.f32 %v625_v63 }
 0x577   :  { %v622_v13 = vpop.xlane.xlu1 %621  ;;  %4350 = vmatmul.mubr.msk.bf16.vlgmr.msra.gmra.mrb[4].mxu1 %vm556_vm5, %v646_v19 }
 0x578   :  { %5117 = vrcp.f32 %v622_v13  ;;  %4354 = vmatpush3.bf16.msra.mxu1 %v418_v59 }
 0x579   :  { %4355 = vmatprep.subr.bf16.mxu1 %v419_v21 }
 0x57b   :  { %v4784_v17 = vpop.permute.xlu1 %4783 }
 0x57c   :  { %v4786_v24 = vunpack.i.h.bf16 %v4784_v17  ;;  %v4785_v25 = vunpack.i.l.bf16 %v4784_v17  ;;  %4356 = vmatpush3.bf16.msra.mxu1 %v419_v21 }
 0x57d   :  { %4357 = vmatprep.subr.bf16.mxu1 %v420_v23 }
 0x57e   :  { %v421_v26 = vpack.c.bf16 %v4786_v24, %v4785_v25  ;;  %v5112_v29 = vpop.eup %5111 }
 0x57f   :  { %v5114_v34 = vpop.eup %5113  ;;  %v644_v44 = vmul.f32 %v5112_v29, %v5609_v35 }
 0x580   :  { %4358 = vmatpush3.bf16.msra.mxu1 %v420_v23  ;;  %v5116_v37 = vpop.eup %5115  ;;  %v641_v45 = vmul.f32 %v5114_v34, %v5605_v33 }
 0x581   :  { %4359 = vmatprep.subr.bf16.mxu1 %v421_v26  ;;  %v643_v47 = vmul.f32 %v5116_v37, %v5601_v28  ;;  %v5029_v28 = vld [vmem:[%s6559_s9] sm:$0xff]  }
 0x582   :  { %v5118_v43 = vpop.eup %5117 }
 0x583   :  { %v642_v46 = vmul.f32 %v5118_v43, %v5613_v38  ;;  %v648_v50 = vpack.c.bf16 %v644_v44, %v643_v47  ;;  %v5030_v38 = vld [vmem:[%s6559_s9 + $0x8] sm:$0xff]   ;;  %v5033_v47 = vld [vmem:[%s6564_s14] sm:$0xff]  }
 0x584   :  { %4360 = vmatpush3.bf16.msra.mxu1 %v421_v26 }
 0x585   :  { %v647_v48 = vpack.c.bf16 %v642_v46, %v641_v45  ;;  %4365 = vmatprep.subr.bf16.mxu1 %v5267_v15  ;;  %v5031_v45 = vld [vmem:[%s6563_s13] sm:$0xff]   ;;  %v5032_v46 = vld [vmem:[%s6563_s13 + $0x8] sm:$0xff]  }
 0x586   :  { %4374 = vmatpush3.bf16.msra.mxu0 %v5031_v45 }
 0x587   :  { %4361 = vmatprep.mubr.msk.bf16.mxu1 %vm556_vm5, %v647_v48  ;;  %4375 = vmatprep.subr.bf16.mxu0 %v5267_v15  ;;  %v5034_v48 = vld [vmem:[%s6564_s14 + $0x8] sm:$0xff]  }
 0x588   :  { %4362 = vmatmul.mubr.msk.bf16.vlgmr.msra.gmra.mrb[8].mxu1 %vm556_vm5, %v648_v50  ;;  %v5035_v50 = vld [vmem:[%s6564_s14 + $0x10] sm:$0xff]  }
 0x589   :  { %4369 = vmatprep.mubr.msk.bf16.mxu1 %vm5268_vm1, %v5267_v15  ;;  %4366 = vmatpush3.bf16.msra.mxu1 %v5029_v28 }
 0x58a   :  { %4367 = vmatprep.subr.bf16.mxu1 %v5267_v15  ;;  %4376 = vmatpush3.bf16.msra.mxu0 %v5032_v46  ;;  %v5042_v46 = vld [vmem:[%s6557_s7 + $0x18] sm:$0xff]  }
 0x58b   :  { %4401 = vmatprep.subr.bf16.mxu0 %v5267_v15 }
 0x58d   :  { %4368 = vmatpush3.bf16.msra.mxu1 %v5030_v38 }
 0x58e   :  { %4381 = vmatprep.subr.bf16.mxu1 %v5267_v15 }
 0x64a   :  { %v4351_v51 = vpop.f32.mrb[4].mxu1 }
 0x64b   :  { %v689_v35 = vpop.f32.mrb[5].mxu1 }
 0x64c   :  { %v4352_v52 = vpop.f32.mrb[6].mxu1 }
 0x64d   :  { %v692_v33 = vpop.f32.mrb[7].mxu1 }
 0x65b   :  { %v4363_v53 = vpop.f32.mrb[8].mxu1 }
 0x65c   :  { %v4787_v54 = vpack.i.bf16 %v4363_v53, %v4351_v51  ;;  %v744_v55 = vpop.f32.mrb[9].mxu1  ;;  %v5036_v51 = vld [vmem:[%s6564_s14 + $0x18] sm:$0xff]  }
 0x65d   :  { %v4364_v56 = vpop.f32.mrb[10].mxu1 }
 0x65e   :  { %v4797_v57 = vpack.i.bf16 %v4364_v56, %v4352_v52  ;;  %4788 = vrot.lane.b32.xlu1 %v4787_v54, %s6574_s0  ;;  %v747_v58 = vpop.f32.mrb[11].mxu1  ;;  %v5038_v52 = vld [vmem:[%s6564_s14 + $0x28] sm:$0xff]  }
 0x65f   :  { %v4792_v59 = vpack.i.bf16 %v747_v58, %v692_v33  ;;  %v3902_v58 = vld [vmem:[%s6561_s11] ss:$0 sm:$0xff] }
 0x661   :  { %4793 = vrot.lane.b32.xlu0 %v4792_v59, %s6572_s26 }
 0x665   :  { %4798 = vrot.lane.b32.xlu0 %v4797_v57, %s6570_s28 }
 0x6d0   :  { %v4789_v39 = vpop.permute.xlu1 %4788 }
 0x6d1   :  { %v4791_v0 = vunpack.i.h.bf16 %v4789_v39  ;;  %v4790_v1 = vunpack.i.l.bf16 %v4789_v39 }
 0x6d3   :  { %v4794_v61 = vpop.permute.xlu0 %4793 }
 0x6d4   :  { %v4796_v36 = vunpack.i.h.bf16 %v4794_v61  ;;  %v4795_v62 = vunpack.i.l.bf16 %v4794_v61 }
 0x6d6   :  { %v784_v63 = vsel %vm69_vm2, %v744_v55, %v4796_v36  ;;  %v783_v41 = vsel %vm69_vm2, %v689_v35, %v4795_v62  ;;  %v5037_v35 = vld [vmem:[%s6564_s14 + $0x20] sm:$0xff]  }
 0x6d7   :  { %v4799_v2 = vpop.permute.xlu0 %4798  ;;  %v785_v5 = vsel %vm128_vm3, %v783_v41, %v4790_v1  ;;  %v786_v60 = vsel %vm128_vm3, %v784_v63, %v4791_v0  ;;  %v3903_v36 = vld [vmem:[%s6562_s12] ss:$0 sm:$0xff]  ;;  %v5039_v1 = vld [vmem:[%s6564_s14 + $0x30] sm:$0xff]  }
 0x6d8   :  { %v4801_v3 = vunpack.i.h.bf16 %v4799_v2  ;;  %v4800_v4 = vunpack.i.l.bf16 %v4799_v2  ;;  %v5040_v2 = vld [vmem:[%s6564_s14 + $0x38] sm:$0xff]  }
 0x6da   :  { %v788_v6 = vsel %vm787_vm6, %v785_v5, %v4800_v4  ;;  %v789_v7 = vsel %vm787_vm6, %v786_v60, %v4801_v3 }
 0x6db   :  { %v790_v8 = vpack.c.bf16 %v789_v7, %v788_v6 }
 0x6dd   :  { %4370 = vmatmul.mubr.msk.bf16.vlgmr.msra.gmra.mrb[12].mxu1 %vm131_vm0, %v790_v8 }
 0x6de   :  { %4397 = vmatprep.mubr.msk.bf16.mxu1 %vm5268_vm1, %v5267_v15  ;;  %4382 = vmatpush3.bf16.msra.mxu1 %v5033_v47 }
 0x6df   :  { %4383 = vmatprep.subr.bf16.mxu1 %v5267_v15 }
 0x6e2   :  { %4384 = vmatpush3.bf16.msra.mxu1 %v5034_v48 }
 0x6e3   :  { %4385 = vmatprep.subr.bf16.mxu1 %v5267_v15 }
 0x6e6   :  { %4386 = vmatpush3.bf16.msra.mxu1 %v5035_v50 }
 0x6e7   :  { %4387 = vmatprep.subr.bf16.mxu1 %v5267_v15 }
 0x6ea   :  { %4388 = vmatpush3.bf16.msra.mxu1 %v5036_v51 }
 0x6eb   :  { %4389 = vmatprep.subr.bf16.mxu1 %v5267_v15 }
 0x6ee   :  { %4390 = vmatpush3.bf16.msra.mxu1 %v5037_v35 }
 0x6ef   :  { %4391 = vmatprep.subr.bf16.mxu1 %v5267_v15 }
 0x6f2   :  { %4392 = vmatpush3.bf16.msra.mxu1 %v5038_v52 }
 0x6f3   :  { %4393 = vmatprep.subr.bf16.mxu1 %v5267_v15 }
 0x6f6   :  { %4394 = vmatpush3.bf16.msra.mxu1 %v5039_v1 }
 0x6f7   :  { %4395 = vmatprep.subr.bf16.mxu1 %v5267_v15 }
 0x6fa   :  { %4396 = vmatpush3.bf16.msra.mxu1 %v5040_v2 }
 0x7b0   :  { %v851_v14 = vpop.f32.mrb[12].mxu1 }
 0x7b1   :  { %v852_v16 = vadd.f32 %v3898_v12, %v851_v14  ;;  %v4371_v18 = vpop.f32.mrb[13].mxu1 }
 0x7b2   :  { %v854_v19 = vpop.f32.mrb[14].mxu1 }
 0x7b3   :  { %v5664_v20 = vadd.f32 %v852_v16, %v5405_v31  ;;  %v855_v22 = vadd.f32 %v3898_v12, %v854_v19  ;;  %v4372_v13 = vpop.f32.mrb[15].mxu1  ;;  %v3907_v12 = vld [vmem:[%s6565_s15] ss:$0 sm:$0xff] }
 0x7b5   :  { %v5667_v21 = vadd.f32 %v855_v22, %v5407_v32  ;;  %v860_v17 = vsel %vm131_vm0, %v5664_v20, 0.0 }
 0x7b6   :  { %861 = vadd.xlane.f32.xlu1 %v860_v17 }
 0x7b7   :  { %v863_v23 = vsel %vm131_vm0, %v5667_v21, 0.0 }
 0x7b8   :  { %864 = vadd.xlane.f32.xlu0 %v863_v23 }
 0x843   :  { %v862_v24 = vpop.xlane.xlu1 %861 }
 0x844   :  { %v866_v25 = vmul.f32 0.03125, %v862_v24 }
 0x845   :  { %v865_v26 = vpop.xlane.xlu0 %864 }
 0x846   :  { %v868_v29 = vsub.f32 %v5664_v20, %v866_v25  ;;  %v867_v31 = vmul.f32 0.03125, %v865_v26 }
 0x848   :  { %v869_v34 = vsub.f32 %v5667_v21, %v867_v31  ;;  %v870_v37 = vmul.f32 %v868_v29, %v868_v29 }
 0x84a   :  { %v872_v32 = vsel %vm131_vm0, %v870_v37, 0.0  ;;  %v871_v43 = vmul.f32 %v869_v34, %v869_v34 }
 0x84b   :  { %873 = vadd.xlane.f32.xlu0 %v872_v32 }
 0x84c   :  { %v875_v44 = vsel %vm131_vm0, %v871_v43, 0.0 }
 0x84f   :  { %876 = vadd.xlane.f32.xlu0 %v875_v44 }
 0x8d8   :  { %v874_v33 = vpop.xlane.xlu0 %873 }
 0x8d9   :  { %v878_v28 = vmul.f32 0.03125, %v874_v33 }
 0x8db   :  { %v880_v38 = vadd.f32 1e-05, %v878_v28  ;;  %v3917_v28 = vld [vmem:[%s6555_s5 + $0x1] ss:$0 sm:$0xff] }
 0x8dc   :  { %v877_v53 = vpop.xlane.xlu0 %876 }
 0x8dd   :  { %5119 = vrsqrt.f32 %v880_v38  ;;  %v879_v54 = vmul.f32 0.03125, %v877_v53 }
 0x8df   :  { %v881_v55 = vadd.f32 1e-05, %v879_v54 }
 0x8e1   :  { %5121 = vrsqrt.f32 %v881_v55 }
 0x8e7   :  { %v5120_v56 = vpop.eup %5119 }
 0x8e8   :  { %v884_v57 = vmul.f32 %v5120_v56, %v868_v29  ;;  %v3919_v56 = vld [vmem:[%s6556_s6 + $0x1] ss:$0 sm:$0xff] }
 0x8ea   :  { %v893_v61 = vmul.f32 %v3902_v58, %v884_v57 }
 0x8eb   :  { %v5122_v59 = vpop.eup %5121 }
 0x8ec   :  { %v885_v39 = vmul.f32 %v5122_v59, %v869_v34  ;;  %v902_v63 = vadd.f32 %v3903_v36, %v893_v61 }
 0x8ee   :  { %v894_v62 = vmul.f32 %v3902_v58, %v885_v39  ;;  %v3925_v39 = vld [vmem:[%s6558_s8 + $0x1] ss:$0 sm:$0xff] }
 0x8f0   :  { %v903_v41 = vadd.f32 %v3903_v36, %v894_v62 }
 0x8f2   :  { %v904_v0 = vpack.c.bf16 %v903_v41, %v902_v63 }
 0x8f4   :  { %4378 = vmatmul.mubr.msk.bf16.vlgmr.msra.gmra.mrb[8].mxu0 %vm131_vm0, %v904_v0 }
 0x8f5   :  { %4405 = vmatprep.mubr.msk.bf16.mxu0 %vm5268_vm1, %v5267_v15 }
 0x9c7   :  { %v958_v3 = vpop.f32.mrb[8].mxu0 }
 0x9c8   :  { %v4379_v4 = vpop.f32.mrb[9].mxu0  ;;  %v965_v60 = vmax.f32 %v958_v3, 0.0 }
 0x9c9   :  { %v961_v5 = vpop.f32.mrb[10].mxu0 }
 0x9ca   :  { %v966_v6 = vmax.f32 %v961_v5, 0.0  ;;  %v4380_v7 = vpop.f32.mrb[11].mxu0 }
 0x9cc   :  { %v967_v8 = vpack.c.bf16 %v966_v6, %v965_v60 }
 0x9ce   :  { %4398 = vmatmul.mubr.bf16.vlgmr.msra.gmra.mrb[16].mxu1 %v967_v8 }
 0xaa1   :  { %v1073_v14 = vpop.f32.mrb[16].mxu1 }
 0xaa2   :  { %v1074_v16 = vadd.f32 %v3907_v12, %v1073_v14  ;;  %v4399_v18 = vpop.f32.mrb[17].mxu1 }
 0xaa3   :  { %v1076_v19 = vpop.f32.mrb[18].mxu1 }
 0xaa4   :  { %v1077_v22 = vadd.f32 %v3907_v12, %v1076_v19  ;;  %v4400_v13 = vpop.f32.mrb[19].mxu1  ;;  %v1080_v17 = vadd.f32 %v1074_v16, %v5664_v20 }
 0xaa6   :  { %v1082_v23 = vsel %vm131_vm0, %v1080_v17, 0.0  ;;  %v1081_v24 = vadd.f32 %v1077_v22, %v5667_v21  ;;  %v5041_v21 = vld [vmem:[%s6557_s7 + $0x10] sm:$0xff]  }
 0xaa7   :  { %1083 = vadd.xlane.f32.xlu1 %v1082_v23  ;;  %4402 = vmatpush3.bf16.msra.mxu0 %v5041_v21 }
 0xaa8   :  { %v1085_v25 = vsel %vm131_vm0, %v1081_v24, 0.0  ;;  %4403 = vmatprep.subr.bf16.mxu0 %v5267_v15 }
 0xaa9   :  { %1086 = vadd.xlane.f32.xlu0 %v1085_v25 }
 0xaab   :  { %4404 = vmatpush3.bf16.msra.mxu0 %v5042_v46 }
 0xb34   :  { %v1084_v26 = vpop.xlane.xlu1 %1083 }
 0xb35   :  { %v1088_v29 = vmul.f32 0.03125, %v1084_v26 }
 0xb36   :  { %v1087_v31 = vpop.xlane.xlu0 %1086 }
 0xb37   :  { %v1090_v34 = vsub.f32 %v1080_v17, %v1088_v29  ;;  %v1089_v37 = vmul.f32 0.03125, %v1087_v31 }
 0xb39   :  { %v1091_v32 = vsub.f32 %v1081_v24, %v1089_v37  ;;  %v1092_v43 = vmul.f32 %v1090_v34, %v1090_v34 }
 0xb3b   :  { %v1094_v44 = vsel %vm131_vm0, %v1092_v43, 0.0  ;;  %v1093_v45 = vmul.f32 %v1091_v32, %v1091_v32 }
 0xb3c   :  { %1095 = vadd.xlane.f32.xlu1 %v1094_v44 }
 0xb3d   :  { %v1097_v20 = vsel %vm131_vm0, %v1093_v45, 0.0 }
 0xb3e   :  { %1098 = vadd.xlane.f32.xlu0 %v1097_v20 }
 0xbc9   :  { %v1096_v47 = vpop.xlane.xlu1 %1095 }
 0xbca   :  { %v1100_v48 = vmul.f32 0.03125, %v1096_v47 }
 0xbcb   :  { %v1099_v50 = vpop.xlane.xlu0 %1098 }
 0xbcc   :  { %v1102_v51 = vadd.f32 1e-05, %v1100_v48  ;;  %v1101_v35 = vmul.f32 0.03125, %v1099_v50 }
 0xbce   :  { %5123 = vrsqrt.f32 %v1102_v51  ;;  %v1103_v52 = vadd.f32 1e-05, %v1101_v35 }
 0xbd0   :  { %5125 = vrsqrt.f32 %v1103_v52 }
 0xbd8   :  { %v5124_v33 = vpop.eup %5123 }
 0xbd9   :  { %v1106_v38 = vmul.f32 %v5124_v33, %v1090_v34 }
 0xbda   :  { %v5126_v53 = vpop.eup %5125 }
 0xbdb   :  { %v1116_v54 = vmul.f32 %v3917_v28, %v1106_v38  ;;  %v1107_v55 = vmul.f32 %v5126_v53, %v1091_v32 }
 0xbdd   :  { %v1117_v57 = vmul.f32 %v3917_v28, %v1107_v55  ;;  %v5747_v58 = vadd.f32 %v3919_v56, %v1116_v54 }
 0xbdf   :  { %v5749_v59 = vadd.f32 %v3919_v56, %v1117_v57 }
 0xbe1   :  { %v1128_v61 = vpack.c.bf16 %v5749_v59, %v5747_v58 }
 0xbe3   :  { %4406 = vmatmul.mubr.msk.bf16.vlgmr.msra.gmra.mrb[12].mxu0 %vm131_vm0, %v1128_v61 }
 0xcb6   :  { %v1191_v36 = vpop.f32.mrb[12].mxu0 }
 0xcb7   :  { %v5757_v62 = vadd.f32 %v3925_v39, %v1191_v36  ;;  %v4407_v63 = vpop.f32.mrb[13].mxu0 }
 0xcb8   :  { %v1194_v41 = vpop.f32.mrb[14].mxu0 }
 0xcb9   :  { %v5759_v0 = vadd.f32 %v3925_v39, %v1194_v41  ;;  %1202 = vrot.lane.b32.xlu1 %v5757_v62, %s5269_s27  ;;  %v4408_v1 = vpop.f32.mrb[15].mxu0  ;;  %v1198_v16 = vmul.f32 0.125, %v5757_v62 }
 0xcbb   :  { %1204 = vrot.lane.b32.xlu0 %v5759_v0, %s5269_s27  ;;  %v1199_v18 = vmul.f32 0.125, %v5759_v0 }
 0xd2b   :  { %v1203_v2 = vpop.permute.xlu1 %1202 }
 0xd2c   :  { %3929 = vst.msk [vmem:[%s6567_s17 + $0x10] sm:$0xff] %vm131_vm0, %v1203_v2 }
 0xd2d   :  { %v1205_v3 = vpop.permute.xlu0 %1204 }
 0xd2e   :  { %3930 = vst.msk [vmem:[%s6567_s17 + $0x18] sm:$0xff] %vm131_vm0, %v1205_v3 }
 0xd35   :  { %v3933_v4 = vld [vmem:[%s6553_s3 + $0x10] sm:$0xff]  ;;  %v3934_v6 = vld [vmem:[%s6553_s3 + $0x18] sm:$0xff] }
 0xd36   :  { %v4802_v5 = vpack.i.bf16 %v1203_v2, %v3933_v4  ;;  %v1288_v60 = vpack.c.bf16 %v1203_v2, %v3933_v4  ;;  %v1292_v8 = vpack.c.bf16 %v1205_v3, %v3934_v6  ;;  %v4822_v14 = vpack.i.bf16 %v1205_v3, %v3934_v6 }
 0xd38   :  { %4803 = vrot.lane.b32.xlu1 %v4802_v5, %s5271_s22  ;;  %4685 = vmatprep.subr.msk.bf16.mxu0 %vm69_vm2, %v1288_v60  ;;  %v1349_v7 = vsel %vm69_vm2, %v1288_v60, 0  ;;  %v1416_v12 = vsel %vm69_vm2, %v1292_v8, 0 }
 0xd39   :  { %4818 = vrot.lane.b32.xlu0 %v4802_v5, %s5273_s23  ;;  %4410 = vmatpush3.bf16.xpose.msra.mxu0 %v1349_v7 }
 0xd3a   :  { %4689 = vmatprep.subr.msk.bf16.mxu1 %vm69_vm2, %v1292_v8 }
 0xd3b   :  { %4422 = vmatpush3.bf16.xpose.msra.mxu1 %v1416_v12 }
 0xd3c   :  { %4808 = vrot.lane.b32.xlu1 %v4802_v5, %s5272_s2 }
 0xd3d   :  { %4823 = vrot.lane.b32.xlu0 %v4822_v14, %s5272_s2 }
 0xd40   :  { %4813 = vrot.lane.b32.xlu1 %v4822_v14, %s5271_s22 }
 0xd41   :  { %1240 = vrot.lane.b32.xlu0 %v1198_v16, %s5273_s23 }
 0xd44   :  { %1228 = vrot.lane.b32.xlu1 %v1198_v16, %s5271_s22 }
 0xd45   :  { %1230 = vrot.lane.b32.xlu0 %v1199_v18, %s5271_s22 }
 0xd48   :  { %1234 = vrot.lane.b32.xlu1 %v1198_v16, %s5272_s2 }
 0xd49   :  { %1242 = vrot.lane.b32.xlu0 %v1199_v18, %s5273_s23 }
 0xd4c   :  { %4828 = vrot.lane.b32.xlu1 %v4822_v14, %s5273_s23 }
 0xd50   :  { %1236 = vrot.lane.b32.xlu1 %v1199_v18, %s5272_s2 }
 0xdaa   :  { %v4804_v19 = vpop.permute.xlu1 %4803 }
 0xdab   :  { %v4806_v22 = vunpack.i.h.bf16 %v4804_v19  ;;  %v4805_v13 = vunpack.i.l.bf16 %v4804_v19  ;;  %v4819_v17 = vpop.permute.xlu0 %4818 }
 0xdac   :  { %v4821_v32 = vunpack.i.h.bf16 %v4819_v17  ;;  %v4820_v43 = vunpack.i.l.bf16 %v4819_v17 }
 0xdad   :  { %v1289_v23 = vpack.c.bf16 %v4806_v22, %v4805_v13 }
 0xdae   :  { %v4809_v24 = vpop.permute.xlu1 %4808  ;;  %v1291_v50 = vpack.c.bf16 %v4821_v32, %v4820_v43 }
 0xdaf   :  { %v4811_v25 = vunpack.i.h.bf16 %v4809_v24  ;;  %v4810_v26 = vunpack.i.l.bf16 %v4809_v24  ;;  %v4824_v29 = vpop.permute.xlu0 %4823  ;;  %4686 = vmatprep.subr.msk.bf16.mxu0 %vm69_vm2, %v1289_v23  ;;  %v1352_v31 = vsel %vm69_vm2, %v1289_v23, 0 }
 0xdb0   :  { %4412 = vmatpush3.bf16.xpose.msra.mxu0 %v1352_v31  ;;  %v4826_v21 = vunpack.i.h.bf16 %v4824_v29  ;;  %v4825_v46 = vunpack.i.l.bf16 %v4824_v29  ;;  %v1358_v57 = vsel %vm69_vm2, %v1291_v50, 0 }
 0xdb1   :  { %v1290_v34 = vpack.c.bf16 %v4811_v25, %v4810_v26 }
 0xdb2   :  { %v4814_v37 = vpop.permute.xlu1 %4813  ;;  %v1294_v28 = vpack.c.bf16 %v4826_v21, %v4825_v46 }
 0xdb3   :  { %v4816_v44 = vunpack.i.h.bf16 %v4814_v37  ;;  %v4815_v45 = vunpack.i.l.bf16 %v4814_v37  ;;  %v1241_v20 = vpop.permute.xlu0 %1240  ;;  %4687 = vmatprep.subr.msk.bf16.mxu0 %vm69_vm2, %v1290_v34  ;;  %v1355_v52 = vsel %vm69_vm2, %v1290_v34, 0 }
 0xdb4   :  { %v1422_v61 = vsel %vm69_vm2, %v1294_v28, 0 }
 0xdb5   :  { %v1293_v47 = vpack.c.bf16 %v4816_v44, %v4815_v45 }
 0xdb6   :  { %v1229_v48 = vpop.permute.xlu1 %1228 }
 0xdb7   :  { %v1246_v51 = vpack.c.bf16 %v1229_v48, %v1198_v16  ;;  %v1231_v35 = vpop.permute.xlu0 %1230  ;;  %4690 = vmatprep.subr.msk.bf16.mxu1 %vm69_vm2, %v1293_v47  ;;  %v1419_v33 = vsel %vm69_vm2, %v1293_v47, 0 }
 0xdb8   :  { %v1248_v38 = vpack.c.bf16 %v1231_v35, %v1199_v18  ;;  %4414 = vmatpush3.bf16.xpose.msra.mxu0 %v1355_v52  ;;  %4424 = vmatpush3.bf16.xpose.msra.mxu1 %v1419_v33 }
 0xdb9   :  { %4688 = vmatprep.subr.msk.bf16.mxu0 %vm69_vm2, %v1291_v50  ;;  %4417 = vmatprep.mubr.msk.bf16.mxu0 %vm69_vm2, %v1246_v51 }
 0xdba   :  { %4691 = vmatprep.subr.msk.bf16.mxu1 %vm69_vm2, %v1294_v28  ;;  %4429 = vmatprep.mubr.msk.bf16.mxu1 %vm69_vm2, %v1248_v38  ;;  %v1235_v53 = vpop.permute.xlu1 %1234 }
 0xdbb   :  { %v1247_v36 = vpack.c.bf16 %v1241_v20, %v1235_v53  ;;  %v1243_v1 = vpop.permute.xlu0 %1242 }
 0xdbe   :  { %v4829_v54 = vpop.permute.xlu1 %4828 }
 0xdbf   :  { %v4831_v55 = vunpack.i.h.bf16 %v4829_v54  ;;  %v4830_v56 = vunpack.i.l.bf16 %v4829_v54 }
 0xdc0   :  { %4416 = vmatpush3.bf16.xpose.msra.mxu0 %v1358_v57  ;;  %4426 = vmatpush3.bf16.xpose.msra.mxu1 %v1422_v61 }
 0xdc1   :  { %v1295_v39 = vpack.c.bf16 %v4831_v55, %v4830_v56 }
 0xdc2   :  { %v1237_v41 = vpop.permute.xlu1 %1236 }
 0xdc3   :  { %4692 = vmatprep.subr.msk.bf16.mxu1 %vm69_vm2, %v1295_v39  ;;  %v1425_v63 = vsel %vm69_vm2, %v1295_v39, 0  ;;  %v1249_v2 = vpack.c.bf16 %v1243_v1, %v1237_v41 }
 0xdc7   :  { %4418 = vmatmul.mubr.msk.bf16.vlgmr.msra.gmra.mrb[16].mxu0 %vm69_vm2, %v1247_v36 }
 0xdc8   :  { %4428 = vmatpush3.bf16.xpose.msra.mxu1 %v1425_v63 }
 0xdc9   :  { %4457 = vmatprep.subr.bf16.mxu1 %v5267_v15 }
 0xdcf   :  { %4430 = vmatmul.mubr.msk.bf16.vlgmr.msra.gmra.mrb[20].mxu1 %vm69_vm2, %v1249_v2 }
 0xdd0   :  { %4461 = vmatprep.mubr.msk.bf16.mxu1 %vm5268_vm1, %v5267_v15 }
 0xe9a   :  { %v4419_v3 = vpop.f32.mrb[16].mxu0 }
 0xe9b   :  { %v5817_v4 = vadd.f32 %v4419_v3, %v5510_v11  ;;  %v1394_v5 = vpop.f32.mrb[17].mxu0 }
 0xe9c   :  { %v5820_v60 = vadd.f32 %v1394_v5, %v5504_v9  ;;  %v4420_v6 = vpop.f32.mrb[18].mxu0 }
 0xe9d   :  { %v1406_v7 = vadd.f32 %v4420_v6, %v5530_v30  ;;  %v1397_v8 = vpop.f32.mrb[19].mxu0  ;;  %v1482_v12 = vsel %vm556_vm5, %v5817_v4, -inf }
 0xe9e   :  { %1483 = vmax.xlane.f32.xlu0 %v1482_v12  ;;  %v1476_v14 = vsel %vm556_vm5, %v5820_v60, -inf  ;;  %v1398_v16 = vadd.f32 %v1397_v8, %v5507_v10 }
 0xe9f   :  { %1477 = vmax.xlane.f32.xlu1 %v1476_v14  ;;  %v1485_v18 = vsel %vm556_vm5, %v1406_v7, -inf }
 0xea0   :  { %v1479_v26 = vsel %vm556_vm5, %v1398_v16, -inf }
 0xea2   :  { %1486 = vmax.xlane.f32.xlu0 %v1485_v18  ;;  %v4431_v19 = vpop.f32.mrb[20].mxu1 }
 0xea3   :  { %v1470_v22 = vadd.f32 %v4431_v19, %v5542_v42  ;;  %v1461_v13 = vpop.f32.mrb[21].mxu1 }
 0xea4   :  { %v4432_v17 = vpop.f32.mrb[22].mxu1  ;;  %v1462_v23 = vadd.f32 %v1461_v13, %v5555_v49 }
 0xea5   :  { %v1473_v24 = vadd.f32 %v4432_v17, %v5525_v27  ;;  %v1464_v25 = vpop.f32.mrb[23].mxu1  ;;  %v1494_v29 = vsel %vm556_vm5, %v1470_v22, -inf }
 0xea6   :  { %1480 = vmax.xlane.f32.xlu0 %v1479_v26  ;;  %1495 = vmax.xlane.f32.xlu1 %v1494_v29  ;;  %v1465_v31 = vadd.f32 %v1464_v25, %v5539_v40  ;;  %v1488_v37 = vsel %vm556_vm5, %v1462_v23, -inf }
 0xea7   :  { %v1497_v34 = vsel %vm556_vm5, %v1473_v24, -inf }
 0xea8   :  { %v1491_v32 = vsel %vm556_vm5, %v1465_v31, -inf }
 0xeaa   :  { %1498 = vmax.xlane.f32.xlu0 %v1497_v34  ;;  %1489 = vmax.xlane.f32.xlu1 %v1488_v37 }
 0xeae   :  { %1492 = vmax.xlane.f32.xlu0 %v1491_v32 }
 0xebb   :  { %1211 = vrot.lane.b32.xlu1 %v5757_v62, %s5279_s20 }
 0xec4   :  { %1213 = vrot.lane.b32.xlu0 %v5759_v0, %s5279_s20 }
 0xf2b   :  { %v1484_v43 = vpop.xlane.xlu0 %1483 }
 0xf2c   :  { %v1478_v44 = vpop.xlane.xlu1 %1477  ;;  %v1502_v18 = vsub.f32 %v5817_v4, %v1484_v43 }
 0xf2e   :  { %v1512_v19 = vmul.f32 1.442695, %v1502_v18 }
 0xf2f   :  { %v1487_v45 = vpop.xlane.xlu0 %1486 }
 0xf30   :  { %v1503_v20 = vsub.f32 %v1406_v7, %v1487_v45 }
 0xf32   :  { %v1514_v21 = vmul.f32 1.442695, %v1503_v20 }
 0xf33   :  { %v1481_v46 = vpop.xlane.xlu0 %1480  ;;  %v1496_v47 = vpop.xlane.xlu1 %1495 }
 0xf34   :  { %5127 = vpow2.f32 %v1514_v21  ;;  %v1501_v48 = vsub.f32 %v1398_v16, %v1481_v46  ;;  %v1506_v50 = vsub.f32 %v1470_v22, %v1496_v47  ;;  %v1500_v22 = vsub.f32 %v5820_v60, %v1478_v44 }
 0xf36   :  { %v1520_v51 = vmul.f32 1.442695, %v1506_v50  ;;  %v1510_v35 = vmul.f32 1.442695, %v1501_v48  ;;  %v1508_v13 = vmul.f32 1.442695, %v1500_v22 }
 0xf37   :  { %v1499_v52 = vpop.xlane.xlu0 %1498  ;;  %v1490_v33 = vpop.xlane.xlu1 %1489 }
 0xf38   :  { %v1504_v28 = vsub.f32 %v1462_v23, %v1490_v33  ;;  %5129 = vpow2.f32 %v1520_v51  ;;  %v1507_v62 = vsub.f32 %v1473_v24, %v1499_v52 }
 0xf39   :  { %5131 = vpow2.f32 %v1510_v35 }
 0xf3a   :  { %v1516_v38 = vmul.f32 1.442695, %v1504_v28  ;;  %v1522_v55 = vmul.f32 1.442695, %v1507_v62 }
 0xf3b   :  { %v1493_v0 = vpop.xlane.xlu0 %1492  ;;  %v1212_v53 = vpop.permute.xlu1 %1211 }
 0xf3c   :  { %3931 = vst.msk [vmem:[%s6568_s18 + $0x10] sm:$0xff] %vm131_vm0, %v1212_v53  ;;  %5133 = vpow2.f32 %v1516_v38  ;;  %v1505_v56 = vsub.f32 %v1465_v31, %v1493_v0 }
 0xf3d   :  { %5135 = vpow2.f32 %v1522_v55 }
 0xf3e   :  { %v5846_v54 = vpop.eup %5127  ;;  %v1518_v36 = vmul.f32 1.442695, %v1505_v56 }
 0xf3f   :  { %v5848_v57 = vpop.permute.xlu0 %1213  ;;  %v1533_v61 = vsel %vm556_vm5, %v5846_v54, 0.0 }
 0xf40   :  { %3932 = vst.msk [vmem:[%s6568_s18 + $0x18] sm:$0xff] %vm131_vm0, %v5848_v57  ;;  %1534 = vadd.xlane.f32.xlu0 %v1533_v61  ;;  %5137 = vpow2.f32 %v1518_v36 }
 0xf41   :  { %5139 = vpow2.f32 %v1512_v19 }
 0xf42   :  { %v5857_v39 = vpop.eup %5129  ;;  %5141 = vpow2.f32 %v1508_v13 }
 0xf43   :  { %v1542_v41 = vsel %vm556_vm5, %v5857_v39, 0.0  ;;  %v5864_v3 = vpop.eup %5131 }
 0xf44   :  { %1543 = vadd.xlane.f32.xlu0 %v1542_v41  ;;  %v1527_v5 = vsel %vm556_vm5, %v5864_v3, 0.0 }
 0xf46   :  { %v5869_v6 = vpop.eup %5133 }
 0xf47   :  { %v3935_v63 = vld [vmem:[%s6554_s4 + $0x10] sm:$0xff]  ;;  %v1536_v7 = vsel %vm556_vm5, %v5869_v6, 0.0  ;;  %v5874_v8 = vpop.eup %5135  ;;  %v3936_v4 = vld [vmem:[%s6554_s4 + $0x18] sm:$0xff] }
 0xf48   :  { %v4832_v1 = vpack.i.bf16 %v1212_v53, %v3935_v63  ;;  %v1334_v2 = vpack.c.bf16 %v1212_v53, %v3935_v63  ;;  %1528 = vadd.xlane.f32.xlu0 %v1527_v5  ;;  %v1545_v12 = vsel %vm556_vm5, %v5874_v8, 0.0  ;;  %v4847_v26 = vpack.i.bf16 %v5848_v57, %v3936_v4 }
 0xf49   :  { %v1338_v33 = vpack.c.bf16 %v5848_v57, %v3936_v4 }
 0xf4a   :  { %4833 = vrot.lane.b32.xlu1 %v4832_v1, %s5271_s22  ;;  %4433 = vmatprep.subr.bf16.mxu0 %v1334_v2  ;;  %v5878_v14 = vpop.eup %5137 }
 0xf4b   :  { %4434 = vmatpush3.bf16.msra.mxu0 %v1334_v2  ;;  %v1539_v16 = vsel %vm556_vm5, %v5878_v14, 0.0  ;;  %v5140_v17 = vpop.eup %5139 }
 0xf4c   :  { %1537 = vadd.xlane.f32.xlu0 %v1536_v7  ;;  %v1530_v23 = vsel %vm556_vm5, %v5140_v17, 0.0  ;;  %v5142_v24 = vpop.eup %5141 }
 0xf4d   :  { %v1524_v25 = vsel %vm556_vm5, %v5142_v24, 0.0 }
 0xf4e   :  { %4838 = vrot.lane.b32.xlu1 %v4832_v1, %s5272_s2 }
 0xf50   :  { %1546 = vadd.xlane.f32.xlu0 %v1545_v12 }
 0xf54   :  { %1540 = vadd.xlane.f32.xlu0 %v1539_v16 }
 0xf6a   :  { %4843 = vrot.lane.b32.xlu0 %v4832_v1, %s5273_s23 }
 0xf72   :  { %1531 = vadd.xlane.f32.xlu1 %v1530_v23 }
 0xf76   :  { %1525 = vadd.xlane.f32.xlu1 %v1524_v25 }
 0xf87   :  { %4848 = vrot.lane.b32.xlu1 %v4847_v26, %s5271_s22 }
 0xf8b   :  { %4853 = vrot.lane.b32.xlu1 %v4847_v26, %s5272_s2 }
 0xf8f   :  { %4858 = vrot.lane.b32.xlu1 %v4847_v26, %s5273_s23 }
 0xfbc   :  { %v4834_v60 = vpop.permute.xlu1 %4833 }
 0xfbd   :  { %v4836_v29 = vunpack.i.h.bf16 %v4834_v60  ;;  %v4835_v31 = vunpack.i.l.bf16 %v4834_v60 }
 0xfbf   :  { %v1335_v34 = vpack.c.bf16 %v4836_v29, %v4835_v31 }
 0xfc0   :  { %v4839_v37 = vpop.permute.xlu1 %4838 }
 0xfc1   :  { %v4841_v32 = vunpack.i.h.bf16 %v4839_v37  ;;  %v4840_v43 = vunpack.i.l.bf16 %v4839_v37  ;;  %4435 = vmatprep.subr.bf16.mxu0 %v1335_v34 }
 0xfc2   :  { %4436 = vmatpush3.bf16.msra.mxu0 %v1335_v34 }
 0xfc3   :  { %v1336_v44 = vpack.c.bf16 %v4841_v32, %v4840_v43 }
 0xfc5   :  { %4437 = vmatprep.subr.bf16.mxu0 %v1336_v44 }
 0xfc6   :  { %4438 = vmatpush3.bf16.msra.mxu0 %v1336_v44 }
 0xfcd   :  { %v1535_v45 = vpop.xlane.xlu0 %1534 }
 0xfce   :  { %5143 = vrcp.f32 %v1535_v45 }
 0xfd1   :  { %v1544_v20 = vpop.xlane.xlu0 %1543 }
 0xfd5   :  { %v1529_v21 = vpop.xlane.xlu0 %1528 }
 0xfd6   :  { %5145 = vrcp.f32 %v1529_v21 }
 0xfd8   :  { %v5144_v38 = vpop.eup %5143 }
 0xfd9   :  { %v1538_v46 = vpop.xlane.xlu0 %1537  ;;  %v1559_v5 = vmul.f32 %v5144_v38, %v5846_v54 }
 0xfdd   :  { %v1547_v47 = vpop.xlane.xlu0 %1546 }
 0xfe0   :  { %v5146_v53 = vpop.eup %5145 }
 0xfe1   :  { %v1541_v48 = vpop.xlane.xlu0 %1540  ;;  %v1557_v1 = vmul.f32 %v5146_v53, %v5864_v3 }
 0xfe5   :  { %v4844_v50 = vpop.permute.xlu0 %4843 }
 0xfe6   :  { %v4846_v51 = vunpack.i.h.bf16 %v4844_v50  ;;  %v4845_v35 = vunpack.i.l.bf16 %v4844_v50 }
 0xfe8   :  { %v1337_v52 = vpack.c.bf16 %v4846_v51, %v4845_v35 }
 0xfea   :  { %4439 = vmatprep.subr.bf16.mxu0 %v1337_v52 }
 0xfeb   :  { %4440 = vmatpush3.bf16.msra.mxu0 %v1337_v52 }
 0xfec   :  { %4445 = vmatprep.subr.bf16.mxu0 %v1338_v33 }
 0xfff   :  { %v1532_v28 = vpop.xlane.xlu1 %1531 }
0x1000   :  { %5147 = vrcp.f32 %v1532_v28 }
0x1001   :  { %5149 = vrcp.f32 %v1541_v48 }
0x1002   :  { %5151 = vrcp.f32 %v1538_v46 }
0x1003   :  { %v1526_v62 = vpop.xlane.xlu1 %1525 }
0x1004   :  { %5153 = vrcp.f32 %v1526_v62 }
0x1005   :  { %5155 = vrcp.f32 %v1547_v47 }
0x1006   :  { %5157 = vrcp.f32 %v1544_v20 }
0x1007   :  { %v4849_v0 = vpop.permute.xlu1 %4848 }
0x1008   :  { %v4851_v7 = vunpack.i.h.bf16 %v4849_v0  ;;  %v4850_v12 = vunpack.i.l.bf16 %v4849_v0 }
0x100a   :  { %v5148_v55 = vpop.eup %5147  ;;  %v1339_v3 = vpack.c.bf16 %v4851_v7, %v4850_v12 }
0x100b   :  { %v5150_v56 = vpop.eup %5149  ;;  %v1558_v63 = vmul.f32 %v5148_v55, %v5140_v17  ;;  %v4854_v41 = vpop.permute.xlu1 %4853 }
0x100c   :  { %v5152_v61 = vpop.eup %5151  ;;  %v1561_v2 = vmul.f32 %v5150_v56, %v5878_v14  ;;  %v4856_v13 = vunpack.i.h.bf16 %v4854_v41  ;;  %v4855_v17 = vunpack.i.l.bf16 %v4854_v41  ;;  %v3950_v41 = vld [vmem:[%s6560_s10 + $0x1] ss:$0 sm:$0xff] }
0x100d   :  { %v1560_v18 = vmul.f32 %v5152_v61, %v5869_v6  ;;  %v1565_v19 = vpack.c.bf16 %v1559_v5, %v1558_v63 }
0x100e   :  { %v5154_v36 = vpop.eup %5153 }
0x100f   :  { %v1556_v57 = vmul.f32 %v5154_v36, %v5142_v24  ;;  %v1566_v22 = vpack.c.bf16 %v1561_v2, %v1560_v18  ;;  %v4859_v23 = vpop.permute.xlu1 %4858  ;;  %v1340_v24 = vpack.c.bf16 %v4856_v13, %v4855_v17  ;;  %v5156_v6 = vpop.eup %5155 }
0x1010   :  { %v4861_v54 = vunpack.i.h.bf16 %v4859_v23  ;;  %v4860_v14 = vunpack.i.l.bf16 %v4859_v23  ;;  %v5158_v4 = vpop.eup %5157  ;;  %v1563_v26 = vmul.f32 %v5156_v6, %v5874_v8  ;;  %v5043_v8 = vld [vmem:[%s6559_s9 + $0x10] sm:$0xff]  }
0x1011   :  { %v1564_v16 = vpack.c.bf16 %v1557_v1, %v1556_v57  ;;  %v1562_v60 = vmul.f32 %v5158_v4, %v5857_v39  ;;  %4458 = vmatpush3.bf16.msra.mxu1 %v5043_v8  ;;  %v5044_v39 = vld [vmem:[%s6559_s9 + $0x18] sm:$0xff]  }
0x1012   :  { %v1341_v25 = vpack.c.bf16 %v4861_v54, %v4860_v14  ;;  %4459 = vmatprep.subr.bf16.mxu1 %v5267_v15  ;;  %v5046_v4 = vld [vmem:[%s6563_s13 + $0x18] sm:$0xff]  }
0x1013   :  { %4441 = vmatprep.mubr.msk.bf16.mxu0 %vm556_vm5, %v1564_v16  ;;  %v1567_v29 = vpack.c.bf16 %v1563_v26, %v1562_v60  ;;  %v5047_v26 = vld [vmem:[%s6564_s14 + $0x40] sm:$0xff]   ;;  %v5048_v60 = vld [vmem:[%s6564_s14 + $0x48] sm:$0xff]  }
0x1014   :  { %4442 = vmatmul.mubr.msk.bf16.vlgmr.msra.gmra.mrb[20].mxu0 %vm556_vm5, %v1565_v19 }
0x1015   :  { %4446 = vmatpush3.bf16.msra.mxu0 %v1338_v33  ;;  %4453 = vmatprep.mubr.msk.bf16.mxu0 %vm556_vm5, %v1566_v22 }
0x1016   :  { %4447 = vmatprep.subr.bf16.mxu0 %v1339_v3  ;;  %4460 = vmatpush3.bf16.msra.mxu1 %v5044_v39 }
0x1017   :  { %4465 = vmatprep.subr.bf16.mxu1 %v5267_v15 }
0x1019   :  { %4448 = vmatpush3.bf16.msra.mxu0 %v1339_v3 }
0x101a   :  { %4449 = vmatprep.subr.bf16.mxu0 %v1340_v24 }
0x101d   :  { %4450 = vmatpush3.bf16.msra.mxu0 %v1340_v24 }
0x101e   :  { %4451 = vmatprep.subr.bf16.mxu0 %v1341_v25 }
0x1021   :  { %4452 = vmatpush3.bf16.msra.mxu0 %v1341_v25  ;;  %v5045_v25 = vld [vmem:[%s6563_s13 + $0x10] sm:$0xff]  }
0x1022   :  { %4473 = vmatprep.subr.bf16.mxu0 %v5267_v15 }
0x1024   :  { %4454 = vmatmul.mubr.msk.bf16.vlgmr.msra.gmra.mrb[24].mxu0 %vm556_vm5, %v1567_v29  ;;  %v5049_v29 = vld [vmem:[%s6564_s14 + $0x50] sm:$0xff]  }
0x1025   :  { %4489 = vmatprep.mubr.msk.bf16.mxu0 %vm5268_vm1, %v5267_v15  ;;  %4474 = vmatpush3.bf16.msra.mxu0 %v5047_v26 }
0x1026   :  { %4475 = vmatprep.subr.bf16.mxu0 %v5267_v15 }
0x1029   :  { %4476 = vmatpush3.bf16.msra.mxu0 %v5048_v60 }
0x102a   :  { %4477 = vmatprep.subr.bf16.mxu0 %v5267_v15 }
0x102d   :  { %4478 = vmatpush3.bf16.msra.mxu0 %v5049_v29 }
0x102e   :  { %4479 = vmatprep.subr.bf16.mxu0 %v5267_v15 }
0x10e7   :  { %v4443_v31 = vpop.f32.mrb[20].mxu0 }
0x10e8   :  { %v1608_v34 = vpop.f32.mrb[21].mxu0 }
0x10e9   :  { %v4444_v37 = vpop.f32.mrb[22].mxu0 }
0x10ea   :  { %v1611_v32 = vpop.f32.mrb[23].mxu0 }
0x10f7   :  { %v4455_v43 = vpop.f32.mrb[24].mxu0 }
0x10f8   :  { %v4862_v44 = vpack.i.bf16 %v4455_v43, %v4443_v31  ;;  %v1663_v45 = vpop.f32.mrb[25].mxu0  ;;  %v5050_v31 = vld [vmem:[%s6564_s14 + $0x58] sm:$0xff]  }
0x10f9   :  { %v4456_v20 = vpop.f32.mrb[26].mxu0  ;;  %4480 = vmatpush3.bf16.msra.mxu0 %v5050_v31 }
0x10fa   :  { %v4872_v21 = vpack.i.bf16 %v4456_v20, %v4444_v37  ;;  %4863 = vrot.lane.b32.xlu1 %v4862_v44, %s6574_s0  ;;  %v1666_v46 = vpop.f32.mrb[27].mxu0  ;;  %4481 = vmatprep.subr.bf16.mxu0 %v5267_v15  ;;  %v5052_v37 = vld [vmem:[%s6564_s14 + $0x68] sm:$0xff]  }
0x10fb   :  { %v4867_v47 = vpack.i.bf16 %v1666_v46, %v1611_v32  ;;  %v3955_v46 = vld [vmem:[%s6561_s11 + $0x1] ss:$0 sm:$0xff] }
0x10fe   :  { %4868 = vrot.lane.b32.xlu1 %v4867_v47, %s6572_s26 }
0x1102   :  { %4873 = vrot.lane.b32.xlu1 %v4872_v21, %s6585_s19 }
0x116c   :  { %v4864_v48 = vpop.permute.xlu1 %4863 }
0x116d   :  { %v4866_v28 = vunpack.i.h.bf16 %v4864_v48  ;;  %v4865_v62 = vunpack.i.l.bf16 %v4864_v48 }
0x1170   :  { %v4869_v50 = vpop.permute.xlu1 %4868 }
0x1171   :  { %v4871_v51 = vunpack.i.h.bf16 %v4869_v50  ;;  %v4870_v35 = vunpack.i.l.bf16 %v4869_v50 }
0x1173   :  { %v1703_v52 = vsel %vm69_vm2, %v1663_v45, %v4871_v51  ;;  %v1702_v33 = vsel %vm69_vm2, %v1608_v34, %v4870_v35  ;;  %v5051_v34 = vld [vmem:[%s6564_s14 + $0x60] sm:$0xff]  }
0x1174   :  { %v4874_v38 = vpop.permute.xlu1 %4873  ;;  %v1704_v55 = vsel %vm128_vm3, %v1702_v33, %v4865_v62  ;;  %v1705_v56 = vsel %vm128_vm3, %v1703_v52, %v4866_v28  ;;  %4482 = vmatpush3.bf16.msra.mxu0 %v5051_v34  ;;  %v3957_v51 = vld [vmem:[%s6562_s12 + $0x1] ss:$0 sm:$0xff]  ;;  %v5053_v62 = vld [vmem:[%s6564_s14 + $0x70] sm:$0xff]  }
0x1175   :  { %v4876_v0 = vunpack.i.h.bf16 %v4874_v38  ;;  %v4875_v53 = vunpack.i.l.bf16 %v4874_v38  ;;  %4483 = vmatprep.subr.bf16.mxu0 %v5267_v15  ;;  %v5054_v38 = vld [vmem:[%s6564_s14 + $0x78] sm:$0xff]  }
0x1177   :  { %v1706_v61 = vsel %vm787_vm6, %v1704_v55, %v4875_v53  ;;  %v1707_v36 = vsel %vm787_vm6, %v1705_v56, %v4876_v0 }
0x1178   :  { %v1708_v63 = vpack.c.bf16 %v1707_v36, %v1706_v61  ;;  %4484 = vmatpush3.bf16.msra.mxu0 %v5052_v37 }
0x1179   :  { %4485 = vmatprep.subr.bf16.mxu0 %v5267_v15 }
0x117a   :  { %4462 = vmatmul.mubr.msk.bf16.vlgmr.msra.gmra.mrb[24].mxu1 %vm131_vm0, %v1708_v63 }
0x117b   :  { %4469 = vmatprep.mubr.msk.bf16.mxu1 %vm5268_vm1, %v5267_v15  ;;  %4466 = vmatpush3.bf16.msra.mxu1 %v5045_v25 }
0x117c   :  { %4467 = vmatprep.subr.bf16.mxu1 %v5267_v15  ;;  %4486 = vmatpush3.bf16.msra.mxu0 %v5053_v62 }
0x117d   :  { %4487 = vmatprep.subr.bf16.mxu0 %v5267_v15 }
0x117f   :  { %4468 = vmatpush3.bf16.msra.mxu1 %v5046_v4  ;;  %v5056_v4 = vld [vmem:[%s6557_s7 + $0x28] sm:$0xff]  }
0x1180   :  { %4493 = vmatprep.subr.bf16.mxu1 %v5267_v15  ;;  %4488 = vmatpush3.bf16.msra.mxu0 %v5054_v38 }
0x124d   :  { %v1771_v57 = vpop.f32.mrb[24].mxu1 }
0x124e   :  { %v1772_v1 = vadd.f32 %v3950_v41, %v1771_v57  ;;  %v4463_v2 = vpop.f32.mrb[25].mxu1 }
0x124f   :  { %v1774_v5 = vpop.f32.mrb[26].mxu1 }
0x1250   :  { %v5932_v7 = vadd.f32 %v1772_v1, %v5747_v58  ;;  %v1775_v12 = vadd.f32 %v3950_v41, %v1774_v5  ;;  %v4464_v16 = vpop.f32.mrb[27].mxu1  ;;  %v3982_v41 = vld [vmem:[%s6565_s15 + $0x1] ss:$0 sm:$0xff] }
0x1252   :  { %v5935_v18 = vadd.f32 %v1775_v12, %v5749_v59  ;;  %v1780_v19 = vsel %vm131_vm0, %v5932_v7, 0.0 }
0x1253   :  { %1781 = vadd.xlane.f32.xlu0 %v1780_v19 }
0x1254   :  { %v1783_v22 = vsel %vm131_vm0, %v5935_v18, 0.0 }
0x1255   :  { %1784 = vadd.xlane.f32.xlu1 %v1783_v22 }
0x12e0   :  { %v1782_v13 = vpop.xlane.xlu0 %1781 }
0x12e1   :  { %v1786_v17 = vmul.f32 0.03125, %v1782_v13 }
0x12e2   :  { %v1785_v3 = vpop.xlane.xlu1 %1784 }
0x12e3   :  { %v1788_v23 = vsub.f32 %v5932_v7, %v1786_v17  ;;  %v1787_v58 = vmul.f32 0.03125, %v1785_v3 }
0x12e5   :  { %v1789_v54 = vsub.f32 %v5935_v18, %v1787_v58  ;;  %v1790_v14 = vmul.f32 %v1788_v23, %v1788_v23 }
0x12e7   :  { %v1792_v59 = vsel %vm131_vm0, %v1790_v14, 0.0  ;;  %v1791_v24 = vmul.f32 %v1789_v54, %v1789_v54 }
0x12e8   :  { %1793 = vadd.xlane.f32.xlu0 %v1792_v59 }
0x12e9   :  { %v1795_v6 = vsel %vm131_vm0, %v1791_v24, 0.0 }
0x12ec   :  { %1796 = vadd.xlane.f32.xlu0 %v1795_v6 }
0x1375   :  { %v1794_v32 = vpop.xlane.xlu0 %1793 }
0x1376   :  { %v1798_v8 = vmul.f32 0.03125, %v1794_v32 }
0x1378   :  { %v1800_v39 = vadd.f32 1e-05, %v1798_v8  ;;  %v3992_v8 = vld [vmem:[%s6555_s5 + $0x2] ss:$0 sm:$0xff] }
0x1379   :  { %v1797_v43 = vpop.xlane.xlu0 %1796 }
0x137a   :  { %5159 = vrsqrt.f32 %v1800_v39  ;;  %v1799_v44 = vmul.f32 0.03125, %v1797_v43 }
0x137c   :  { %v1801_v45 = vadd.f32 1e-05, %v1799_v44 }
0x137e   :  { %5161 = vrsqrt.f32 %v1801_v45 }
0x1384   :  { %v5160_v20 = vpop.eup %5159 }
0x1385   :  { %v1804_v21 = vmul.f32 %v5160_v20, %v1788_v23  ;;  %v3994_v20 = vld [vmem:[%s6556_s6 + $0x2] ss:$0 sm:$0xff] }
0x1387   :  { %v1814_v48 = vmul.f32 %v3955_v46, %v1804_v21 }
0x1388   :  { %v5162_v47 = vpop.eup %5161 }
0x1389   :  { %v1805_v50 = vmul.f32 %v5162_v47, %v1789_v54  ;;  %v1824_v52 = vadd.f32 %v3957_v51, %v1814_v48 }
0x138b   :  { %v1815_v35 = vmul.f32 %v3955_v46, %v1805_v50  ;;  %v4000_v50 = vld [vmem:[%s6558_s8 + $0x2] ss:$0 sm:$0xff] }
0x138d   :  { %v1825_v33 = vadd.f32 %v3957_v51, %v1815_v35 }
0x138f   :  { %v1826_v28 = vpack.c.bf16 %v1825_v33, %v1824_v52 }
0x1391   :  { %4470 = vmatmul.mubr.msk.bf16.vlgmr.msra.gmra.mrb[28].mxu1 %vm131_vm0, %v1826_v28 }
0x1392   :  { %4497 = vmatprep.mubr.msk.bf16.mxu1 %vm5268_vm1, %v5267_v15 }
0x1464   :  { %v1881_v0 = vpop.f32.mrb[28].mxu1 }
0x1465   :  { %v4471_v53 = vpop.f32.mrb[29].mxu1  ;;  %v1888_v56 = vmax.f32 %v1881_v0, 0.0 }
0x1466   :  { %v1884_v55 = vpop.f32.mrb[30].mxu1 }
0x1467   :  { %v1889_v61 = vmax.f32 %v1884_v55, 0.0  ;;  %v4472_v36 = vpop.f32.mrb[31].mxu1 }
0x1469   :  { %v1890_v63 = vpack.c.bf16 %v1889_v61, %v1888_v56 }
0x146b   :  { %4490 = vmatmul.mubr.bf16.vlgmr.msra.gmra.mrb[28].mxu0 %v1890_v63 }
0x153e   :  { %v1998_v57 = vpop.f32.mrb[28].mxu0 }
0x153f   :  { %v1999_v1 = vadd.f32 %v3982_v41, %v1998_v57  ;;  %v4491_v2 = vpop.f32.mrb[29].mxu0 }
0x1540   :  { %v2001_v5 = vpop.f32.mrb[30].mxu0 }
0x1541   :  { %v2005_v12 = vadd.f32 %v1999_v1, %v5932_v7  ;;  %v2002_v16 = vadd.f32 %v3982_v41, %v2001_v5  ;;  %v4492_v19 = vpop.f32.mrb[31].mxu0 }
0x1543   :  { %v2006_v22 = vadd.f32 %v2002_v16, %v5935_v18  ;;  %v2007_v13 = vsel %vm131_vm0, %v2005_v12, 0.0  ;;  %v5055_v18 = vld [vmem:[%s6557_s7 + $0x20] sm:$0xff]  }
0x1544   :  { %2008 = vadd.xlane.f32.xlu0 %v2007_v13  ;;  %4494 = vmatpush3.bf16.msra.mxu1 %v5055_v18 }
0x1545   :  { %v2010_v17 = vsel %vm131_vm0, %v2006_v22, 0.0  ;;  %4495 = vmatprep.subr.bf16.mxu1 %v5267_v15 }
0x1546   :  { %2011 = vadd.xlane.f32.xlu1 %v2010_v17 }
0x1548   :  { %4496 = vmatpush3.bf16.msra.mxu1 %v5056_v4 }
0x15d1   :  { %v2009_v3 = vpop.xlane.xlu0 %2008 }
0x15d2   :  { %v2013_v23 = vmul.f32 0.03125, %v2009_v3 }
0x15d3   :  { %v2012_v58 = vpop.xlane.xlu1 %2011 }
0x15d4   :  { %v2015_v54 = vsub.f32 %v2005_v12, %v2013_v23  ;;  %v2014_v14 = vmul.f32 0.03125, %v2012_v58 }
0x15d6   :  { %v2016_v59 = vsub.f32 %v2006_v22, %v2014_v14  ;;  %v2017_v24 = vmul.f32 %v2015_v54, %v2015_v54 }
0x15d8   :  { %v2019_v6 = vsel %vm131_vm0, %v2017_v24, 0.0  ;;  %v2018_v7 = vmul.f32 %v2016_v59, %v2016_v59 }
0x15d9   :  { %2020 = vadd.xlane.f32.xlu0 %v2019_v6 }
0x15da   :  { %v2022_v25 = vsel %vm131_vm0, %v2018_v7, 0.0 }
0x15db   :  { %2023 = vadd.xlane.f32.xlu1 %v2022_v25 }
0x1666   :  { %v2021_v26 = vpop.xlane.xlu0 %2020 }
0x1667   :  { %v2025_v60 = vmul.f32 0.03125, %v2021_v26 }
0x1668   :  { %v2024_v29 = vpop.xlane.xlu1 %2023 }
0x1669   :  { %v2027_v31 = vadd.f32 1e-05, %v2025_v60  ;;  %v2026_v34 = vmul.f32 0.03125, %v2024_v29 }
0x166b   :  { %5163 = vrsqrt.f32 %v2027_v31  ;;  %v2028_v37 = vadd.f32 1e-05, %v2026_v34 }
0x166d   :  { %5165 = vrsqrt.f32 %v2028_v37 }
0x1675   :  { %v5164_v32 = vpop.eup %5163 }
0x1676   :  { %v2031_v39 = vmul.f32 %v5164_v32, %v2015_v54 }
0x1677   :  { %v5166_v43 = vpop.eup %5165 }
0x1678   :  { %v2041_v44 = vmul.f32 %v3992_v8, %v2031_v39  ;;  %v2032_v45 = vmul.f32 %v5166_v43, %v2016_v59 }
0x167a   :  { %v2042_v21 = vmul.f32 %v3992_v8, %v2032_v45  ;;  %v6015_v46 = vadd.f32 %v3994_v20, %v2041_v44 }
0x167c   :  { %v6017_v47 = vadd.f32 %v3994_v20, %v2042_v21 }
0x167e   :  { %v2053_v48 = vpack.c.bf16 %v6017_v47, %v6015_v46 }
0x1680   :  { %4498 = vmatmul.mubr.msk.bf16.vlgmr.msra.gmra.mrb[32].mxu1 %vm131_vm0, %v2053_v48 }
0x1753   :  { %v2116_v51 = vpop.f32.mrb[32].mxu1 }
0x1754   :  { %v6025_v35 = vadd.f32 %v4000_v50, %v2116_v51  ;;  %v4499_v52 = vpop.f32.mrb[33].mxu1 }
0x1755   :  { %v2119_v33 = vpop.f32.mrb[34].mxu1 }
0x1756   :  { %v6027_v28 = vadd.f32 %v4000_v50, %v2119_v33  ;;  %2127 = vrot.lane.b32.xlu0 %v6025_v35, %s5269_s27  ;;  %v4500_v62 = vpop.f32.mrb[35].mxu1  ;;  %v2123_v1 = vmul.f32 0.125, %v6025_v35 }
0x1758   :  { %2129 = vrot.lane.b32.xlu1 %v6027_v28, %s5269_s27  ;;  %v2124_v2 = vmul.f32 0.125, %v6027_v28 }
0x17c8   :  { %v2128_v38 = vpop.permute.xlu0 %2127 }
0x17c9   :  { %4004 = vst.msk [vmem:[%s6567_s17 + $0x20] sm:$0xff] %vm131_vm0, %v2128_v38 }
0x17ca   :  { %v2130_v0 = vpop.permute.xlu1 %2129 }
0x17cb   :  { %4005 = vst.msk [vmem:[%s6567_s17 + $0x28] sm:$0xff] %vm131_vm0, %v2130_v0 }
0x17d2   :  { %v4008_v53 = vld [vmem:[%s6553_s3 + $0x20] sm:$0xff]  ;;  %v4009_v61 = vld [vmem:[%s6553_s3 + $0x28] sm:$0xff] }
0x17d3   :  { %v2213_v55 = vpack.c.bf16 %v2128_v38, %v4008_v53  ;;  %v4877_v56 = vpack.i.bf16 %v2128_v38, %v4008_v53  ;;  %v4887_v63 = vpack.i.bf16 %v2130_v0, %v4009_v61  ;;  %v2217_v41 = vpack.c.bf16 %v2130_v0, %v4009_v61 }
0x17d5   :  { %4693 = vmatprep.subr.msk.bf16.mxu1 %vm69_vm2, %v2213_v55  ;;  %4878 = vrot.lane.b32.xlu1 %v4877_v56, %s5271_s22  ;;  %v2274_v36 = vsel %vm69_vm2, %v2213_v55, 0  ;;  %v2341_v57 = vsel %vm69_vm2, %v2217_v41, 0 }
0x17d6   :  { %4502 = vmatpush3.bf16.xpose.msra.mxu1 %v2274_v36  ;;  %4888 = vrot.lane.b32.xlu0 %v4887_v63, %s5271_s22 }
0x17d7   :  { %4697 = vmatprep.subr.msk.bf16.mxu0 %vm69_vm2, %v2217_v41 }
0x17d8   :  { %4514 = vmatpush3.bf16.xpose.msra.mxu0 %v2341_v57 }
0x17d9   :  { %4883 = vrot.lane.b32.xlu1 %v4877_v56, %s5272_s2 }
0x17da   :  { %2153 = vrot.lane.b32.xlu0 %v2123_v1, %s5271_s22 }
0x17dd   :  { %4893 = vrot.lane.b32.xlu1 %v4877_v56, %s5273_s23 }
0x17de   :  { %2159 = vrot.lane.b32.xlu0 %v2123_v1, %s5272_s2 }
0x17e1   :  { %4898 = vrot.lane.b32.xlu1 %v4887_v63, %s5272_s2 }
0x17e2   :  { %4903 = vrot.lane.b32.xlu0 %v4887_v63, %s5273_s23 }
0x17e5   :  { %2165 = vrot.lane.b32.xlu1 %v2123_v1, %s5273_s23 }
0x17e6   :  { %2161 = vrot.lane.b32.xlu0 %v2124_v2, %s5272_s2 }
0x17e9   :  { %2155 = vrot.lane.b32.xlu1 %v2124_v2, %s5271_s22 }
0x17ed   :  { %2167 = vrot.lane.b32.xlu1 %v2124_v2, %s5273_s23 }
0x1847   :  { %v4879_v5 = vpop.permute.xlu1 %4878 }
0x1848   :  { %v4881_v12 = vunpack.i.h.bf16 %v4879_v5  ;;  %v4880_v16 = vunpack.i.l.bf16 %v4879_v5  ;;  %v4889_v19 = vpop.permute.xlu0 %4888 }
0x1849   :  { %v4891_v13 = vunpack.i.h.bf16 %v4889_v19  ;;  %v4890_v17 = vunpack.i.l.bf16 %v4889_v19 }
0x184a   :  { %v2214_v22 = vpack.c.bf16 %v4881_v12, %v4880_v16 }
0x184b   :  { %v4884_v3 = vpop.permute.xlu1 %4883  ;;  %v2218_v23 = vpack.c.bf16 %v4891_v13, %v4890_v17 }
0x184c   :  { %v4886_v58 = vunpack.i.h.bf16 %v4884_v3  ;;  %v4885_v54 = vunpack.i.l.bf16 %v4884_v3  ;;  %4694 = vmatprep.subr.msk.bf16.mxu1 %vm69_vm2, %v2214_v22  ;;  %v2277_v14 = vsel %vm69_vm2, %v2214_v22, 0  ;;  %v2154_v59 = vpop.permute.xlu0 %2153 }
0x184d   :  { %4504 = vmatpush3.bf16.xpose.msra.mxu1 %v2277_v14  ;;  %v2171_v6 = vpack.c.bf16 %v2154_v59, %v2123_v1  ;;  %4698 = vmatprep.subr.msk.bf16.mxu0 %vm69_vm2, %v2218_v23  ;;  %v2344_v7 = vsel %vm69_vm2, %v2218_v23, 0 }
0x184e   :  { %v2215_v24 = vpack.c.bf16 %v4886_v58, %v4885_v54  ;;  %4516 = vmatpush3.bf16.xpose.msra.mxu0 %v2344_v7 }
0x184f   :  { %v4894_v25 = vpop.permute.xlu1 %4893  ;;  %4509 = vmatprep.mubr.msk.bf16.mxu1 %vm69_vm2, %v2171_v6 }
0x1850   :  { %v4896_v18 = vunpack.i.h.bf16 %v4894_v25  ;;  %v4895_v4 = vunpack.i.l.bf16 %v4894_v25  ;;  %4695 = vmatprep.subr.msk.bf16.mxu1 %vm69_vm2, %v2215_v24  ;;  %v2160_v26 = vpop.permute.xlu0 %2159  ;;  %v2280_v37 = vsel %vm69_vm2, %v2215_v24, 0 }
0x1852   :  { %v2216_v29 = vpack.c.bf16 %v4896_v18, %v4895_v4 }
0x1853   :  { %v4899_v60 = vpop.permute.xlu1 %4898 }
0x1854   :  { %v4901_v31 = vunpack.i.h.bf16 %v4899_v60  ;;  %v4900_v34 = vunpack.i.l.bf16 %v4899_v60  ;;  %v4904_v32 = vpop.permute.xlu0 %4903  ;;  %v2283_v50 = vsel %vm69_vm2, %v2216_v29, 0 }
0x1855   :  { %4506 = vmatpush3.bf16.xpose.msra.mxu1 %v2280_v37  ;;  %v4906_v39 = vunpack.i.h.bf16 %v4904_v32  ;;  %v4905_v43 = vunpack.i.l.bf16 %v4904_v32 }
0x1856   :  { %v2219_v8 = vpack.c.bf16 %v4901_v31, %v4900_v34  ;;  %4696 = vmatprep.subr.msk.bf16.mxu1 %vm69_vm2, %v2216_v29 }
0x1857   :  { %v2166_v44 = vpop.permute.xlu1 %2165  ;;  %v2220_v45 = vpack.c.bf16 %v4906_v39, %v4905_v43 }
0x1858   :  { %4699 = vmatprep.subr.msk.bf16.mxu0 %vm69_vm2, %v2219_v8  ;;  %v2347_v20 = vsel %vm69_vm2, %v2219_v8, 0  ;;  %v2172_v52 = vpack.c.bf16 %v2166_v44, %v2160_v26  ;;  %v2162_v62 = vpop.permute.xlu0 %2161 }
0x1859   :  { %4518 = vmatpush3.bf16.xpose.msra.mxu0 %v2347_v20  ;;  %v2350_v51 = vsel %vm69_vm2, %v2220_v45, 0 }
0x185a   :  { %4700 = vmatprep.subr.msk.bf16.mxu0 %vm69_vm2, %v2220_v45 }
0x185b   :  { %v2156_v21 = vpop.permute.xlu1 %2155 }
0x185c   :  { %v2173_v48 = vpack.c.bf16 %v2156_v21, %v2124_v2 }
0x185d   :  { %4508 = vmatpush3.bf16.xpose.msra.mxu1 %v2283_v50 }
0x185e   :  { %4521 = vmatprep.mubr.msk.bf16.mxu0 %vm69_vm2, %v2173_v48 }
0x185f   :  { %v2168_v33 = vpop.permute.xlu1 %2167 }
0x1860   :  { %v2174_v38 = vpack.c.bf16 %v2168_v33, %v2162_v62 }
0x1861   :  { %4520 = vmatpush3.bf16.xpose.msra.mxu0 %v2350_v51 }
0x1862   :  { %4549 = vmatprep.subr.bf16.mxu0 %v5267_v15 }
0x1864   :  { %4510 = vmatmul.mubr.msk.bf16.vlgmr.msra.gmra.mrb[36].mxu1 %vm69_vm2, %v2172_v52 }
0x1868   :  { %4522 = vmatmul.mubr.msk.bf16.vlgmr.msra.gmra.mrb[32].mxu0 %vm69_vm2, %v2174_v38 }
0x1869   :  { %4553 = vmatprep.mubr.msk.bf16.mxu0 %vm5268_vm1, %v5267_v15 }
0x1937   :  { %v4511_v0 = vpop.f32.mrb[36].mxu1 }
0x1938   :  { %v2319_v53 = vpop.f32.mrb[37].mxu1  ;;  %v2328_v36 = vadd.f32 %v4511_v0, %v5510_v11 }
0x1939   :  { %v2320_v55 = vadd.f32 %v2319_v53, %v5504_v9  ;;  %v4512_v56 = vpop.f32.mrb[38].mxu1 }
0x193a   :  { %v2322_v61 = vpop.f32.mrb[39].mxu1  ;;  %v2331_v19 = vadd.f32 %v4512_v56, %v5530_v30  ;;  %v2407_v22 = vsel %vm556_vm5, %v2328_v36, -inf }
0x193b   :  { %v2323_v63 = vadd.f32 %v2322_v61, %v5507_v10  ;;  %v4523_v41 = vpop.f32.mrb[32].mxu0  ;;  %v2401_v57 = vsel %vm556_vm5, %v2320_v55, -inf }
0x193c   :  { %v2386_v1 = vpop.f32.mrb[33].mxu0  ;;  %2402 = vmax.xlane.f32.xlu0 %v2401_v57  ;;  %v2395_v3 = vadd.f32 %v4523_v41, %v5542_v42  ;;  %v2410_v23 = vsel %vm556_vm5, %v2331_v19, -inf }
0x193d   :  { %v4524_v2 = vpop.f32.mrb[34].mxu0  ;;  %v2404_v5 = vsel %vm556_vm5, %v2323_v63, -inf  ;;  %v2387_v54 = vadd.f32 %v2386_v1, %v5555_v49 }
0x193e   :  { %v2398_v12 = vadd.f32 %v4524_v2, %v5525_v27  ;;  %v2389_v16 = vpop.f32.mrb[35].mxu0  ;;  %2405 = vmax.xlane.f32.xlu1 %v2404_v5  ;;  %v2419_v14 = vsel %vm556_vm5, %v2395_v3, -inf }
0x193f   :  { %v6094_v17 = vadd.f32 %v2389_v16, %v5539_v40  ;;  %v2413_v59 = vsel %vm556_vm5, %v2387_v54, -inf }
0x1940   :  { %2408 = vmax.xlane.f32.xlu0 %v2407_v22  ;;  %v2422_v13 = vsel %vm556_vm5, %v2398_v12, -inf }
0x1941   :  { %v2416_v58 = vsel %vm556_vm5, %v6094_v17, -inf }
0x1942   :  { %2423 = vmax.xlane.f32.xlu1 %v2422_v13 }
0x1944   :  { %2411 = vmax.xlane.f32.xlu0 %v2410_v23 }
0x1946   :  { %2417 = vmax.xlane.f32.xlu1 %v2416_v58 }
0x1948   :  { %2420 = vmax.xlane.f32.xlu0 %v2419_v14 }
0x194c   :  { %2414 = vmax.xlane.f32.xlu0 %v2413_v59 }
0x1957   :  { %2138 = vrot.lane.b32.xlu1 %v6027_v28, %s5279_s20 }
0x1962   :  { %2136 = vrot.lane.b32.xlu0 %v6025_v35, %s5279_s20 }
0x19c9   :  { %v2403_v24 = vpop.xlane.xlu0 %2402 }
0x19ca   :  { %v2425_v32 = vsub.f32 %v2320_v55, %v2403_v24 }
0x19cb   :  { %v2406_v6 = vpop.xlane.xlu1 %2405 }
0x19cc   :  { %v2426_v8 = vsub.f32 %v2323_v63, %v2406_v6  ;;  %v2433_v43 = vmul.f32 1.442695, %v2425_v32 }
0x19cd   :  { %v2409_v7 = vpop.xlane.xlu0 %2408 }
0x19ce   :  { %v2427_v37 = vsub.f32 %v2328_v36, %v2409_v7  ;;  %v2435_v45 = vmul.f32 1.442695, %v2426_v8 }
0x19cf   :  { %v2424_v25 = vpop.xlane.xlu1 %2423 }
0x19d0   :  { %v2437_v39 = vmul.f32 1.442695, %v2427_v37  ;;  %v2432_v51 = vsub.f32 %v2398_v12, %v2424_v25 }
0x19d1   :  { %v2412_v18 = vpop.xlane.xlu0 %2411 }
0x19d2   :  { %v2428_v44 = vsub.f32 %v2331_v19, %v2412_v18  ;;  %5167 = vpow2.f32 %v2437_v39  ;;  %v2447_v38 = vmul.f32 1.442695, %v2432_v51 }
0x19d3   :  { %v2418_v4 = vpop.xlane.xlu1 %2417  ;;  %5169 = vpow2.f32 %v2433_v43 }
0x19d4   :  { %v2439_v20 = vmul.f32 1.442695, %v2428_v44  ;;  %5171 = vpow2.f32 %v2435_v45  ;;  %v2430_v0 = vsub.f32 %v6094_v17, %v2418_v4 }
0x19d5   :  { %v2421_v26 = vpop.xlane.xlu0 %2420 }
0x19d6   :  { %v2431_v21 = vsub.f32 %v2395_v3, %v2421_v26  ;;  %5173 = vpow2.f32 %v2439_v20  ;;  %v2443_v36 = vmul.f32 1.442695, %v2430_v0 }
0x19d7   :  { %v6107_v60 = vpop.permute.xlu1 %2138 }
0x19d8   :  { %4007 = vst.msk [vmem:[%s6568_s18 + $0x28] sm:$0xff] %vm131_vm0, %v6107_v60  ;;  %v2445_v48 = vmul.f32 1.442695, %v2431_v21 }
0x19d9   :  { %v2415_v29 = vpop.xlane.xlu0 %2414 }
0x19da   :  { %v2429_v50 = vsub.f32 %v2387_v54, %v2415_v29  ;;  %5175 = vpow2.f32 %v2445_v48 }
0x19dc   :  { %v2441_v52 = vmul.f32 1.442695, %v2429_v50  ;;  %v6124_v33 = vpop.eup %5167 }
0x19dd   :  { %v2137_v28 = vpop.permute.xlu0 %2136  ;;  %v6126_v62 = vpop.eup %5169  ;;  %v2455_v53 = vsel %vm556_vm5, %v6124_v33, 0.0 }
0x19de   :  { %4006 = vst.msk [vmem:[%s6568_s18 + $0x20] sm:$0xff] %vm131_vm0, %v2137_v28  ;;  %5177 = vpow2.f32 %v2441_v52  ;;  %v6131_v55 = vpop.eup %5171  ;;  %v2449_v56 = vsel %vm556_vm5, %v6126_v62, 0.0 }
0x19df   :  { %5179 = vpow2.f32 %v2447_v38  ;;  %v2452_v63 = vsel %vm556_vm5, %v6131_v55, 0.0 }
0x19e0   :  { %v6135_v61 = vpop.eup %5173  ;;  %5181 = vpow2.f32 %v2443_v36 }
0x19e1   :  { %v2458_v41 = vsel %vm556_vm5, %v6135_v61, 0.0 }
0x19e4   :  { %v6141_v57 = vpop.eup %5175 }
0x19e5   :  { %v4010_v35 = vld [vmem:[%s6554_s4 + $0x20] sm:$0xff]  ;;  %v2467_v1 = vsel %vm556_vm5, %v6141_v57, 0.0  ;;  %v4011_v13 = vld [vmem:[%s6554_s4 + $0x28] sm:$0xff] }
0x19e6   :  { %v4912_v31 = vpack.i.bf16 %v2137_v28, %v4010_v35  ;;  %v2259_v34 = vpack.c.bf16 %v2137_v28, %v4010_v35  ;;  %v4922_v17 = vpack.i.bf16 %v6107_v60, %v4011_v13  ;;  %v2263_v26 = vpack.c.bf16 %v6107_v60, %v4011_v13 }
0x19e8   :  { %4913 = vrot.lane.b32.xlu1 %v4912_v31, %s5272_s2  ;;  %4908 = vrot.lane.b32.xlu0 %v4912_v31, %s5271_s22  ;;  %v6145_v2 = vpop.eup %5177 }
0x19e9   :  { %4525 = vmatprep.subr.bf16.mxu1 %v2259_v34  ;;  %v2461_v5 = vsel %vm556_vm5, %v6145_v2, 0.0  ;;  %v6149_v12 = vpop.eup %5179 }
0x19ea   :  { %4526 = vmatpush3.bf16.msra.mxu1 %v2259_v34  ;;  %v2470_v16 = vsel %vm556_vm5, %v6149_v12, 0.0  ;;  %v6153_v19 = vpop.eup %5181 }
0x19eb   :  { %v2464_v22 = vsel %vm556_vm5, %v6153_v19, 0.0 }
0x19ec   :  { %4918 = vrot.lane.b32.xlu0 %v4912_v31, %s5273_s23 }
0x1a0b   :  { %2456 = vadd.xlane.f32.xlu0 %v2455_v53 }
0x1a0c   :  { %2450 = vadd.xlane.f32.xlu1 %v2449_v56 }
0x1a0f   :  { %2453 = vadd.xlane.f32.xlu0 %v2452_v63 }
0x1a10   :  { %2459 = vadd.xlane.f32.xlu1 %v2458_v41 }
0x1a14   :  { %2468 = vadd.xlane.f32.xlu1 %v2467_v1 }
0x1a18   :  { %2462 = vadd.xlane.f32.xlu1 %v2461_v5 }
0x1a1c   :  { %2471 = vadd.xlane.f32.xlu1 %v2470_v16 }
0x1a20   :  { %2465 = vadd.xlane.f32.xlu1 %v2464_v22 }
0x1a25   :  { %4923 = vrot.lane.b32.xlu0 %v4922_v17, %s5271_s22 }
0x1a29   :  { %4928 = vrot.lane.b32.xlu0 %v4922_v17, %s5272_s2 }
0x1a31   :  { %4933 = vrot.lane.b32.xlu1 %v4922_v17, %s5273_s23 }
0x1a5a   :  { %v4914_v3 = vpop.permute.xlu1 %4913  ;;  %v4909_v23 = vpop.permute.xlu0 %4908 }
0x1a5b   :  { %v4916_v58 = vunpack.i.h.bf16 %v4914_v3  ;;  %v4915_v54 = vunpack.i.l.bf16 %v4914_v3  ;;  %v4911_v14 = vunpack.i.h.bf16 %v4909_v23  ;;  %v4910_v59 = vunpack.i.l.bf16 %v4909_v23 }
0x1a5d   :  { %v2260_v24 = vpack.c.bf16 %v4911_v14, %v4910_v59  ;;  %v2261_v7 = vpack.c.bf16 %v4916_v58, %v4915_v54 }
0x1a5e   :  { %v4919_v6 = vpop.permute.xlu0 %4918 }
0x1a5f   :  { %v4921_v25 = vunpack.i.h.bf16 %v4919_v6  ;;  %v4920_v18 = vunpack.i.l.bf16 %v4919_v6  ;;  %4527 = vmatprep.subr.bf16.mxu1 %v2260_v24 }
0x1a60   :  { %4528 = vmatpush3.bf16.msra.mxu1 %v2260_v24 }
0x1a61   :  { %4529 = vmatprep.subr.bf16.mxu1 %v2261_v7  ;;  %v2262_v4 = vpack.c.bf16 %v4921_v25, %v4920_v18 }
0x1a64   :  { %4530 = vmatpush3.bf16.msra.mxu1 %v2261_v7 }
0x1a65   :  { %4531 = vmatprep.subr.bf16.mxu1 %v2262_v4 }
0x1a68   :  { %4532 = vmatpush3.bf16.msra.mxu1 %v2262_v4 }
0x1a69   :  { %4537 = vmatprep.subr.bf16.mxu1 %v2263_v26 }
0x1a98   :  { %v2457_v29 = vpop.xlane.xlu0 %2456 }
0x1a99   :  { %v2451_v28 = vpop.xlane.xlu1 %2450 }
0x1a9a   :  { %5183 = vrcp.f32 %v2451_v28 }
0x1a9b   :  { %5185 = vrcp.f32 %v2457_v29 }
0x1a9c   :  { %v2454_v35 = vpop.xlane.xlu0 %2453 }
0x1a9d   :  { %5187 = vrcp.f32 %v2454_v35  ;;  %v2460_v31 = vpop.xlane.xlu1 %2459 }
0x1a9e   :  { %5189 = vrcp.f32 %v2460_v31 }
0x1aa0   :  { %v4924_v37 = vpop.permute.xlu0 %4923 }
0x1aa1   :  { %v2469_v34 = vpop.xlane.xlu1 %2468  ;;  %v4926_v48 = vunpack.i.h.bf16 %v4924_v37  ;;  %v4925_v50 = vunpack.i.l.bf16 %v4924_v37 }
0x1aa3   :  { %v2264_v53 = vpack.c.bf16 %v4926_v48, %v4925_v50  ;;  %v4025_v50 = vld [vmem:[%s6560_s10 + $0x2] ss:$0 sm:$0xff] }
0x1aa4   :  { %v5184_v32 = vpop.eup %5183  ;;  %v4929_v52 = vpop.permute.xlu0 %4928 }
0x1aa5   :  { %v2463_v8 = vpop.xlane.xlu1 %2462  ;;  %v5186_v39 = vpop.eup %5185  ;;  %v2481_v45 = vmul.f32 %v5184_v32, %v6126_v62  ;;  %v4931_v56 = vunpack.i.h.bf16 %v4929_v52  ;;  %v4930_v62 = vunpack.i.l.bf16 %v4929_v52 }
0x1aa6   :  { %v2483_v20 = vmul.f32 %v5186_v39, %v6124_v33 }
0x1aa7   :  { %v5188_v43 = vpop.eup %5187  ;;  %v2265_v33 = vpack.c.bf16 %v4931_v56, %v4930_v62 }
0x1aa8   :  { %v5190_v44 = vpop.eup %5189  ;;  %v2482_v60 = vmul.f32 %v5188_v43, %v6131_v55 }
0x1aa9   :  { %v2484_v21 = vmul.f32 %v5190_v44, %v6135_v61  ;;  %v2472_v51 = vpop.xlane.xlu1 %2471 }
0x1aaa   :  { %v2489_v38 = vpack.c.bf16 %v2482_v60, %v2481_v45  ;;  %5191 = vrcp.f32 %v2472_v51 }
0x1aab   :  { %v2490_v0 = vpack.c.bf16 %v2484_v21, %v2483_v20  ;;  %5193 = vrcp.f32 %v2463_v8 }
0x1aac   :  { %4533 = vmatprep.mubr.msk.bf16.mxu1 %vm556_vm5, %v2489_v38  ;;  %5195 = vrcp.f32 %v2469_v34 }
0x1aad   :  { %v2466_v36 = vpop.xlane.xlu1 %2465  ;;  %4534 = vmatmul.mubr.msk.bf16.vlgmr.msra.gmra.mrb[40].mxu1 %vm556_vm5, %v2490_v0 }
0x1aae   :  { %5197 = vrcp.f32 %v2466_v36  ;;  %4538 = vmatpush3.bf16.msra.mxu1 %v2263_v26 }
0x1aaf   :  { %4539 = vmatprep.subr.bf16.mxu1 %v2264_v53 }
0x1ab1   :  { %v4934_v55 = vpop.permute.xlu1 %4933 }
0x1ab2   :  { %v4936_v61 = vunpack.i.h.bf16 %v4934_v55  ;;  %v4935_v63 = vunpack.i.l.bf16 %v4934_v55  ;;  %4540 = vmatpush3.bf16.msra.mxu1 %v2264_v53 }
0x1ab3   :  { %4541 = vmatprep.subr.bf16.mxu1 %v2265_v33 }
0x1ab4   :  { %v2266_v41 = vpack.c.bf16 %v4936_v61, %v4935_v63  ;;  %v5192_v1 = vpop.eup %5191 }
0x1ab5   :  { %v5194_v5 = vpop.eup %5193  ;;  %v2488_v13 = vmul.f32 %v5192_v1, %v6149_v12 }
0x1ab6   :  { %4542 = vmatpush3.bf16.msra.mxu1 %v2265_v33  ;;  %v5196_v16 = vpop.eup %5195  ;;  %v2485_v17 = vmul.f32 %v5194_v5, %v6145_v2 }
0x1ab7   :  { %4543 = vmatprep.subr.bf16.mxu1 %v2266_v41  ;;  %v2487_v23 = vmul.f32 %v5196_v16, %v6141_v57  ;;  %v5057_v57 = vld [vmem:[%s6559_s9 + $0x20] sm:$0xff]  }
0x1ab8   :  { %v5198_v22 = vpop.eup %5197  ;;  %4550 = vmatpush3.bf16.msra.mxu0 %v5057_v57 }
0x1ab9   :  { %v2486_v3 = vmul.f32 %v5198_v22, %v6153_v19  ;;  %v2492_v54 = vpack.c.bf16 %v2488_v13, %v2487_v23  ;;  %4551 = vmatprep.subr.bf16.mxu0 %v5267_v15  ;;  %v5058_v19 = vld [vmem:[%s6559_s9 + $0x28] sm:$0xff]   ;;  %v5061_v23 = vld [vmem:[%s6564_s14 + $0x80] sm:$0xff]  }
0x1aba   :  { %4544 = vmatpush3.bf16.msra.mxu1 %v2266_v41 }
0x1abb   :  { %v2491_v58 = vpack.c.bf16 %v2486_v3, %v2485_v17  ;;  %4565 = vmatprep.subr.bf16.mxu1 %v5267_v15  ;;  %v5059_v17 = vld [vmem:[%s6563_s13 + $0x20] sm:$0xff]   ;;  %v5060_v3 = vld [vmem:[%s6563_s13 + $0x28] sm:$0xff]  }
0x1abc   :  { %4552 = vmatpush3.bf16.msra.mxu0 %v5058_v19 }
0x1abd   :  { %4545 = vmatprep.mubr.msk.bf16.mxu1 %vm556_vm5, %v2491_v58  ;;  %4557 = vmatprep.subr.bf16.mxu0 %v5267_v15  ;;  %v5062_v58 = vld [vmem:[%s6564_s14 + $0x88] sm:$0xff]  }
0x1abe   :  { %4546 = vmatmul.mubr.msk.bf16.vlgmr.msra.gmra.mrb[44].mxu1 %vm556_vm5, %v2492_v54  ;;  %v5063_v54 = vld [vmem:[%s6564_s14 + $0x90] sm:$0xff]  }
0x1abf   :  { %4581 = vmatprep.mubr.msk.bf16.mxu1 %vm5268_vm1, %v5267_v15  ;;  %4566 = vmatpush3.bf16.msra.mxu1 %v5061_v23 }
0x1ac0   :  { %4567 = vmatprep.subr.bf16.mxu1 %v5267_v15 }
0x1ac3   :  { %4568 = vmatpush3.bf16.msra.mxu1 %v5062_v58 }
0x1ac4   :  { %4569 = vmatprep.subr.bf16.mxu1 %v5267_v15 }
0x1ac7   :  { %4570 = vmatpush3.bf16.msra.mxu1 %v5063_v54 }
0x1ac8   :  { %4571 = vmatprep.subr.bf16.mxu1 %v5267_v15 }
0x1b80   :  { %v4535_v14 = vpop.f32.mrb[40].mxu1 }
0x1b81   :  { %v2533_v12 = vpop.f32.mrb[41].mxu1 }
0x1b82   :  { %v4536_v59 = vpop.f32.mrb[42].mxu1 }
0x1b83   :  { %v2536_v2 = vpop.f32.mrb[43].mxu1 }
0x1b91   :  { %v4547_v24 = vpop.f32.mrb[44].mxu1 }
0x1b92   :  { %v4937_v6 = vpack.i.bf16 %v4547_v24, %v4535_v14  ;;  %v2588_v7 = vpop.f32.mrb[45].mxu1  ;;  %v5064_v14 = vld [vmem:[%s6564_s14 + $0x98] sm:$0xff]  }
0x1b93   :  { %v4548_v25 = vpop.f32.mrb[46].mxu1  ;;  %4572 = vmatpush3.bf16.msra.mxu1 %v5064_v14 }
0x1b94   :  { %v4947_v18 = vpack.i.bf16 %v4548_v25, %v4536_v59  ;;  %4938 = vrot.lane.b32.xlu1 %v4937_v6, %s6574_s0  ;;  %v2591_v4 = vpop.f32.mrb[47].mxu1  ;;  %4573 = vmatprep.subr.bf16.mxu1 %v5267_v15  ;;  %v5066_v59 = vld [vmem:[%s6564_s14 + $0xa8] sm:$0xff]  }
0x1b95   :  { %v4942_v26 = vpack.i.bf16 %v2591_v4, %v2536_v2  ;;  %v4030_v4 = vld [vmem:[%s6561_s11 + $0x2] ss:$0 sm:$0xff] }
0x1b97   :  { %4943 = vrot.lane.b32.xlu0 %v4942_v26, %s6586_s24 }
0x1b9b   :  { %4948 = vrot.lane.b32.xlu0 %v4947_v18, %s6585_s19 }
0x1c06   :  { %v4939_v28 = vpop.permute.xlu1 %4938 }
0x1c07   :  { %v4941_v32 = vunpack.i.h.bf16 %v4939_v28  ;;  %v4940_v8 = vunpack.i.l.bf16 %v4939_v28 }
0x1c09   :  { %v4944_v29 = vpop.permute.xlu0 %4943 }
0x1c0a   :  { %v4946_v35 = vunpack.i.h.bf16 %v4944_v29  ;;  %v4945_v31 = vunpack.i.l.bf16 %v4944_v29 }
0x1c0c   :  { %v2628_v34 = vsel %vm69_vm2, %v2588_v7, %v4946_v35  ;;  %v2627_v37 = vsel %vm69_vm2, %v2533_v12, %v4945_v31  ;;  %v5065_v12 = vld [vmem:[%s6564_s14 + $0xa0] sm:$0xff]  }
0x1c0d   :  { %v4949_v39 = vpop.permute.xlu0 %4948  ;;  %v2629_v45 = vsel %vm128_vm3, %v2627_v37, %v4940_v8  ;;  %v2630_v60 = vsel %vm128_vm3, %v2628_v34, %v4941_v32  ;;  %4574 = vmatpush3.bf16.msra.mxu1 %v5065_v12  ;;  %v4032_v35 = vld [vmem:[%s6562_s12 + $0x2] ss:$0 sm:$0xff]  ;;  %v5067_v8 = vld [vmem:[%s6564_s14 + $0xb0] sm:$0xff]  }
0x1c0e   :  { %v4951_v43 = vunpack.i.h.bf16 %v4949_v39  ;;  %v4950_v44 = vunpack.i.l.bf16 %v4949_v39  ;;  %4575 = vmatprep.subr.bf16.mxu1 %v5267_v15  ;;  %v5068_v39 = vld [vmem:[%s6564_s14 + $0xb8] sm:$0xff]  }
0x1c10   :  { %v2631_v20 = vsel %vm787_vm6, %v2629_v45, %v4950_v44  ;;  %v2632_v21 = vsel %vm787_vm6, %v2630_v60, %v4951_v43 }
0x1c11   :  { %v2633_v48 = vpack.c.bf16 %v2632_v21, %v2631_v20  ;;  %4576 = vmatpush3.bf16.msra.mxu1 %v5066_v59 }
0x1c12   :  { %4577 = vmatprep.subr.bf16.mxu1 %v5267_v15 }
0x1c13   :  { %4554 = vmatmul.mubr.msk.bf16.vlgmr.msra.gmra.mrb[36].mxu0 %vm131_vm0, %v2633_v48 }
0x1c14   :  { %4561 = vmatprep.mubr.msk.bf16.mxu0 %vm5268_vm1, %v5267_v15  ;;  %4558 = vmatpush3.bf16.msra.mxu0 %v5059_v17 }
0x1c15   :  { %4559 = vmatprep.subr.bf16.mxu0 %v5267_v15  ;;  %4578 = vmatpush3.bf16.msra.mxu1 %v5067_v8 }
0x1c16   :  { %4579 = vmatprep.subr.bf16.mxu1 %v5267_v15 }
0x1c18   :  { %4560 = vmatpush3.bf16.msra.mxu0 %v5060_v3  ;;  %v5070_v3 = vld [vmem:[%s6557_s7 + $0x38] sm:$0xff]  }
0x1c19   :  { %4585 = vmatprep.subr.bf16.mxu0 %v5267_v15  ;;  %4580 = vmatpush3.bf16.msra.mxu1 %v5068_v39 }
0x1ce6   :  { %v2696_v51 = vpop.f32.mrb[36].mxu0 }
0x1ce7   :  { %v2697_v52 = vadd.f32 %v4025_v50, %v2696_v51  ;;  %v4555_v38 = vpop.f32.mrb[37].mxu0 }
0x1ce8   :  { %v2699_v0 = vpop.f32.mrb[38].mxu0 }
0x1ce9   :  { %v6204_v53 = vadd.f32 %v2697_v52, %v6015_v46  ;;  %v2700_v56 = vadd.f32 %v4025_v50, %v2699_v0  ;;  %v4556_v62 = vpop.f32.mrb[39].mxu0  ;;  %v4057_v50 = vld [vmem:[%s6565_s15 + $0x2] ss:$0 sm:$0xff] }
0x1ceb   :  { %v6207_v36 = vadd.f32 %v2700_v56, %v6017_v47  ;;  %v2705_v33 = vsel %vm131_vm0, %v6204_v53, 0.0 }
0x1cec   :  { %2706 = vadd.xlane.f32.xlu1 %v2705_v33 }
0x1ced   :  { %v2708_v55 = vsel %vm131_vm0, %v6207_v36, 0.0 }
0x1cee   :  { %2709 = vadd.xlane.f32.xlu0 %v2708_v55 }
0x1d79   :  { %v2707_v61 = vpop.xlane.xlu1 %2706 }
0x1d7a   :  { %v2711_v63 = vmul.f32 0.03125, %v2707_v61 }
0x1d7b   :  { %v2710_v41 = vpop.xlane.xlu0 %2709 }
0x1d7c   :  { %v2713_v1 = vsub.f32 %v6204_v53, %v2711_v63  ;;  %v2712_v46 = vmul.f32 0.03125, %v2710_v41 }
0x1d7e   :  { %v2714_v5 = vsub.f32 %v6207_v36, %v2712_v46  ;;  %v2715_v16 = vmul.f32 %v2713_v1, %v2713_v1 }
0x1d80   :  { %v2717_v47 = vsel %vm131_vm0, %v2715_v16, 0.0  ;;  %v2716_v22 = vmul.f32 %v2714_v5, %v2714_v5 }
0x1d81   :  { %2718 = vadd.xlane.f32.xlu0 %v2717_v47 }
0x1d82   :  { %v2720_v13 = vsel %vm131_vm0, %v2716_v22, 0.0 }
0x1d85   :  { %2721 = vadd.xlane.f32.xlu0 %v2720_v13 }
0x1e0e   :  { %v2719_v2 = vpop.xlane.xlu0 %2718 }
0x1e0f   :  { %v2723_v57 = vmul.f32 0.03125, %v2719_v2 }
0x1e11   :  { %v2725_v19 = vadd.f32 1e-05, %v2723_v57  ;;  %v4067_v57 = vld [vmem:[%s6555_s5 + $0x3] ss:$0 sm:$0xff]  ;;  %s6587_s5 = smov 16  }
0x1e12   :  { %v2722_v24 = vpop.xlane.xlu0 %2721 }
0x1e13   :  { %5199 = vrsqrt.f32 %v2725_v19  ;;  %v2724_v6 = vmul.f32 0.03125, %v2722_v24 }
0x1e15   :  { %v2726_v7 = vadd.f32 1e-05, %v2724_v6 }
0x1e17   :  { %5201 = vrsqrt.f32 %v2726_v7 }
0x1e1d   :  { %v5200_v25 = vpop.eup %5199 }
0x1e1e   :  { %v2729_v18 = vmul.f32 %v5200_v25, %v2713_v1  ;;  %v4069_v25 = vld [vmem:[%s6556_s6 + $0x3] ss:$0 sm:$0xff] }
0x1e20   :  { %v2739_v29 = vmul.f32 %v4030_v4, %v2729_v18 }
0x1e21   :  { %v5202_v26 = vpop.eup %5201 }
0x1e22   :  { %v2730_v28 = vmul.f32 %v5202_v26, %v2714_v5  ;;  %v2749_v34 = vadd.f32 %v4032_v35, %v2739_v29 }
0x1e24   :  { %v2740_v31 = vmul.f32 %v4030_v4, %v2730_v28  ;;  %v4075_v28 = vld [vmem:[%s6558_s8 + $0x3] ss:$0 sm:$0xff] }
0x1e26   :  { %v2750_v37 = vadd.f32 %v4032_v35, %v2740_v31 }
0x1e28   :  { %v2751_v32 = vpack.c.bf16 %v2750_v37, %v2749_v34 }
0x1e2a   :  { %4562 = vmatmul.mubr.msk.bf16.vlgmr.msra.gmra.mrb[40].mxu0 %vm131_vm0, %v2751_v32 }
0x1e2b   :  { %4589 = vmatprep.mubr.msk.bf16.mxu0 %vm5268_vm1, %v5267_v15 }
0x1efd   :  { %v2806_v43 = vpop.f32.mrb[40].mxu0 }
0x1efe   :  { %v4563_v44 = vpop.f32.mrb[41].mxu0  ;;  %v2813_v60 = vmax.f32 %v2806_v43, 0.0 }
0x1eff   :  { %v2809_v45 = vpop.f32.mrb[42].mxu0 }
0x1f00   :  { %v2814_v20 = vmax.f32 %v2809_v45, 0.0  ;;  %v4564_v21 = vpop.f32.mrb[43].mxu0 }
0x1f02   :  { %v2815_v48 = vpack.c.bf16 %v2814_v20, %v2813_v60 }
0x1f04   :  { %4582 = vmatmul.mubr.bf16.vlgmr.msra.gmra.mrb[48].mxu1 %v2815_v48 }
0x1fd7   :  { %v2923_v51 = vpop.f32.mrb[48].mxu1 }
0x1fd8   :  { %v2924_v52 = vadd.f32 %v4057_v50, %v2923_v51  ;;  %v4583_v38 = vpop.f32.mrb[49].mxu1 }
0x1fd9   :  { %v2926_v0 = vpop.f32.mrb[50].mxu1 }
0x1fda   :  { %v2930_v56 = vadd.f32 %v2924_v52, %v6204_v53  ;;  %v2927_v62 = vadd.f32 %v4057_v50, %v2926_v0  ;;  %v4584_v33 = vpop.f32.mrb[51].mxu1 }
0x1fdc   :  { %v2931_v55 = vadd.f32 %v2927_v62, %v6207_v36  ;;  %v2932_v61 = vsel %vm131_vm0, %v2930_v56, 0.0  ;;  %v5069_v36 = vld [vmem:[%s6557_s7 + $0x30] sm:$0xff]  }
0x1fdd   :  { %2933 = vadd.xlane.f32.xlu1 %v2932_v61  ;;  %4586 = vmatpush3.bf16.msra.mxu0 %v5069_v36 }
0x1fde   :  { %v2935_v63 = vsel %vm131_vm0, %v2931_v55, 0.0  ;;  %4587 = vmatprep.subr.bf16.mxu0 %v5267_v15 }
0x1fdf   :  { %2936 = vadd.xlane.f32.xlu0 %v2935_v63 }
0x1fe1   :  { %4588 = vmatpush3.bf16.msra.mxu0 %v5070_v3 }
0x206a   :  { %v2934_v41 = vpop.xlane.xlu1 %2933 }
0x206b   :  { %v2938_v1 = vmul.f32 0.03125, %v2934_v41 }
0x206c   :  { %v2937_v46 = vpop.xlane.xlu0 %2936 }
0x206d   :  { %v2940_v5 = vsub.f32 %v2930_v56, %v2938_v1  ;;  %v2939_v16 = vmul.f32 0.03125, %v2937_v46 }
0x206f   :  { %v2941_v47 = vsub.f32 %v2931_v55, %v2939_v16  ;;  %v2942_v22 = vmul.f32 %v2940_v5, %v2940_v5 }
0x2071   :  { %v2944_v13 = vsel %vm131_vm0, %v2942_v22, 0.0  ;;  %v2943_v53 = vmul.f32 %v2941_v47, %v2941_v47 }
0x2072   :  { %2945 = vadd.xlane.f32.xlu1 %v2944_v13 }
0x2073   :  { %v2947_v17 = vsel %vm131_vm0, %v2943_v53, 0.0 }
0x2074   :  { %2948 = vadd.xlane.f32.xlu0 %v2947_v17 }
0x20ff   :  { %v2946_v23 = vpop.xlane.xlu1 %2945 }
0x2100   :  { %v2950_v58 = vmul.f32 0.03125, %v2946_v23 }
0x2101   :  { %v2949_v54 = vpop.xlane.xlu0 %2948 }
0x2102   :  { %v2952_v14 = vadd.f32 1e-05, %v2950_v58  ;;  %v2951_v12 = vmul.f32 0.03125, %v2949_v54 }
0x2104   :  { %5203 = vrsqrt.f32 %v2952_v14  ;;  %v2953_v59 = vadd.f32 1e-05, %v2951_v12 }
0x2106   :  { %5205 = vrsqrt.f32 %v2953_v59 }
0x210e   :  { %v5204_v2 = vpop.eup %5203 }
0x210f   :  { %v2956_v19 = vmul.f32 %v5204_v2, %v2940_v5 }
0x2110   :  { %v5206_v24 = vpop.eup %5205 }
0x2111   :  { %v2966_v6 = vmul.f32 %v4067_v57, %v2956_v19  ;;  %v2957_v7 = vmul.f32 %v5206_v24, %v2941_v47 }
0x2113   :  { %v2967_v18 = vmul.f32 %v4067_v57, %v2957_v7  ;;  %v6287_v4 = vadd.f32 %v4069_v25, %v2966_v6 }
0x2115   :  { %v6289_v26 = vadd.f32 %v4069_v25, %v2967_v18 }
0x2117   :  { %v2978_v29 = vpack.c.bf16 %v6289_v26, %v6287_v4 }
0x2119   :  { %4590 = vmatmul.mubr.msk.bf16.vlgmr.msra.gmra.mrb[44].mxu0 %vm131_vm0, %v2978_v29 }
0x21ec   :  { %v3041_v35 = vpop.f32.mrb[44].mxu0 }
0x21ed   :  { %v6297_v31 = vadd.f32 %v4075_v28, %v3041_v35  ;;  %v4591_v34 = vpop.f32.mrb[45].mxu0 }
0x21ee   :  { %v3044_v37 = vpop.f32.mrb[46].mxu0 }
0x21ef   :  { %v6299_v32 = vadd.f32 %v4075_v28, %v3044_v37  ;;  %3052 = vrot.lane.b32.xlu1 %v6297_v31, %s5269_s27  ;;  %v4592_v8 = vpop.f32.mrb[47].mxu0  ;;  %v3048_v52 = vmul.f32 0.125, %v6297_v31 }
0x21f1   :  { %3054 = vrot.lane.b32.xlu0 %v6299_v32, %s5269_s27  ;;  %v3049_v38 = vmul.f32 0.125, %v6299_v32 }
0x2261   :  { %v3053_v39 = vpop.permute.xlu1 %3052 }
0x2262   :  { %4079 = vst.msk [vmem:[%s6567_s17 + $0x30] sm:$0xff] %vm131_vm0, %v3053_v39 }
0x2263   :  { %v3055_v43 = vpop.permute.xlu0 %3054 }
0x2264   :  { %4080 = vst.msk [vmem:[%s6567_s17 + $0x38] sm:$0xff] %vm131_vm0, %v3055_v43 }
0x226b   :  { %v4083_v44 = vld [vmem:[%s6553_s3 + $0x30] sm:$0xff]  ;;  %v4084_v20 = vld [vmem:[%s6553_s3 + $0x38] sm:$0xff] }
0x226c   :  { %v4952_v45 = vpack.i.bf16 %v3053_v39, %v4083_v44  ;;  %v3138_v60 = vpack.c.bf16 %v3053_v39, %v4083_v44  ;;  %v3142_v48 = vpack.c.bf16 %v3055_v43, %v4084_v20  ;;  %v4972_v51 = vpack.i.bf16 %v3055_v43, %v4084_v20 }
0x226e   :  { %4953 = vrot.lane.b32.xlu1 %v4952_v45, %s5271_s22  ;;  %4701 = vmatprep.subr.msk.bf16.mxu0 %vm69_vm2, %v3138_v60  ;;  %v3199_v21 = vsel %vm69_vm2, %v3138_v60, 0  ;;  %v3266_v50 = vsel %vm69_vm2, %v3142_v48, 0 }
0x226f   :  { %4968 = vrot.lane.b32.xlu0 %v4952_v45, %s5273_s23  ;;  %4594 = vmatpush3.bf16.xpose.msra.mxu0 %v3199_v21 }
0x2270   :  { %4705 = vmatprep.subr.msk.bf16.mxu1 %vm69_vm2, %v3142_v48 }
0x2271   :  { %4606 = vmatpush3.bf16.xpose.msra.mxu1 %v3266_v50 }
0x2272   :  { %4958 = vrot.lane.b32.xlu1 %v4952_v45, %s5272_s2 }
0x2273   :  { %4973 = vrot.lane.b32.xlu0 %v4972_v51, %s5272_s2 }
0x2276   :  { %4963 = vrot.lane.b32.xlu1 %v4972_v51, %s5271_s22 }
0x2277   :  { %3090 = vrot.lane.b32.xlu0 %v3048_v52, %s5273_s23 }
0x227a   :  { %3078 = vrot.lane.b32.xlu1 %v3048_v52, %s5271_s22 }
0x227b   :  { %3080 = vrot.lane.b32.xlu0 %v3049_v38, %s5271_s22 }
0x227e   :  { %3084 = vrot.lane.b32.xlu1 %v3048_v52, %s5272_s2 }
0x227f   :  { %3092 = vrot.lane.b32.xlu0 %v3049_v38, %s5273_s23 }
0x2282   :  { %4978 = vrot.lane.b32.xlu1 %v4972_v51, %s5273_s23 }
0x2286   :  { %3086 = vrot.lane.b32.xlu1 %v3049_v38, %s5272_s2 }
0x22e0   :  { %v4954_v0 = vpop.permute.xlu1 %4953 }
0x22e1   :  { %v4956_v56 = vunpack.i.h.bf16 %v4954_v0  ;;  %v4955_v62 = vunpack.i.l.bf16 %v4954_v0  ;;  %v4969_v33 = vpop.permute.xlu0 %4968 }
0x22e2   :  { %v4971_v47 = vunpack.i.h.bf16 %v4969_v33  ;;  %v4970_v22 = vunpack.i.l.bf16 %v4969_v33 }
0x22e3   :  { %v3139_v55 = vpack.c.bf16 %v4956_v56, %v4955_v62 }
0x22e4   :  { %v4959_v61 = vpop.permute.xlu1 %4958  ;;  %v3141_v54 = vpack.c.bf16 %v4971_v47, %v4970_v22 }
0x22e5   :  { %v4961_v63 = vunpack.i.h.bf16 %v4959_v61  ;;  %v4960_v41 = vunpack.i.l.bf16 %v4959_v61  ;;  %v4974_v1 = vpop.permute.xlu0 %4973  ;;  %4702 = vmatprep.subr.msk.bf16.mxu0 %vm69_vm2, %v3139_v55  ;;  %v3202_v46 = vsel %vm69_vm2, %v3139_v55, 0 }
0x22e6   :  { %4596 = vmatpush3.bf16.xpose.msra.mxu0 %v3202_v46  ;;  %v4976_v36 = vunpack.i.h.bf16 %v4974_v1  ;;  %v4975_v3 = vunpack.i.l.bf16 %v4974_v1  ;;  %v3208_v18 = vsel %vm69_vm2, %v3141_v54, 0 }
0x22e7   :  { %v3140_v5 = vpack.c.bf16 %v4961_v63, %v4960_v41 }
0x22e8   :  { %v4964_v16 = vpop.permute.xlu1 %4963  ;;  %v3144_v57 = vpack.c.bf16 %v4976_v36, %v4975_v3 }
0x22e9   :  { %v4966_v13 = vunpack.i.h.bf16 %v4964_v16  ;;  %v4965_v53 = vunpack.i.l.bf16 %v4964_v16  ;;  %v3091_v17 = vpop.permute.xlu0 %3090  ;;  %4703 = vmatprep.subr.msk.bf16.mxu0 %vm69_vm2, %v3140_v5  ;;  %v3205_v59 = vsel %vm69_vm2, %v3140_v5, 0 }
0x22ea   :  { %v3272_v29 = vsel %vm69_vm2, %v3144_v57, 0 }
0x22eb   :  { %v3143_v23 = vpack.c.bf16 %v4966_v13, %v4965_v53 }
0x22ec   :  { %v3079_v58 = vpop.permute.xlu1 %3078 }
0x22ed   :  { %v3096_v14 = vpack.c.bf16 %v3079_v58, %v3048_v52  ;;  %v3081_v12 = vpop.permute.xlu0 %3080  ;;  %4706 = vmatprep.subr.msk.bf16.mxu1 %vm69_vm2, %v3143_v23  ;;  %v3269_v2 = vsel %vm69_vm2, %v3143_v23, 0 }
0x22ee   :  { %v3098_v19 = vpack.c.bf16 %v3081_v12, %v3049_v38  ;;  %4598 = vmatpush3.bf16.xpose.msra.mxu0 %v3205_v59  ;;  %4608 = vmatpush3.bf16.xpose.msra.mxu1 %v3269_v2 }
0x22ef   :  { %4704 = vmatprep.subr.msk.bf16.mxu0 %vm69_vm2, %v3141_v54  ;;  %4601 = vmatprep.mubr.msk.bf16.mxu0 %vm69_vm2, %v3096_v14 }
0x22f0   :  { %4707 = vmatprep.subr.msk.bf16.mxu1 %vm69_vm2, %v3144_v57  ;;  %4613 = vmatprep.mubr.msk.bf16.mxu1 %vm69_vm2, %v3098_v19  ;;  %v3085_v24 = vpop.permute.xlu1 %3084 }
0x22f1   :  { %v3097_v35 = vpack.c.bf16 %v3091_v17, %v3085_v24  ;;  %v3093_v8 = vpop.permute.xlu0 %3092 }
0x22f4   :  { %v4979_v6 = vpop.permute.xlu1 %4978 }
0x22f5   :  { %v4981_v7 = vunpack.i.h.bf16 %v4979_v6  ;;  %v4980_v25 = vunpack.i.l.bf16 %v4979_v6 }
0x22f6   :  { %4600 = vmatpush3.bf16.xpose.msra.mxu0 %v3208_v18  ;;  %4610 = vmatpush3.bf16.xpose.msra.mxu1 %v3272_v29 }
0x22f7   :  { %v3145_v28 = vpack.c.bf16 %v4981_v7, %v4980_v25 }
0x22f8   :  { %v3087_v37 = vpop.permute.xlu1 %3086 }
0x22f9   :  { %4708 = vmatprep.subr.msk.bf16.mxu1 %vm69_vm2, %v3145_v28  ;;  %v3275_v34 = vsel %vm69_vm2, %v3145_v28, 0  ;;  %v3099_v39 = vpack.c.bf16 %v3093_v8, %v3087_v37 }
0x22fd   :  { %4602 = vmatmul.mubr.msk.bf16.vlgmr.msra.gmra.mrb[48].mxu0 %vm69_vm2, %v3097_v35 }
0x22fe   :  { %4612 = vmatpush3.bf16.xpose.msra.mxu1 %v3275_v34 }
0x22ff   :  { %4641 = vmatprep.subr.bf16.mxu1 %v5267_v15 }
0x2305   :  { %4614 = vmatmul.mubr.msk.bf16.vlgmr.msra.gmra.mrb[52].mxu1 %vm69_vm2, %v3099_v39 }
0x2306   :  { %4645 = vmatprep.mubr.msk.bf16.mxu1 %vm5268_vm1, %v5267_v15 }
0x23d0   :  { %v4603_v43 = vpop.f32.mrb[48].mxu0 }
0x23d1   :  { %v6357_v44 = vadd.f32 %v4603_v43, %v5510_v11  ;;  %v3244_v45 = vpop.f32.mrb[49].mxu0 }
0x23d2   :  { %v6360_v60 = vadd.f32 %v3244_v45, %v5504_v9  ;;  %v4604_v20 = vpop.f32.mrb[50].mxu0 }
0x23d3   :  { %v3256_v21 = vadd.f32 %v4604_v20, %v5530_v30  ;;  %v3247_v48 = vpop.f32.mrb[51].mxu0  ;;  %v3332_v50 = vsel %vm556_vm5, %v6357_v44, -inf }
0x23d4   :  { %3333 = vmax.xlane.f32.xlu0 %v3332_v50  ;;  %v3326_v51 = vsel %vm556_vm5, %v6360_v60, -inf  ;;  %v3248_v52 = vadd.f32 %v3247_v48, %v5507_v10 }
0x23d5   :  { %3327 = vmax.xlane.f32.xlu1 %v3326_v51  ;;  %v3335_v11 = vsel %vm556_vm5, %v3256_v21, -inf }
0x23d6   :  { %v3329_v55 = vsel %vm556_vm5, %v3248_v52, -inf }
0x23d8   :  { %v4615_v38 = vpop.f32.mrb[52].mxu1  ;;  %3336 = vmax.xlane.f32.xlu0 %v3335_v11 }
0x23d9   :  { %v3320_v9 = vadd.f32 %v4615_v38, %v5542_v42  ;;  %v3311_v0 = vpop.f32.mrb[53].mxu1 }
0x23da   :  { %v4616_v56 = vpop.f32.mrb[54].mxu1  ;;  %v3312_v30 = vadd.f32 %v3311_v0, %v5555_v49 }
0x23db   :  { %v3323_v62 = vadd.f32 %v4616_v56, %v5525_v27  ;;  %v3314_v33 = vpop.f32.mrb[55].mxu1  ;;  %v3344_v61 = vsel %vm556_vm5, %v3320_v9, -inf }
0x23dc   :  { %3330 = vmax.xlane.f32.xlu0 %v3329_v55  ;;  %3345 = vmax.xlane.f32.xlu1 %v3344_v61  ;;  %v3315_v10 = vadd.f32 %v3314_v33, %v5539_v40  ;;  %v3338_v41 = vsel %vm556_vm5, %v3312_v30, -inf }
0x23dd   :  { %v3347_v63 = vsel %vm556_vm5, %v3323_v62, -inf }
0x23de   :  { %v3341_v42 = vsel %vm556_vm5, %v3315_v10, -inf }
0x23e0   :  { %3348 = vmax.xlane.f32.xlu0 %v3347_v63  ;;  %3339 = vmax.xlane.f32.xlu1 %v3338_v41 }
0x23e4   :  { %3342 = vmax.xlane.f32.xlu0 %v3341_v42 }
0x23f1   :  { %3061 = vrot.lane.b32.xlu1 %v6297_v31, %s5279_s20 }
0x23fa   :  { %3063 = vrot.lane.b32.xlu0 %v6299_v32, %s5279_s20 }
0x2461   :  { %v3334_v27 = vpop.xlane.xlu0 %3333 }
0x2462   :  { %v3328_v49 = vpop.xlane.xlu1 %3327  ;;  %v3352_v43 = vsub.f32 %v6357_v44, %v3334_v27 }
0x2463   :  { %v3350_v20 = vsub.f32 %v6360_v60, %v3328_v49 }
0x2464   :  { %v3362_v45 = vmul.f32 1.442695, %v3352_v43 }
0x2465   :  { %v3337_v1 = vpop.xlane.xlu0 %3336 }
0x2466   :  { %v3353_v46 = vsub.f32 %v3256_v21, %v3337_v1  ;;  %v3358_v21 = vmul.f32 1.442695, %v3350_v20 }
0x2468   :  { %v3364_v40 = vmul.f32 1.442695, %v3353_v46 }
0x2469   :  { %v3331_v5 = vpop.xlane.xlu0 %3330  ;;  %v3346_v16 = vpop.xlane.xlu1 %3345 }
0x246a   :  { %5207 = vpow2.f32 %v3364_v40  ;;  %v3351_v47 = vsub.f32 %v3248_v52, %v3331_v5  ;;  %v3356_v22 = vsub.f32 %v3320_v9, %v3346_v16 }
0x246c   :  { %v3370_v13 = vmul.f32 1.442695, %v3356_v22  ;;  %v3360_v53 = vmul.f32 1.442695, %v3351_v47 }
0x246d   :  { %v3349_v17 = vpop.xlane.xlu0 %3348  ;;  %v3340_v36 = vpop.xlane.xlu1 %3339 }
0x246e   :  { %v3354_v3 = vsub.f32 %v3312_v30, %v3340_v36  ;;  %5209 = vpow2.f32 %v3370_v13  ;;  %v3357_v31 = vsub.f32 %v3323_v62, %v3349_v17 }
0x246f   :  { %5211 = vpow2.f32 %v3360_v53 }
0x2470   :  { %v3366_v23 = vmul.f32 1.442695, %v3354_v3  ;;  %v3372_v14 = vmul.f32 1.442695, %v3357_v31 }
0x2471   :  { %v3343_v32 = vpop.xlane.xlu0 %3342  ;;  %v3062_v58 = vpop.permute.xlu1 %3061 }
0x2472   :  { %4081 = vst.msk [vmem:[%s6568_s18 + $0x30] sm:$0xff] %vm131_vm0, %v3062_v58  ;;  %5213 = vpow2.f32 %v3366_v23  ;;  %v3355_v12 = vsub.f32 %v3315_v10, %v3343_v32 }
0x2473   :  { %5215 = vpow2.f32 %v3372_v14 }
0x2474   :  { %v6386_v54 = vpop.eup %5207  ;;  %v3368_v19 = vmul.f32 1.442695, %v3355_v12 }
0x2475   :  { %v6388_v59 = vpop.permute.xlu0 %3063  ;;  %v3383_v2 = vsel %vm556_vm5, %v6386_v54, 0.0 }
0x2476   :  { %4082 = vst.msk [vmem:[%s6568_s18 + $0x38] sm:$0xff] %vm131_vm0, %v6388_v59  ;;  %3384 = vadd.xlane.f32.xlu0 %v3383_v2  ;;  %5217 = vpow2.f32 %v3368_v19 }
0x2477   :  { %5219 = vpow2.f32 %v3362_v45 }
0x2478   :  { %v6397_v57 = vpop.eup %5209  ;;  %5221 = vpow2.f32 %v3358_v21 }
0x2479   :  { %v3392_v6 = vsel %vm556_vm5, %v6397_v57, 0.0  ;;  %v6404_v18 = vpop.eup %5211 }
0x247a   :  { %3393 = vadd.xlane.f32.xlu0 %v3392_v6  ;;  %v3377_v29 = vsel %vm556_vm5, %v6404_v18, 0.0 }
0x247c   :  { %v6409_v28 = vpop.eup %5213 }
0x247d   :  { %v4085_v24 = vld [vmem:[%s6554_s4 + $0x30] sm:$0xff]  ;;  %v3386_v35 = vsel %vm556_vm5, %v6409_v28, 0.0  ;;  %v6414_v34 = vpop.eup %5215  ;;  %v4086_v44 = vld [vmem:[%s6554_s4 + $0x38] sm:$0xff] }
0x247e   :  { %v4982_v7 = vpack.i.bf16 %v3062_v58, %v4085_v24  ;;  %v3184_v25 = vpack.c.bf16 %v3062_v58, %v4085_v24  ;;  %3378 = vadd.xlane.f32.xlu0 %v3377_v29  ;;  %v3395_v37 = vsel %vm556_vm5, %v6414_v34, 0.0  ;;  %v4997_v11 = vpack.i.bf16 %v6388_v59, %v4086_v44 }
0x247f   :  { %v3188_v40 = vpack.c.bf16 %v6388_v59, %v4086_v44 }
0x2480   :  { %4983 = vrot.lane.b32.xlu1 %v4982_v7, %s5271_s22  ;;  %4617 = vmatprep.subr.bf16.mxu0 %v3184_v25  ;;  %v6418_v8 = vpop.eup %5217 }
0x2481   :  { %4618 = vmatpush3.bf16.msra.mxu0 %v3184_v25  ;;  %v3389_v39 = vsel %vm556_vm5, %v6418_v8, 0.0  ;;  %v5220_v48 = vpop.eup %5219 }
0x2482   :  { %3387 = vadd.xlane.f32.xlu0 %v3386_v35  ;;  %v3380_v50 = vsel %vm556_vm5, %v5220_v48, 0.0  ;;  %v5222_v51 = vpop.eup %5221 }
0x2483   :  { %v3374_v52 = vsel %vm556_vm5, %v5222_v51, 0.0 }
0x2484   :  { %4988 = vrot.lane.b32.xlu1 %v4982_v7, %s5272_s2 }
0x2486   :  { %3396 = vadd.xlane.f32.xlu0 %v3395_v37 }
0x248a   :  { %3390 = vadd.xlane.f32.xlu0 %v3389_v39 }
0x24a0   :  { %4993 = vrot.lane.b32.xlu0 %v4982_v7, %s5273_s23 }
0x24a8   :  { %3381 = vadd.xlane.f32.xlu1 %v3380_v50 }
0x24ac   :  { %3375 = vadd.xlane.f32.xlu1 %v3374_v52 }
0x24bd   :  { %4998 = vrot.lane.b32.xlu1 %v4997_v11, %s5271_s22 }
0x24c1   :  { %5003 = vrot.lane.b32.xlu1 %v4997_v11, %s5272_s2 }
0x24c5   :  { %5008 = vrot.lane.b32.xlu1 %v4997_v11, %s5273_s23 }
0x24f2   :  { %v4984_v60 = vpop.permute.xlu1 %4983 }
0x24f3   :  { %v4986_v38 = vunpack.i.h.bf16 %v4984_v60  ;;  %v4985_v9 = vunpack.i.l.bf16 %v4984_v60 }
0x24f5   :  { %v3185_v0 = vpack.c.bf16 %v4986_v38, %v4985_v9 }
0x24f6   :  { %v4989_v56 = vpop.permute.xlu1 %4988 }
0x24f7   :  { %v4991_v30 = vunpack.i.h.bf16 %v4989_v56  ;;  %v4990_v62 = vunpack.i.l.bf16 %v4989_v56  ;;  %4619 = vmatprep.subr.bf16.mxu0 %v3185_v0 }
0x24f8   :  { %4620 = vmatpush3.bf16.msra.mxu0 %v3185_v0 }
0x24f9   :  { %v3186_v33 = vpack.c.bf16 %v4991_v30, %v4990_v62 }
0x24fb   :  { %4621 = vmatprep.subr.bf16.mxu0 %v3186_v33 }
0x24fc   :  { %4622 = vmatpush3.bf16.msra.mxu0 %v3186_v33 }
0x2503   :  { %v3385_v55 = vpop.xlane.xlu0 %3384 }
0x2504   :  { %5223 = vrcp.f32 %v3385_v55 }
0x2507   :  { %v3394_v61 = vpop.xlane.xlu0 %3393 }
0x250b   :  { %v3379_v10 = vpop.xlane.xlu0 %3378 }
0x250c   :  { %5225 = vrcp.f32 %v3379_v10 }
0x250e   :  { %v5224_v47 = vpop.eup %5223 }
0x250f   :  { %v3388_v63 = vpop.xlane.xlu0 %3387  ;;  %v3409_v12 = vmul.f32 %v5224_v47, %v6386_v54  ;;  %v4100_v47 = vld [vmem:[%s6560_s10 + $0x3] ss:$0 sm:$0xff] }
0x2513   :  { %v3397_v41 = vpop.xlane.xlu0 %3396 }
0x2516   :  { %v5226_v13 = vpop.eup %5225 }
0x2517   :  { %v3391_v42 = vpop.xlane.xlu0 %3390  ;;  %v3407_v58 = vmul.f32 %v5226_v13, %v6404_v18 }
0x251b   :  { %v4994_v27 = vpop.permute.xlu0 %4993 }
0x251c   :  { %v4996_v49 = vunpack.i.h.bf16 %v4994_v27  ;;  %v4995_v1 = vunpack.i.l.bf16 %v4994_v27 }
0x251e   :  { %v3187_v46 = vpack.c.bf16 %v4996_v49, %v4995_v1 }
0x2520   :  { %4623 = vmatprep.subr.bf16.mxu0 %v3187_v46 }
0x2521   :  { %4624 = vmatpush3.bf16.msra.mxu0 %v3187_v46 }
0x2522   :  { %4629 = vmatprep.subr.bf16.mxu0 %v3188_v40 }
0x2535   :  { %v3382_v5 = vpop.xlane.xlu1 %3381 }
0x2536   :  { %5227 = vrcp.f32 %v3382_v5 }
0x2537   :  { %5229 = vrcp.f32 %v3391_v42 }
0x2538   :  { %5231 = vrcp.f32 %v3388_v63 }
0x2539   :  { %v3376_v16 = vpop.xlane.xlu1 %3375 }
0x253a   :  { %5233 = vrcp.f32 %v3376_v16 }
0x253b   :  { %5235 = vrcp.f32 %v3397_v41 }
0x253c   :  { %5237 = vrcp.f32 %v3394_v61 }
0x253d   :  { %v4999_v22 = vpop.permute.xlu1 %4998 }
0x253e   :  { %v5001_v59 = vunpack.i.h.bf16 %v4999_v22  ;;  %v5000_v2 = vunpack.i.l.bf16 %v4999_v22 }
0x2540   :  { %v5228_v53 = vpop.eup %5227  ;;  %v3189_v25 = vpack.c.bf16 %v5001_v59, %v5000_v2 }
0x2541   :  { %v5230_v17 = vpop.eup %5229  ;;  %v3408_v31 = vmul.f32 %v5228_v53, %v5220_v48  ;;  %v5004_v23 = vpop.permute.xlu1 %5003 }
0x2542   :  { %v5232_v36 = vpop.eup %5231  ;;  %v3411_v14 = vmul.f32 %v5230_v17, %v6418_v8  ;;  %v5006_v29 = vunpack.i.h.bf16 %v5004_v23  ;;  %v5005_v35 = vunpack.i.l.bf16 %v5004_v23 }
0x2543   :  { %v3410_v24 = vmul.f32 %v5232_v36, %v6409_v28  ;;  %v3415_v6 = vpack.c.bf16 %v3409_v12, %v3408_v31 }
0x2544   :  { %v5234_v3 = vpop.eup %5233  ;;  %v3190_v54 = vpack.c.bf16 %v5006_v29, %v5005_v35  ;;  %v5074_v29 = vld [vmem:[%s6563_s13 + $0x38] sm:$0xff]   ;;  %v5075_v35 = vld [vmem:[%s6564_s14 + $0xc0] sm:$0xff]  }
0x2545   :  { %v3406_v32 = vmul.f32 %v5234_v3, %v5222_v51  ;;  %v3416_v7 = vpack.c.bf16 %v3411_v14, %v3410_v24  ;;  %v5009_v18 = vpop.permute.xlu1 %5008  ;;  %v5236_v28 = vpop.eup %5235 }
0x2546   :  { %v5011_v37 = vunpack.i.h.bf16 %v5009_v18  ;;  %v5010_v8 = vunpack.i.l.bf16 %v5009_v18  ;;  %v5238_v43 = vpop.eup %5237  ;;  %v3413_v45 = vmul.f32 %v5236_v28, %v6414_v34  ;;  %v5071_v34 = vld [vmem:[%s6559_s9 + $0x30] sm:$0xff]   ;;  %v5076_v18 = vld [vmem:[%s6564_s14 + $0xc8] sm:$0xff]  }
0x2547   :  { %v3414_v19 = vpack.c.bf16 %v3407_v58, %v3406_v32  ;;  %v3412_v20 = vmul.f32 %v5238_v43, %v6397_v57  ;;  %4642 = vmatpush3.bf16.msra.mxu1 %v5071_v34  ;;  %v5072_v57 = vld [vmem:[%s6559_s9 + $0x38] sm:$0xff]   ;;  %v5080_v28 = vld [vmem:[%s6564_s14 + $0xe8] sm:$0xff]  }
0x2548   :  { %v3191_v39 = vpack.c.bf16 %v5011_v37, %v5010_v8  ;;  %4643 = vmatprep.subr.bf16.mxu1 %v5267_v15  ;;  %v5078_v37 = vld [vmem:[%s6564_s14 + $0xd8] sm:$0xff]   ;;  %v5079_v8 = vld [vmem:[%s6564_s14 + $0xe0] sm:$0xff]  }
0x2549   :  { %4625 = vmatprep.mubr.msk.bf16.mxu0 %vm556_vm5, %v3414_v19  ;;  %v3417_v21 = vpack.c.bf16 %v3413_v45, %v3412_v20 }
0x254a   :  { %4626 = vmatmul.mubr.msk.bf16.vlgmr.msra.gmra.mrb[52].mxu0 %vm556_vm5, %v3415_v6 }
0x254b   :  { %4630 = vmatpush3.bf16.msra.mxu0 %v3188_v40  ;;  %4637 = vmatprep.mubr.msk.bf16.mxu0 %vm556_vm5, %v3416_v7 }
0x254c   :  { %4631 = vmatprep.subr.bf16.mxu0 %v3189_v25  ;;  %4644 = vmatpush3.bf16.msra.mxu1 %v5072_v57 }
0x254d   :  { %4649 = vmatprep.subr.bf16.mxu1 %v5267_v15 }
0x254f   :  { %4632 = vmatpush3.bf16.msra.mxu0 %v3189_v25  ;;  %v5073_v25 = vld [vmem:[%s6563_s13 + $0x30] sm:$0xff]  }
0x2550   :  { %4633 = vmatprep.subr.bf16.mxu0 %v3190_v54 }
0x2553   :  { %4634 = vmatpush3.bf16.msra.mxu0 %v3190_v54  ;;  %v5077_v54 = vld [vmem:[%s6564_s14 + $0xd0] sm:$0xff]  }
0x2554   :  { %4635 = vmatprep.subr.bf16.mxu0 %v3191_v39 }
0x2557   :  { %4636 = vmatpush3.bf16.msra.mxu0 %v3191_v39 }
0x2558   :  { %4657 = vmatprep.subr.bf16.mxu0 %v5267_v15 }
0x255a   :  { %4638 = vmatmul.mubr.msk.bf16.vlgmr.msra.gmra.mrb[56].mxu0 %vm556_vm5, %v3417_v21 }
0x255b   :  { %4673 = vmatprep.mubr.msk.bf16.mxu0 %vm5268_vm1, %v5267_v15  ;;  %4658 = vmatpush3.bf16.msra.mxu0 %v5075_v35 }
0x255c   :  { %4659 = vmatprep.subr.bf16.mxu0 %v5267_v15 }
0x255f   :  { %4660 = vmatpush3.bf16.msra.mxu0 %v5076_v18 }
0x2560   :  { %4661 = vmatprep.subr.bf16.mxu0 %v5267_v15 }
0x2563   :  { %4662 = vmatpush3.bf16.msra.mxu0 %v5077_v54 }
0x2564   :  { %4663 = vmatprep.subr.bf16.mxu0 %v5267_v15 }
0x2567   :  { %4664 = vmatpush3.bf16.msra.mxu0 %v5078_v37 }
0x2568   :  { %4665 = vmatprep.subr.bf16.mxu0 %v5267_v15 }
0x256b   :  { %4666 = vmatpush3.bf16.msra.mxu0 %v5079_v8 }
0x256c   :  { %4667 = vmatprep.subr.bf16.mxu0 %v5267_v15 }
0x256f   :  { %4668 = vmatpush3.bf16.msra.mxu0 %v5080_v28 }
0x2570   :  { %4669 = vmatprep.subr.bf16.mxu0 %v5267_v15 }
0x261d   :  { %v4627_v48 = vpop.f32.mrb[52].mxu0 }
0x261e   :  { %v3458_v50 = vpop.f32.mrb[53].mxu0 }
0x261f   :  { %v4628_v51 = vpop.f32.mrb[54].mxu0 }
0x2620   :  { %v3461_v52 = vpop.f32.mrb[55].mxu0 }
0x262d   :  { %v4639_v44 = vpop.f32.mrb[56].mxu0 }
0x262e   :  { %v5012_v11 = vpack.i.bf16 %v4639_v44, %v4627_v48  ;;  %v3513_v60 = vpop.f32.mrb[57].mxu0 }
0x262f   :  { %v4640_v38 = vpop.f32.mrb[58].mxu0 }
0x2630   :  { %v5022_v9 = vpack.i.bf16 %v4640_v38, %v4628_v51  ;;  %5013 = vrot.lane.b32.xlu1 %v5012_v11, %s6587_s5  ;;  %v3516_v0 = vpop.f32.mrb[59].mxu0  ;;  %v4107_v11 = vld [vmem:[%s6562_s12 + $0x3] ss:$0 sm:$0xff] }
0x2631   :  { %v5017_v56 = vpack.i.bf16 %v3516_v0, %v3461_v52  ;;  %v4105_v52 = vld [vmem:[%s6561_s11 + $0x3] ss:$0 sm:$0xff] }
0x2634   :  { %5018 = vrot.lane.b32.xlu1 %v5017_v56, %s6586_s24  ;;  %v5081_v56 = vld [vmem:[%s6564_s14 + $0xf0] sm:$0xff]  }
0x2635   :  { %4670 = vmatpush3.bf16.msra.mxu0 %v5081_v56 }
0x2636   :  { %4671 = vmatprep.subr.bf16.mxu0 %v5267_v15 }
0x2638   :  { %5023 = vrot.lane.b32.xlu1 %v5022_v9, %s6585_s19  ;;  %s5282_s19 = smov [#allocation2]  }
0x2639   :  { %s3864_s10 = sshll.u32 %s5282_s19, 4  ;;  %s3865_s10 = int_to_ptr.vmem [resolvable:$true] %s3864_s10 }
0x263a   :  { %p5248_p1 = scmp.lt.s32.totalorder %s3865_s10, %s3865_s10 }
0x26a2   :  { %v5014_v30 = vpop.permute.xlu1 %5013 }
0x26a3   :  { %v5016_v63 = vunpack.i.h.bf16 %v5014_v30  ;;  %v5015_v41 = vunpack.i.l.bf16 %v5014_v30  ;;  %v5082_v30 = vld [vmem:[%s6564_s14 + $0xf8] sm:$0xff]   ;;  %s5243_s14 = scalar_lea.vmem %s3865_s10, 256 }
0x26a4   :  { %4672 = vmatpush3.bf16.msra.mxu0 %v5082_v30  ;;  %p5244_p0 = scmp.ne.s32.totalorder %s3865_s10, %s5243_s14  ;;  %p5249_p2 = scmp.lt.s32.totalorder %s5243_s14, %s5243_s14 }
0x26a6   :  { %v5019_v62 = vpop.permute.xlu1 %5018  ;;  %p5250_p3 = por %p5249_p2, %p5248_p1 }
0x26a7   :  { %v5021_v33 = vunpack.i.h.bf16 %v5019_v62  ;;  %v5020_v55 = vunpack.i.l.bf16 %v5019_v62 }
0x26a8   :  { %p5251_p4 = pnand %p5250_p3, %p5244_p0 }
0x26a9   :  { %v3553_v61 = vsel %vm69_vm2, %v3513_v60, %v5021_v33  ;;  %v3552_v10 = vsel %vm69_vm2, %v3458_v50, %v5020_v55 }
0x26aa   :  { %v5024_v42 = vpop.permute.xlu1 %5023  ;;  %v3554_v1 = vsel %vm128_vm3, %v3552_v10, %v5015_v41  ;;  %v3555_v46 = vsel %vm128_vm3, %v3553_v61, %v5016_v63 }
0x26ab   :  { %v5026_v27 = vunpack.i.h.bf16 %v5024_v42  ;;  %v5025_v49 = vunpack.i.l.bf16 %v5024_v42  ;;  %v4132_v42 = vld [vmem:[%s6565_s15 + $0x3] ss:$0 sm:$0xff] }
0x26ad   :  { %v3556_v40 = vsel %vm787_vm6, %v3554_v1, %v5025_v49  ;;  %v3557_v5 = vsel %vm787_vm6, %v3555_v46, %v5026_v27 }
0x26ae   :  { %v3558_v16 = vpack.c.bf16 %v3557_v5, %v3556_v40 }
0x26b0   :  { %4646 = vmatmul.mubr.msk.bf16.vlgmr.msra.gmra.mrb[56].mxu1 %vm131_vm0, %v3558_v16 }
0x26b1   :  { %4653 = vmatprep.mubr.msk.bf16.mxu1 %vm5268_vm1, %v5267_v15  ;;  %4650 = vmatpush3.bf16.msra.mxu1 %v5073_v25 }
0x26b2   :  { %4651 = vmatprep.subr.bf16.mxu1 %v5267_v15 }
0x26b5   :  { %4652 = vmatpush3.bf16.msra.mxu1 %v5074_v29 }
0x2783   :  { %v3621_v22 = vpop.f32.mrb[56].mxu1 }
0x2784   :  { %v3622_v13 = vadd.f32 %v4100_v47, %v3621_v22  ;;  %v4647_v53 = vpop.f32.mrb[57].mxu1 }
0x2785   :  { %v3624_v17 = vpop.f32.mrb[58].mxu1 }
0x2786   :  { %v6472_v36 = vadd.f32 %v3622_v13, %v6287_v4  ;;  %v3625_v3 = vadd.f32 %v4100_v47, %v3624_v17  ;;  %v4648_v31 = vpop.f32.mrb[59].mxu1 }
0x2788   :  { %v6475_v23 = vadd.f32 %v3625_v3, %v6289_v26  ;;  %v3630_v32 = vsel %vm131_vm0, %v6472_v36, 0.0 }
0x2789   :  { %3631 = vadd.xlane.f32.xlu0 %v3630_v32 }
0x278a   :  { %v3633_v58 = vsel %vm131_vm0, %v6475_v23, 0.0 }
0x278b   :  { %3634 = vadd.xlane.f32.xlu1 %v3633_v58 }
0x2816   :  { %v3632_v14 = vpop.xlane.xlu0 %3631 }
0x2817   :  { %v3636_v12 = vmul.f32 0.03125, %v3632_v14 }
0x2818   :  { %v3635_v59 = vpop.xlane.xlu1 %3634 }
0x2819   :  { %v3638_v2 = vsub.f32 %v6472_v36, %v3636_v12  ;;  %v3637_v4 = vmul.f32 0.03125, %v3635_v59 }
0x281b   :  { %v3639_v19 = vsub.f32 %v6475_v23, %v3637_v4  ;;  %v3640_v24 = vmul.f32 %v3638_v2, %v3638_v2 }
0x281d   :  { %v3642_v26 = vsel %vm131_vm0, %v3640_v24, 0.0  ;;  %v3641_v6 = vmul.f32 %v3639_v19, %v3639_v19 }
0x281e   :  { %3643 = vadd.xlane.f32.xlu0 %v3642_v26 }
0x281f   :  { %v3645_v7 = vsel %vm131_vm0, %v3641_v6, 0.0 }
0x2822   :  { %3646 = vadd.xlane.f32.xlu0 %v3645_v7 }
0x28ab   :  { %v3644_v39 = vpop.xlane.xlu0 %3643 }
0x28ac   :  { %v3648_v43 = vmul.f32 0.03125, %v3644_v39 }
0x28ae   :  { %v3650_v45 = vadd.f32 1e-05, %v3648_v43 }
0x28af   :  { %v3647_v20 = vpop.xlane.xlu0 %3646 }
0x28b0   :  { %5239 = vrsqrt.f32 %v3650_v45  ;;  %v3649_v21 = vmul.f32 0.03125, %v3647_v20 }
0x28b2   :  { %v3651_v48 = vadd.f32 1e-05, %v3649_v21 }
0x28b4   :  { %5241 = vrsqrt.f32 %v3651_v48 }
0x28ba   :  { %v5240_v50 = vpop.eup %5239 }
0x28bb   :  { %v3654_v51 = vmul.f32 %v5240_v50, %v3638_v2 }
0x28bd   :  { %v3664_v57 = vmul.f32 %v4105_v52, %v3654_v51 }
0x28be   :  { %v5242_v34 = vpop.eup %5241 }
0x28bf   :  { %v3655_v44 = vmul.f32 %v5242_v34, %v3639_v19  ;;  %v3674_v38 = vadd.f32 %v4107_v11, %v3664_v57 }
0x28c1   :  { %v3665_v60 = vmul.f32 %v4105_v52, %v3655_v44 }
0x28c3   :  { %v3675_v9 = vadd.f32 %v4107_v11, %v3665_v60 }
0x28c5   :  { %v3676_v0 = vpack.c.bf16 %v3675_v9, %v3674_v38 }
0x28c7   :  { %4654 = vmatmul.mubr.msk.bf16.vlgmr.msra.gmra.mrb[60].mxu1 %vm131_vm0, %v3676_v0 }
0x299a   :  { %v3731_v62 = vpop.f32.mrb[60].mxu1 }
0x299b   :  { %v4655_v33 = vpop.f32.mrb[61].mxu1  ;;  %v3738_v61 = vmax.f32 %v3731_v62, 0.0 }
0x299c   :  { %v3734_v55 = vpop.f32.mrb[62].mxu1 }
0x299d   :  { %v3739_v10 = vmax.f32 %v3734_v55, 0.0  ;;  %v4656_v63 = vpop.f32.mrb[63].mxu1 }
0x299f   :  { %v3740_v41 = vpack.c.bf16 %v3739_v10, %v3738_v61 }
0x29a1   :  { %4674 = vmatmul.mubr.bf16.vlgmr.msra.gmra.mrb[60].mxu0 %v3740_v41 }
0x2a74   :  { %v3848_v27 = vpop.f32.mrb[60].mxu0 }
0x2a75   :  { %v3849_v49 = vadd.f32 %v4132_v42, %v3848_v27  ;;  %v4675_v15 = vpop.f32.mrb[61].mxu0 }
0x2a76   :  { %v3851_v1 = vpop.f32.mrb[62].mxu0 }
0x2a77   :  { %v3855_v46 = vadd.f32 %v3849_v49, %v6472_v36  ;;  %v3852_v40 = vadd.f32 %v4132_v42, %v3851_v1  ;;  %v4676_v5 = vpop.f32.mrb[63].mxu0 }
0x2a79   :  { %3857 = vst.msk [vmem:[#allocation2] sm:$0xff] %vm131_vm0, %v3855_v46  ;;  %v3856_v16 = vadd.f32 %v3852_v40, %v6475_v23 }
0x2a7b   :  { %3858 = vst.msk [vmem:[#allocation2 + $0x8] sm:$0xff] %vm131_vm0, %v3856_v16 }
0x2a7c   :  { %5254 = shalt.err (!%p5251_p4)
}
0x2a7d   :  { %s5255_s26 = scalar_lea.hbm %s6566_s16, 256 }
0x2a7e   :  { %p5256_p5 = scmp.ne.s32.totalorder %s6566_s16, %s5255_s26  ;;  %p5259_p6 = scmp.lt.u32.totalorder %s5255_s26, %s6566_s16 }
0x2a80   :  { %p5261_p7 = pnand %p5259_p6, %p5256_p5 }
0x2a82   :  { %5264 = shalt.err (!%p5261_p7)
}
0x2a83   :  { %s5283_s25 = smov 128  }
0x2a84   :  { %3870 = dma.vmem_to_hbm [thread:$0]  %s3865_s10, 256, %s6566_s16, [#allocation3], %s5283_s25, %s5283_s25, %s6586_s24  }
0x2a85   :  { %5265 = dma.done.wait [#allocation3], 256  }
0x2a86   :  { %5266 = vsyncadd [#allocation3], 4294967040 }
0x2a87   :  { %3882 = vsyncpa [#allocation3], 1 }

</bundles_post_ra>
